<compile_context>
chip_gen: v5e
topology: v5e:2x2
jax: 0.10.0
libtpu: 0.0.40
codegen_flags: <defaults>
</compile_context>

<pallas_src>
import math

import numpy as np
import jax
import jax.numpy as jnp
from jax.experimental import pallas as pl
from jax.experimental.pallas import tpu as pltpu

# ----------------------------- model config (small, consistent w/ module) ---
INPUT_DIM = 16
HIDDEN_DIM = 32
NUM_LAYERS = 4
CONDITION_DIM = 16
TIME_EMBED_DIM = 32
BATCH = 4


# ----------------------------- block configuration ---------------------------
def _block_configs():
    nl2 = NUM_LAYERS // 2
    enc = [(f"enc{i}", HIDDEN_DIM * 2 ** i, HIDDEN_DIM * 2 ** (i + 1), i >= 1)
           for i in range(nl2)]
    mid = ("mid", HIDDEN_DIM * 2 ** nl2, HIDDEN_DIM * 2 ** nl2, True)
    # Decoder in-channels follow the reference forward() dataflow:
    #   concat(h_prev, reversed(skip)) -> prev_out + skip_width channels.
    skip_w = [co for (_, _, co, _) in enc]
    dec, prev = [], mid[2]
    for i in range(nl2):
        c_out = HIDDEN_DIM * 2 ** (nl2 - i - 1)
        dec.append((f"dec{i}", prev + skip_w[nl2 - 1 - i], c_out, (nl2 - i - 1) >= 1))
        prev = c_out
    return enc, mid, dec


_ENC, _MID, _DEC = _block_configs()
_ALL_BLOCKS = _ENC + [_MID] + _DEC


# ----------------------------- static slab layout -----------------------------
def _build_layout():
    mats, vecs = {}, {}
    state = {"mrow": 0, "vlane": 0}

    def am(name, r, c):                       # matrix slab entry (8-row aligned)
        mats[name] = (state["mrow"], r, c)
        state["mrow"] += ((r + 7) // 8) * 8

    def av(name, w):                          # vector slab entry (128-lane aligned)
        vecs[name] = (state["vlane"], w)
        state["vlane"] += ((w + 127) // 128) * 128

    # GroupNorm folded factor matrices M = P@Q (one per unique (C, groups) key).
    gn_keys = {(HIDDEN_DIM, 8)}
    for (_, ci, co, _) in _ENC + [_MID]:
        gn_keys.add((ci, 8)); gn_keys.add((co, 8))
    for (_, ci, co, _) in _DEC:
        gn_keys.add((ci // 2, 4)); gn_keys.add((co, 8))
    for (c, g) in sorted(gn_keys):
        am(f"gnM_{c}_{g}", c, c)

    # Globals.
    am("time_w1", TIME_EMBED_DIM, HIDDEN_DIM); av("time_b1", HIDDEN_DIM)
    am("time_w2", HIDDEN_DIM, HIDDEN_DIM);     av("time_b2", HIDDEN_DIM)
    am("in_w", INPUT_DIM, HIDDEN_DIM);         av("in_b", HIDDEN_DIM)
    am("cond_w", CONDITION_DIM, HIDDEN_DIM);   av("cond_b", HIDDEN_DIM)
    am("out_w", HIDDEN_DIM, INPUT_DIM)
    av("out_gn_w", HIDDEN_DIM); av("out_gn_b", HIDDEN_DIM); av("out_b", INPUT_DIM)

    tp_total = sum(co for (_, _, co, _) in _ALL_BLOCKS)
    av("tpb_all", tp_total)

    tp_offs, off = {}, 0
    for (p, ci, co, attn) in _ALL_BLOCKS:
        tp_offs[p] = off
        off += co
        if p.startswith("dec"):
            ch = ci // 2
            av(p + ".gn1a_w", ch); av(p + ".gn1a_b", ch)
            av(p + ".gn1b_w", ch); av(p + ".gn1b_b", ch)
            am(p + ".w1a", ch, co); am(p + ".w1b", ch, co); av(p + ".b1", co)
            am(p + ".rwa", ch, co); am(p + ".rwb", ch, co); av(p + ".rb", co)
        else:
            av(p + ".gn1_w", ci); av(p + ".gn1_b", ci)
            am(p + ".w1", ci, co); av(p + ".b1", co)
            if ci != co:
                am(p + ".rw", ci, co); av(p + ".rb", co)
        av(p + ".gn2_w", co); av(p + ".gn2_b", co)
        am(p + ".w2", co, co); av(p + ".b2", co)
        if attn:
            am(p + ".aw", co, co); av(p + ".ab", co)
            av(p + ".ln_w", co); av(p + ".ln_b", co)

    max_c = max(c for (_, _, c) in mats.values())
    mat_cols = ((max_c + 127) // 128) * 128
    return mats, vecs, state["mrow"], mat_cols, state["vlane"], tp_offs, tp_total


_MAT, _VEC, _MAT_ROWS, _MAT_COLS, _VEC_WIDTH, _TP_OFFS, _TP_TOTAL = _build_layout()

# Activation-slab lane offsets: [x | sin/cos time emb | condition | cond mask].
_ACT_X0 = 0
_ACT_E0 = INPUT_DIM
_ACT_C0 = INPUT_DIM + TIME_EMBED_DIM
_ACT_M0 = INPUT_DIM + TIME_EMBED_DIM + CONDITION_DIM
_ACT_W = _ACT_M0 + 1

_SLAB_MAT_ELEMS = sum(r * c for (_, r, c) in _MAT.values())


# ----------------------------- fused forward kernel --------------------------
def _fused_kernel(act_ref, mat_ref, vec_ref, tpw_ref, out_ref):
    def dot(a, b):
        return jnp.dot(a, b, preferred_element_type=jnp.float32)

    def M(name):                              # static slice of the matrix slab
        off, r, c = _MAT[name]
        return mat_ref[off:off + r, 0:c]

    def V(name):                              # static slice of the vector slab
        off, w = _VEC[name]
        return vec_ref[:, off:off + w]

    def silu(v):
        # SiLU = v * sigmoid(v); sigmoid via one EUP tanh: 0.5*(tanh(v/2)+1).
        return v * (0.5 * jnp.tanh(0.5 * v) + 0.5)

    def gnorm(v, c, g, prefix, eps=1e-5):
        m = M(f"gnM_{c}_{g}")                 # single [C,C] group-mean matrix
        mean = dot(v, m)
        vc = v - mean
        var = dot(vc * vc, m)                 # biased (torch) two-pass variance
        return vc * jax.lax.rsqrt(var + eps) * V(prefix + "_w") + V(prefix + "_b")

    def lnorm(v, prefix, eps=1e-5):
        mean = jnp.mean(v, axis=-1, keepdims=True)
        var = jnp.mean((v - mean) ** 2, axis=-1, keepdims=True)
        return (v - mean) * jax.lax.rsqrt(var + eps) * V(prefix + "_w") + V(prefix + "_b")

    def attn_norm(y, p):
        # seq-len 1 attention collapses to out_proj(v_proj(y)); weights pre-fused.
        o = dot(y, M(p + ".aw")) + V(p + ".ab")
        return lnorm(y + o, p + ".ln")

    x = act_ref[:, _ACT_X0:_ACT_E0]
    emb = act_ref[:, _ACT_E0:_ACT_C0]
    cond = act_ref[:, _ACT_C0:_ACT_M0]
    cmask = act_ref[:, _ACT_M0:_ACT_W]

    # --- TimeEmbedding.mlp: Linear -> SiLU -> Linear; shared SiLU(t_emb). ----
    t_emb = dot(silu(dot(emb, M("time_w1")) + V("time_b1")), M("time_w2")) + V("time_b2")
    t_act = silu(t_emb)
    # Every block's time_proj in ONE matmul (off the critical path).
    t_all = dot(t_act, tpw_ref[...]) + V("tpb_all")

    # --- input_proj + mask-gated condition_proj (mask=0 row == condition=None).
    h = dot(x, M("in_w")) + V("in_b")
    h = h + cmask * (dot(cond, M("cond_w")) + V("cond_b"))

    def enc_block(v, p, c_in, c_out, attn):
        residual = (dot(v, M(p + ".rw")) + V(p + ".rb")) if c_in != c_out else v
        # conv1: GroupNorm -> SiLU -> Linear (Dropout: identity at eval).
        y = dot(silu(gnorm(v, c_in, 8, p + ".gn1")), M(p + ".w1")) + V(p + ".b1")
        tpo = _TP_OFFS[p]
        y = y + t_all[:, tpo:tpo + c_out]
        # conv2: GroupNorm -> SiLU -> Linear.
        y = dot(silu(gnorm(y, c_out, 8, p + ".gn2")), M(p + ".w2")) + V(p + ".b2")
        if attn:
            y = attn_norm(y, p)
        return y + residual

    def dec_block(v, skip, p, c_in, c_out, attn):
        ch = c_in // 2
        # residual_proj(concat) == h @ rw_top + skip @ rw_bot + rb.
        residual = dot(v, M(p + ".rwa")) + dot(skip, M(p + ".rwb")) + V(p + ".rb")
        # GroupNorm(8, c_in)(concat): groups never straddle the seam, so it is
        # exactly a 4-group GroupNorm per half with its slice of gamma/beta.
        na = silu(gnorm(v, ch, 4, p + ".gn1a"))
        nb = silu(gnorm(skip, ch, 4, p + ".gn1b"))
        y = dot(na, M(p + ".w1a")) + dot(nb, M(p + ".w1b")) + V(p + ".b1")
        tpo = _TP_OFFS[p]
        y = y + t_all[:, tpo:tpo + c_out]
        y = dot(silu(gnorm(y, c_out, 8, p + ".gn2")), M(p + ".w2")) + V(p + ".b2")
        if attn:
            y = attn_norm(y, p)
        return y + residual

    # --- UNet body -------------------------------------------------------------
    skips = []
    for (p, ci, co, attn) in _ENC:
        h = enc_block(h, p, ci, co, attn)
        skips.append(h)
    p, ci, co, attn = _MID
    h = enc_block(h, p, ci, co, attn)
    for (p, ci, co, attn), skip in zip(_DEC, reversed(skips)):
        h = dec_block(h, skip, p, ci, co, attn)

    # --- output_proj: GroupNorm -> SiLU -> Linear -------------------------------
    h = dot(silu(gnorm(h, HIDDEN_DIM, 8, "out_gn")), M("out_w")) + V("out_b")
    out_ref[...] = h


# ----------------------------- parameters (packed once at init) --------------
def init_packed_params(seed=0):
    rng = np.random.default_rng(seed)
    mat = np.zeros((_MAT_ROWS, _MAT_COLS), np.float32)
    vec = np.zeros((1, _VEC_WIDTH), np.float32)
    tpw = np.zeros((HIDDEN_DIM, _TP_TOTAL), np.float32)
    tpb = np.zeros((_TP_TOTAL,), np.float32)

    def put_m(name, a):
        off, r, c = _MAT[name]
        assert a.shape == (r, c), (name, a.shape, (r, c))
        mat[off:off + r, :c] = a

    def put_v(name, a):
        off, w = _VEC[name]
        a = np.asarray(a, np.float32).reshape(-1)
        assert a.shape[0] == w, (name, a.shape, w)
        vec[0, off:off + w] = a

    def dense(din, dout, scale=0.08):
        return (rng.standard_normal((din, dout)).astype(np.float32) * scale,
                rng.standard_normal((dout,)).astype(np.float32) * scale)

    def ones(n):
        return np.ones((n,), np.float32)

    def zeros(n):
        return np.zeros((n,), np.float32)

    # GroupNorm folded factor: M[i,j] = 1/group_size if group(i) == group(j).
    for name in _MAT:
        if name.startswith("gnM_"):
            _, cs, gs = name.split("_")
            c, g = int(cs), int(gs)
            grp = np.arange(c) // (c // g)
            put_m(name, (grp[:, None] == grp[None, :]).astype(np.float32) / (c // g))

    w, b = dense(TIME_EMBED_DIM, HIDDEN_DIM); put_m("time_w1", w); put_v("time_b1", b)
    w, b = dense(HIDDEN_DIM, HIDDEN_DIM);     put_m("time_w2", w); put_v("time_b2", b)
    w, b = dense(INPUT_DIM, HIDDEN_DIM);      put_m("in_w", w);    put_v("in_b", b)
    w, b = dense(CONDITION_DIM, HIDDEN_DIM);  put_m("cond_w", w);  put_v("cond_b", b)

    for (p, ci, co, attn) in _ALL_BLOCKS:
        if p.startswith("dec"):
            ch = ci // 2
            g1w, g1b = ones(ci), zeros(ci)
            put_v(p + ".gn1a_w", g1w[:ch]); put_v(p + ".gn1a_b", g1b[:ch])
            put_v(p + ".gn1b_w", g1w[ch:]); put_v(p + ".gn1b_b", g1b[ch:])
            w1, b1 = dense(ci, co)
            put_m(p + ".w1a", w1[:ch]); put_m(p + ".w1b", w1[ch:]); put_v(p + ".b1", b1)
            rw, rb = dense(ci, co)
            put_m(p + ".rwa", rw[:ch]); put_m(p + ".rwb", rw[ch:]); put_v(p + ".rb", rb)
        else:
            put_v(p + ".gn1_w", ones(ci)); put_v(p + ".gn1_b", zeros(ci))
            w1, b1 = dense(ci, co); put_m(p + ".w1", w1); put_v(p + ".b1", b1)
            if ci != co:
                rw, rb = dense(ci, co); put_m(p + ".rw", rw); put_v(p + ".rb", rb)
        tw, tb = dense(HIDDEN_DIM, co)        # block time_embed_dim == hidden_dim
        tpo = _TP_OFFS[p]
        tpw[:, tpo:tpo + co] = tw
        tpb[tpo:tpo + co] = tb
        put_v(p + ".gn2_w", ones(co)); put_v(p + ".gn2_b", zeros(co))
        w2, b2 = dense(co, co); put_m(p + ".w2", w2); put_v(p + ".b2", b2)
        if attn:
            # out_proj(v_proj(y)) == y @ (vw@ow) + (vb@ow + ob); q/k irrelevant
            # for a length-1 sequence (softmax over one key == 1).
            vw, vb = dense(co, co)
            ow, ob = dense(co, co)
            put_m(p + ".aw", vw @ ow); put_v(p + ".ab", vb @ ow + ob)
            put_v(p + ".ln_w", ones(co)); put_v(p + ".ln_b", zeros(co))

    put_v("tpb_all", tpb)
    put_v("out_gn_w", ones(HIDDEN_DIM)); put_v("out_gn_b", zeros(HIDDEN_DIM))
    w, b = dense(HIDDEN_DIM, INPUT_DIM); put_m("out_w", w); put_v("out_b", b)

    return {"mat": jnp.asarray(mat), "vec": jnp.asarray(vec), "tpw": jnp.asarray(tpw)}


# ----------------------------- wrappers (single fused pallas_call) -----------
def _pallas_forward(packed, act):
    b = act.shape[0]
    cost = pl.CostEstimate(
        flops=int(4 * b * (_SLAB_MAT_ELEMS + HIDDEN_DIM * _TP_TOTAL)),
        transcendentals=int(24 * b * 128),
        bytes_accessed=int(4 * (_MAT_ROWS * _MAT_COLS + _VEC_WIDTH
                                + HIDDEN_DIM * _TP_TOTAL + b * (_ACT_W + INPUT_DIM))),
    )
    return pl.pallas_call(
        _fused_kernel,
        out_shape=jax.ShapeDtypeStruct((b, INPUT_DIM), jnp.float32),
        in_specs=[pl.BlockSpec(memory_space=pltpu.MemorySpace.VMEM)] * 4,
        out_specs=pl.BlockSpec(memory_space=pltpu.MemorySpace.VMEM),
        cost_estimate=cost,
    )(act, packed["mat"], packed["vec"], packed["tpw"])


def _act_slab(x, timestep, cond, cmask):
    half = TIME_EMBED_DIM // 2
    freq = jnp.exp(jnp.arange(half, dtype=jnp.float32) * (-math.log(10000.0) / (half - 1)))
    e = timestep.astype(jnp.float32).reshape(-1)[:, None] * freq[None, :]
    emb = jnp.concatenate([jnp.sin(e), jnp.cos(e)], axis=-1)
    return jnp.concatenate([x, emb, cond, cmask], axis=-1)


@jax.jit
def _forward_single(packed, x, timestep, cond, cmask):
    return _pallas_forward(packed, _act_slab(x, timestep, cond, cmask))


@jax.jit
def _forward_cfg(packed, x, timestep, condition, cfg_scale):
    # Conditional rows 0..B-1 (mask=1) and unconditional rows B..2B-1 (mask=0)
    # fused in ONE B=2*BATCH kernel call; combined with CFG afterwards.
    b = x.shape[0]
    act = _act_slab(
        jnp.concatenate([x, x], axis=0),
        jnp.concatenate([timestep, timestep], axis=0),
        jnp.concatenate([condition, jnp.zeros_like(condition)], axis=0),
        jnp.concatenate([jnp.ones((b, 1), jnp.float32),
                         jnp.zeros((b, 1), jnp.float32)], axis=0))
    out = _pallas_forward(packed, act)
    cond_pred, uncond_pred = out[:b], out[b:]
    return uncond_pred + cfg_scale * (cond_pred - uncond_pred)


def forward(packed, x, timestep, condition=None, cfg_scale=1.0):
    b = x.shape[0]
    if condition is None:
        return _forward_single(packed, x, timestep,
                               jnp.zeros((b, CONDITION_DIM), jnp.float32),
                               jnp.zeros((b, 1), jnp.float32))
    if cfg_scale > 1.0:
        return _forward_cfg(packed, x, timestep, condition, cfg_scale)
    return _forward_single(packed, x, timestep, condition,
                           jnp.ones((b, 1), jnp.float32))


# ----------------------------- main ------------------------------------------
if __name__ == "__main__":
    packed = init_packed_params(seed=0)

    key = jax.random.PRNGKey(0)
    kx, kt, kc = jax.random.split(key, 3)
    x = jax.random.normal(kx, (BATCH, INPUT_DIM), jnp.float32)
    timestep = jax.random.randint(kt, (BATCH,), 0, 100).astype(jnp.float32)
    condition = jax.random.normal(kc, (BATCH, CONDITION_DIM), jnp.float32)

    cond_pred = jax.block_until_ready(forward(packed, x, timestep, condition, cfg_scale=1.0))
    uncond_pred = jax.block_until_ready(forward(packed, x, timestep, None))
    cfg_pred = jax.block_until_ready(forward(packed, x, timestep, condition, cfg_scale=2.0))

    assert cond_pred.shape == (BATCH, INPUT_DIM), cond_pred.shape
    assert uncond_pred.shape == (BATCH, INPUT_DIM), uncond_pred.shape
    assert cfg_pred.shape == (BATCH, INPUT_DIM), cfg_pred.shape
    assert bool(jnp.all(jnp.isfinite(cond_pred)))
    assert bool(jnp.all(jnp.isfinite(uncond_pred)))
    assert bool(jnp.all(jnp.isfinite(cfg_pred)))

    # The fused B=8 CFG call must agree with combining the two B=4 passes.
    ref_cfg = uncond_pred + 2.0 * (cond_pred - uncond_pred)
    assert bool(jnp.allclose(cfg_pred, ref_cfg, atol=1e-4, rtol=1e-4)), \
        float(jnp.max(jnp.abs(cfg_pred - ref_cfg)))

    print("KERNEL_OK")
</pallas_src>

<mosaic_0001>
module attributes {stable_mosaic.version = 11 : i64} {
  func.func @_fused_kernel(%arg0: memref<4x65xf32, #tpu.memory_space<vmem>>, %arg1: memref<2368x128xf32, #tpu.memory_space<vmem>>, %arg2: memref<1x7424xf32, #tpu.memory_space<vmem>>, %arg3: memref<32x416xf32, #tpu.memory_space<vmem>>, %arg4: memref<4x16xf32, #tpu.memory_space<vmem>>) attributes {dimension_semantics = [], scalar_prefetch = 0 : i64, scratch_operands = 0 : i64, tpu.core_type = #tpu.core_type<tc>} {
    %c0 = arith.constant 0 : index
    %c0_0 = arith.constant 0 : index
    %0 = vector.load %arg0[%c0, %c0_0] : memref<4x65xf32, #tpu.memory_space<vmem>>, vector<4x16xf32>
    %c0_1 = arith.constant 0 : index
    %c16 = arith.constant 16 : index
    %1 = vector.load %arg0[%c0_1, %c16] : memref<4x65xf32, #tpu.memory_space<vmem>>, vector<4x32xf32>
    %c0_2 = arith.constant 0 : index
    %c48 = arith.constant 48 : index
    %2 = vector.load %arg0[%c0_2, %c48] : memref<4x65xf32, #tpu.memory_space<vmem>>, vector<4x16xf32>
    %c0_3 = arith.constant 0 : index
    %c64 = arith.constant 64 : index
    %3 = vector.load %arg0[%c0_3, %c64] : memref<4x65xf32, #tpu.memory_space<vmem>>, vector<4x1xf32>
    %c416 = arith.constant 416 : index
    %c0_4 = arith.constant 0 : index
    %4 = vector.load %arg1[%c416, %c0_4] : memref<2368x128xf32, #tpu.memory_space<vmem>>, vector<32x32xf32>
    %cst = arith.constant dense<0.000000e+00> : vector<4x32xf32>
    %5 = tpu.matmul %1, %4, %cst {dimension_numbers = #tpu.dot_dimension_numbers<[1], [0], [0], [1], [0, 0, 1, 1], [], []>} : vector<4x32xf32>, vector<32x32xf32>, vector<4x32xf32> -> vector<4x32xf32>
    %c0_5 = arith.constant 0 : index
    %c0_6 = arith.constant 0 : index
    %6 = vector.load %arg2[%c0_5, %c0_6] : memref<1x7424xf32, #tpu.memory_space<vmem>>, vector<1x32xf32>
    %7 = vector.broadcast %6 : vector<1x32xf32> to vector<4x32xf32>
    %8 = arith.addf %5, %7 : vector<4x32xf32>
    %cst_7 = arith.constant 5.000000e-01 : f32
    %9 = vector.broadcast %cst_7 : f32 to vector<4x32xf32>
    %10 = arith.mulf %9, %8 : vector<4x32xf32>
    %11 = math.tanh %10 : vector<4x32xf32>
    %cst_8 = arith.constant 5.000000e-01 : f32
    %12 = vector.broadcast %cst_8 : f32 to vector<4x32xf32>
    %13 = arith.mulf %12, %11 : vector<4x32xf32>
    %cst_9 = arith.constant 5.000000e-01 : f32
    %14 = vector.broadcast %cst_9 : f32 to vector<4x32xf32>
    %15 = arith.addf %13, %14 : vector<4x32xf32>
    %16 = arith.mulf %8, %15 : vector<4x32xf32>
    %c448 = arith.constant 448 : index
    %c0_10 = arith.constant 0 : index
    %17 = vector.load %arg1[%c448, %c0_10] : memref<2368x128xf32, #tpu.memory_space<vmem>>, vector<32x32xf32>
    %cst_11 = arith.constant dense<0.000000e+00> : vector<4x32xf32>
    %18 = tpu.matmul %16, %17, %cst_11 {dimension_numbers = #tpu.dot_dimension_numbers<[1], [0], [0], [1], [0, 0, 1, 1], [], []>} : vector<4x32xf32>, vector<32x32xf32>, vector<4x32xf32> -> vector<4x32xf32>
    %c0_12 = arith.constant 0 : index
    %c128 = arith.constant 128 : index
    %19 = vector.load %arg2[%c0_12, %c128] : memref<1x7424xf32, #tpu.memory_space<vmem>>, vector<1x32xf32>
    %20 = vector.broadcast %19 : vector<1x32xf32> to vector<4x32xf32>
    %21 = arith.addf %18, %20 : vector<4x32xf32>
    %cst_13 = arith.constant 5.000000e-01 : f32
    %22 = vector.broadcast %cst_13 : f32 to vector<4x32xf32>
    %23 = arith.mulf %22, %21 : vector<4x32xf32>
    %24 = math.tanh %23 : vector<4x32xf32>
    %cst_14 = arith.constant 5.000000e-01 : f32
    %25 = vector.broadcast %cst_14 : f32 to vector<4x32xf32>
    %26 = arith.mulf %25, %24 : vector<4x32xf32>
    %cst_15 = arith.constant 5.000000e-01 : f32
    %27 = vector.broadcast %cst_15 : f32 to vector<4x32xf32>
    %28 = arith.addf %26, %27 : vector<4x32xf32>
    %29 = arith.mulf %21, %28 : vector<4x32xf32>
    %c0_16 = arith.constant 0 : index
    %c0_17 = arith.constant 0 : index
    %30 = vector.load %arg3[%c0_16, %c0_17] : memref<32x416xf32, #tpu.memory_space<vmem>>, vector<32x416xf32>
    %cst_18 = arith.constant dense<0.000000e+00> : vector<4x416xf32>
    %31 = tpu.matmul %29, %30, %cst_18 {dimension_numbers = #tpu.dot_dimension_numbers<[1], [0], [0], [1], [0, 0, 1, 1], [], []>} : vector<4x32xf32>, vector<32x416xf32>, vector<4x416xf32> -> vector<4x416xf32>
    %c0_19 = arith.constant 0 : index
    %c896 = arith.constant 896 : index
    %32 = vector.load %arg2[%c0_19, %c896] : memref<1x7424xf32, #tpu.memory_space<vmem>>, vector<1x416xf32>
    %33 = vector.broadcast %32 : vector<1x416xf32> to vector<4x416xf32>
    %34 = arith.addf %31, %33 : vector<4x416xf32>
    %c480 = arith.constant 480 : index
    %c0_20 = arith.constant 0 : index
    %35 = vector.load %arg1[%c480, %c0_20] : memref<2368x128xf32, #tpu.memory_space<vmem>>, vector<16x32xf32>
    %cst_21 = arith.constant dense<0.000000e+00> : vector<4x32xf32>
    %36 = tpu.matmul %0, %35, %cst_21 {dimension_numbers = #tpu.dot_dimension_numbers<[1], [0], [0], [1], [0, 0, 1, 1], [], []>} : vector<4x16xf32>, vector<16x32xf32>, vector<4x32xf32> -> vector<4x32xf32>
    %c0_22 = arith.constant 0 : index
    %c256 = arith.constant 256 : index
    %37 = vector.load %arg2[%c0_22, %c256] : memref<1x7424xf32, #tpu.memory_space<vmem>>, vector<1x32xf32>
    %38 = vector.broadcast %37 : vector<1x32xf32> to vector<4x32xf32>
    %39 = arith.addf %36, %38 : vector<4x32xf32>
    %c496 = arith.constant 496 : index
    %c0_23 = arith.constant 0 : index
    %40 = vector.load %arg1[%c496, %c0_23] : memref<2368x128xf32, #tpu.memory_space<vmem>>, vector<16x32xf32>
    %cst_24 = arith.constant dense<0.000000e+00> : vector<4x32xf32>
    %41 = tpu.matmul %2, %40, %cst_24 {dimension_numbers = #tpu.dot_dimension_numbers<[1], [0], [0], [1], [0, 0, 1, 1], [], []>} : vector<4x16xf32>, vector<16x32xf32>, vector<4x32xf32> -> vector<4x32xf32>
    %c0_25 = arith.constant 0 : index
    %c384 = arith.constant 384 : index
    %42 = vector.load %arg2[%c0_25, %c384] : memref<1x7424xf32, #tpu.memory_space<vmem>>, vector<1x32xf32>
    %43 = vector.broadcast %42 : vector<1x32xf32> to vector<4x32xf32>
    %44 = arith.addf %41, %43 : vector<4x32xf32>
    %45 = vector.broadcast %3 : vector<4x1xf32> to vector<4x32xf32>
    %46 = arith.mulf %45, %44 : vector<4x32xf32>
    %47 = arith.addf %39, %46 : vector<4x32xf32>
    %c576 = arith.constant 576 : index
    %c0_26 = arith.constant 0 : index
    %48 = vector.load %arg1[%c576, %c0_26] : memref<2368x128xf32, #tpu.memory_space<vmem>>, vector<32x64xf32>
    %cst_27 = arith.constant dense<0.000000e+00> : vector<4x64xf32>
    %49 = tpu.matmul %47, %48, %cst_27 {dimension_numbers = #tpu.dot_dimension_numbers<[1], [0], [0], [1], [0, 0, 1, 1], [], []>} : vector<4x32xf32>, vector<32x64xf32>, vector<4x64xf32> -> vector<4x64xf32>
    %c0_28 = arith.constant 0 : index
    %c1792 = arith.constant 1792 : index
    %50 = vector.load %arg2[%c0_28, %c1792] : memref<1x7424xf32, #tpu.memory_space<vmem>>, vector<1x64xf32>
    %51 = vector.broadcast %50 : vector<1x64xf32> to vector<4x64xf32>
    %52 = arith.addf %49, %51 : vector<4x64xf32>
    %c0_29 = arith.constant 0 : index
    %c0_30 = arith.constant 0 : index
    %53 = vector.load %arg1[%c0_29, %c0_30] : memref<2368x128xf32, #tpu.memory_space<vmem>>, vector<32x32xf32>
    %cst_31 = arith.constant dense<0.000000e+00> : vector<4x32xf32>
    %54 = tpu.matmul %47, %53, %cst_31 {dimension_numbers = #tpu.dot_dimension_numbers<[1], [0], [0], [1], [0, 0, 1, 1], [], []>} : vector<4x32xf32>, vector<32x32xf32>, vector<4x32xf32> -> vector<4x32xf32>
    %55 = arith.subf %47, %54 : vector<4x32xf32>
    %56 = arith.mulf %55, %55 : vector<4x32xf32>
    %cst_32 = arith.constant dense<0.000000e+00> : vector<4x32xf32>
    %57 = tpu.matmul %56, %53, %cst_32 {dimension_numbers = #tpu.dot_dimension_numbers<[1], [0], [0], [1], [0, 0, 1, 1], [], []>} : vector<4x32xf32>, vector<32x32xf32>, vector<4x32xf32> -> vector<4x32xf32>
    %cst_33 = arith.constant 9.99999974E-6 : f32
    %58 = vector.broadcast %cst_33 : f32 to vector<4x32xf32>
    %59 = arith.addf %57, %58 : vector<4x32xf32>
    %60 = math.rsqrt %59 : vector<4x32xf32>
    %61 = arith.mulf %55, %60 : vector<4x32xf32>
    %c0_34 = arith.constant 0 : index
    %c1408 = arith.constant 1408 : index
    %62 = vector.load %arg2[%c0_34, %c1408] : memref<1x7424xf32, #tpu.memory_space<vmem>>, vector<1x32xf32>
    %63 = vector.broadcast %62 : vector<1x32xf32> to vector<4x32xf32>
    %64 = arith.mulf %61, %63 : vector<4x32xf32>
    %c0_35 = arith.constant 0 : index
    %c1536 = arith.constant 1536 : index
    %65 = vector.load %arg2[%c0_35, %c1536] : memref<1x7424xf32, #tpu.memory_space<vmem>>, vector<1x32xf32>
    %66 = vector.broadcast %65 : vector<1x32xf32> to vector<4x32xf32>
    %67 = arith.addf %64, %66 : vector<4x32xf32>
    %cst_36 = arith.constant 5.000000e-01 : f32
    %68 = vector.broadcast %cst_36 : f32 to vector<4x32xf32>
    %69 = arith.mulf %68, %67 : vector<4x32xf32>
    %70 = math.tanh %69 : vector<4x32xf32>
    %cst_37 = arith.constant 5.000000e-01 : f32
    %71 = vector.broadcast %cst_37 : f32 to vector<4x32xf32>
    %72 = arith.mulf %71, %70 : vector<4x32xf32>
    %cst_38 = arith.constant 5.000000e-01 : f32
    %73 = vector.broadcast %cst_38 : f32 to vector<4x32xf32>
    %74 = arith.addf %72, %73 : vector<4x32xf32>
    %75 = arith.mulf %67, %74 : vector<4x32xf32>
    %c544 = arith.constant 544 : index
    %c0_39 = arith.constant 0 : index
    %76 = vector.load %arg1[%c544, %c0_39] : memref<2368x128xf32, #tpu.memory_space<vmem>>, vector<32x64xf32>
    %cst_40 = arith.constant dense<0.000000e+00> : vector<4x64xf32>
    %77 = tpu.matmul %75, %76, %cst_40 {dimension_numbers = #tpu.dot_dimension_numbers<[1], [0], [0], [1], [0, 0, 1, 1], [], []>} : vector<4x32xf32>, vector<32x64xf32>, vector<4x64xf32> -> vector<4x64xf32>
    %c0_41 = arith.constant 0 : index
    %c1664 = arith.constant 1664 : index
    %78 = vector.load %arg2[%c0_41, %c1664] : memref<1x7424xf32, #tpu.memory_space<vmem>>, vector<1x64xf32>
    %79 = vector.broadcast %78 : vector<1x64xf32> to vector<4x64xf32>
    %80 = arith.addf %77, %79 : vector<4x64xf32>
    %81 = vector.extract_strided_slice %34 {offsets = [0, 0], sizes = [4, 64], strides = [1, 1]} : vector<4x416xf32> to vector<4x64xf32>
    %82 = arith.addf %80, %81 : vector<4x64xf32>
    %c96 = arith.constant 96 : index
    %c0_42 = arith.constant 0 : index
    %83 = vector.load %arg1[%c96, %c0_42] : memref<2368x128xf32, #tpu.memory_space<vmem>>, vector<64x64xf32>
    %cst_43 = arith.constant dense<0.000000e+00> : vector<4x64xf32>
    %84 = tpu.matmul %82, %83, %cst_43 {dimension_numbers = #tpu.dot_dimension_numbers<[1], [0], [0], [1], [0, 0, 1, 1], [], []>} : vector<4x64xf32>, vector<64x64xf32>, vector<4x64xf32> -> vector<4x64xf32>
    %85 = arith.subf %82, %84 : vector<4x64xf32>
    %86 = arith.mulf %85, %85 : vector<4x64xf32>
    %cst_44 = arith.constant dense<0.000000e+00> : vector<4x64xf32>
    %87 = tpu.matmul %86, %83, %cst_44 {dimension_numbers = #tpu.dot_dimension_numbers<[1], [0], [0], [1], [0, 0, 1, 1], [], []>} : vector<4x64xf32>, vector<64x64xf32>, vector<4x64xf32> -> vector<4x64xf32>
    %cst_45 = arith.constant 9.99999974E-6 : f32
    %88 = vector.broadcast %cst_45 : f32 to vector<4x64xf32>
    %89 = arith.addf %87, %88 : vector<4x64xf32>
    %90 = math.rsqrt %89 : vector<4x64xf32>
    %91 = arith.mulf %85, %90 : vector<4x64xf32>
    %c0_46 = arith.constant 0 : index
    %c1920 = arith.constant 1920 : index
    %92 = vector.load %arg2[%c0_46, %c1920] : memref<1x7424xf32, #tpu.memory_space<vmem>>, vector<1x64xf32>
    %93 = vector.broadcast %92 : vector<1x64xf32> to vector<4x64xf32>
    %94 = arith.mulf %91, %93 : vector<4x64xf32>
    %c0_47 = arith.constant 0 : index
    %c2048 = arith.constant 2048 : index
    %95 = vector.load %arg2[%c0_47, %c2048] : memref<1x7424xf32, #tpu.memory_space<vmem>>, vector<1x64xf32>
    %96 = vector.broadcast %95 : vector<1x64xf32> to vector<4x64xf32>
    %97 = arith.addf %94, %96 : vector<4x64xf32>
    %cst_48 = arith.constant 5.000000e-01 : f32
    %98 = vector.broadcast %cst_48 : f32 to vector<4x64xf32>
    %99 = arith.mulf %98, %97 : vector<4x64xf32>
    %100 = math.tanh %99 : vector<4x64xf32>
    %cst_49 = arith.constant 5.000000e-01 : f32
    %101 = vector.broadcast %cst_49 : f32 to vector<4x64xf32>
    %102 = arith.mulf %101, %100 : vector<4x64xf32>
    %cst_50 = arith.constant 5.000000e-01 : f32
    %103 = vector.broadcast %cst_50 : f32 to vector<4x64xf32>
    %104 = arith.addf %102, %103 : vector<4x64xf32>
    %105 = arith.mulf %97, %104 : vector<4x64xf32>
    %c608 = arith.constant 608 : index
    %c0_51 = arith.constant 0 : index
    %106 = vector.load %arg1[%c608, %c0_51] : memref<2368x128xf32, #tpu.memory_space<vmem>>, vector<64x64xf32>
    %cst_52 = arith.constant dense<0.000000e+00> : vector<4x64xf32>
    %107 = tpu.matmul %105, %106, %cst_52 {dimension_numbers = #tpu.dot_dimension_numbers<[1], [0], [0], [1], [0, 0, 1, 1], [], []>} : vector<4x64xf32>, vector<64x64xf32>, vector<4x64xf32> -> vector<4x64xf32>
    %c0_53 = arith.constant 0 : index
    %c2176 = arith.constant 2176 : index
    %108 = vector.load %arg2[%c0_53, %c2176] : memref<1x7424xf32, #tpu.memory_space<vmem>>, vector<1x64xf32>
    %109 = vector.broadcast %108 : vector<1x64xf32> to vector<4x64xf32>
    %110 = arith.addf %107, %109 : vector<4x64xf32>
    %111 = arith.addf %110, %52 : vector<4x64xf32>
    %c736 = arith.constant 736 : index
    %c0_54 = arith.constant 0 : index
    %112 = vector.load %arg1[%c736, %c0_54] : memref<2368x128xf32, #tpu.memory_space<vmem>>, vector<64x128xf32>
    %cst_55 = arith.constant dense<0.000000e+00> : vector<4x128xf32>
    %113 = tpu.matmul %111, %112, %cst_55 {dimension_numbers = #tpu.dot_dimension_numbers<[1], [0], [0], [1], [0, 0, 1, 1], [], []>} : vector<4x64xf32>, vector<64x128xf32>, vector<4x128xf32> -> vector<4x128xf32>
    %c0_56 = arith.constant 0 : index
    %c2688 = arith.constant 2688 : index
    %114 = vector.load %arg2[%c0_56, %c2688] : memref<1x7424xf32, #tpu.memory_space<vmem>>, vector<1x128xf32>
    %115 = vector.broadcast %114 : vector<1x128xf32> to vector<4x128xf32>
    %116 = arith.addf %113, %115 : vector<4x128xf32>
    %c96_57 = arith.constant 96 : index
    %c0_58 = arith.constant 0 : index
    %117 = vector.load %arg1[%c96_57, %c0_58] : memref<2368x128xf32, #tpu.memory_space<vmem>>, vector<64x64xf32>
    %cst_59 = arith.constant dense<0.000000e+00> : vector<4x64xf32>
    %118 = tpu.matmul %111, %117, %cst_59 {dimension_numbers = #tpu.dot_dimension_numbers<[1], [0], [0], [1], [0, 0, 1, 1], [], []>} : vector<4x64xf32>, vector<64x64xf32>, vector<4x64xf32> -> vector<4x64xf32>
    %119 = arith.subf %111, %118 : vector<4x64xf32>
    %120 = arith.mulf %119, %119 : vector<4x64xf32>
    %cst_60 = arith.constant dense<0.000000e+00> : vector<4x64xf32>
    %121 = tpu.matmul %120, %117, %cst_60 {dimension_numbers = #tpu.dot_dimension_numbers<[1], [0], [0], [1], [0, 0, 1, 1], [], []>} : vector<4x64xf32>, vector<64x64xf32>, vector<4x64xf32> -> vector<4x64xf32>
    %cst_61 = arith.constant 9.99999974E-6 : f32
    %122 = vector.broadcast %cst_61 : f32 to vector<4x64xf32>
    %123 = arith.addf %121, %122 : vector<4x64xf32>
    %124 = math.rsqrt %123 : vector<4x64xf32>
    %125 = arith.mulf %119, %124 : vector<4x64xf32>
    %c0_62 = arith.constant 0 : index
    %c2304 = arith.constant 2304 : index
    %126 = vector.load %arg2[%c0_62, %c2304] : memref<1x7424xf32, #tpu.memory_space<vmem>>, vector<1x64xf32>
    %127 = vector.broadcast %126 : vector<1x64xf32> to vector<4x64xf32>
    %128 = arith.mulf %125, %127 : vector<4x64xf32>
    %c0_63 = arith.constant 0 : index
    %c2432 = arith.constant 2432 : index
    %129 = vector.load %arg2[%c0_63, %c2432] : memref<1x7424xf32, #tpu.memory_space<vmem>>, vector<1x64xf32>
    %130 = vector.broadcast %129 : vector<1x64xf32> to vector<4x64xf32>
    %131 = arith.addf %128, %130 : vector<4x64xf32>
    %cst_64 = arith.constant 5.000000e-01 : f32
    %132 = vector.broadcast %cst_64 : f32 to vector<4x64xf32>
    %133 = arith.mulf %132, %131 : vector<4x64xf32>
    %134 = math.tanh %133 : vector<4x64xf32>
    %cst_65 = arith.constant 5.000000e-01 : f32
    %135 = vector.broadcast %cst_65 : f32 to vector<4x64xf32>
    %136 = arith.mulf %135, %134 : vector<4x64xf32>
    %cst_66 = arith.constant 5.000000e-01 : f32
    %137 = vector.broadcast %cst_66 : f32 to vector<4x64xf32>
    %138 = arith.addf %136, %137 : vector<4x64xf32>
    %139 = arith.mulf %131, %138 : vector<4x64xf32>
    %c672 = arith.constant 672 : index
    %c0_67 = arith.constant 0 : index
    %140 = vector.load %arg1[%c672, %c0_67] : memref<2368x128xf32, #tpu.memory_space<vmem>>, vector<64x128xf32>
    %cst_68 = arith.constant dense<0.000000e+00> : vector<4x128xf32>
    %141 = tpu.matmul %139, %140, %cst_68 {dimension_numbers = #tpu.dot_dimension_numbers<[1], [0], [0], [1], [0, 0, 1, 1], [], []>} : vector<4x64xf32>, vector<64x128xf32>, vector<4x128xf32> -> vector<4x128xf32>
    %c0_69 = arith.constant 0 : index
    %c2560 = arith.constant 2560 : index
    %142 = vector.load %arg2[%c0_69, %c2560] : memref<1x7424xf32, #tpu.memory_space<vmem>>, vector<1x128xf32>
    %143 = vector.broadcast %142 : vector<1x128xf32> to vector<4x128xf32>
    %144 = arith.addf %141, %143 : vector<4x128xf32>
    %145 = vector.extract_strided_slice %34 {offsets = [0, 64], sizes = [4, 128], strides = [1, 1]} : vector<4x416xf32> to vector<4x128xf32>
    %146 = arith.addf %144, %145 : vector<4x128xf32>
    %c288 = arith.constant 288 : index
    %c0_70 = arith.constant 0 : index
    %147 = vector.load %arg1[%c288, %c0_70] : memref<2368x128xf32, #tpu.memory_space<vmem>>, vector<128x128xf32>
    %cst_71 = arith.constant dense<0.000000e+00> : vector<4x128xf32>
    %148 = tpu.matmul %146, %147, %cst_71 {dimension_numbers = #tpu.dot_dimension_numbers<[1], [0], [0], [1], [0, 0, 1, 1], [], []>} : vector<4x128xf32>, vector<128x128xf32>, vector<4x128xf32> -> vector<4x128xf32>
    %149 = arith.subf %146, %148 : vector<4x128xf32>
    %150 = arith.mulf %149, %149 : vector<4x128xf32>
    %cst_72 = arith.constant dense<0.000000e+00> : vector<4x128xf32>
    %151 = tpu.matmul %150, %147, %cst_72 {dimension_numbers = #tpu.dot_dimension_numbers<[1], [0], [0], [1], [0, 0, 1, 1], [], []>} : vector<4x128xf32>, vector<128x128xf32>, vector<4x128xf32> -> vector<4x128xf32>
    %cst_73 = arith.constant 9.99999974E-6 : f32
    %152 = vector.broadcast %cst_73 : f32 to vector<4x128xf32>
    %153 = arith.addf %151, %152 : vector<4x128xf32>
    %154 = math.rsqrt %153 : vector<4x128xf32>
    %155 = arith.mulf %149, %154 : vector<4x128xf32>
    %c0_74 = arith.constant 0 : index
    %c2816 = arith.constant 2816 : index
    %156 = vector.load %arg2[%c0_74, %c2816] : memref<1x7424xf32, #tpu.memory_space<vmem>>, vector<1x128xf32>
    %157 = vector.broadcast %156 : vector<1x128xf32> to vector<4x128xf32>
    %158 = arith.mulf %155, %157 : vector<4x128xf32>
    %c0_75 = arith.constant 0 : index
    %c2944 = arith.constant 2944 : index
    %159 = vector.load %arg2[%c0_75, %c2944] : memref<1x7424xf32, #tpu.memory_space<vmem>>, vector<1x128xf32>
    %160 = vector.broadcast %159 : vector<1x128xf32> to vector<4x128xf32>
    %161 = arith.addf %158, %160 : vector<4x128xf32>
    %cst_76 = arith.constant 5.000000e-01 : f32
    %162 = vector.broadcast %cst_76 : f32 to vector<4x128xf32>
    %163 = arith.mulf %162, %161 : vector<4x128xf32>
    %164 = math.tanh %163 : vector<4x128xf32>
    %cst_77 = arith.constant 5.000000e-01 : f32
    %165 = vector.broadcast %cst_77 : f32 to vector<4x128xf32>
    %166 = arith.mulf %165, %164 : vector<4x128xf32>
    %cst_78 = arith.constant 5.000000e-01 : f32
    %167 = vector.broadcast %cst_78 : f32 to vector<4x128xf32>
    %168 = arith.addf %166, %167 : vector<4x128xf32>
    %169 = arith.mulf %161, %168 : vector<4x128xf32>
    %c800 = arith.constant 800 : index
    %c0_79 = arith.constant 0 : index
    %170 = vector.load %arg1[%c800, %c0_79] : memref<2368x128xf32, #tpu.memory_space<vmem>>, vector<128x128xf32>
    %cst_80 = arith.constant dense<0.000000e+00> : vector<4x128xf32>
    %171 = tpu.matmul %169, %170, %cst_80 {dimension_numbers = #tpu.dot_dimension_numbers<[1], [0], [0], [1], [0, 0, 1, 1], [], []>} : vector<4x128xf32>, vector<128x128xf32>, vector<4x128xf32> -> vector<4x128xf32>
    %c0_81 = arith.constant 0 : index
    %c3072 = arith.constant 3072 : index
    %172 = vector.load %arg2[%c0_81, %c3072] : memref<1x7424xf32, #tpu.memory_space<vmem>>, vector<1x128xf32>
    %173 = vector.broadcast %172 : vector<1x128xf32> to vector<4x128xf32>
    %174 = arith.addf %171, %173 : vector<4x128xf32>
    %c928 = arith.constant 928 : index
    %c0_82 = arith.constant 0 : index
    %175 = vector.load %arg1[%c928, %c0_82] : memref<2368x128xf32, #tpu.memory_space<vmem>>, vector<128x128xf32>
    %cst_83 = arith.constant dense<0.000000e+00> : vector<4x128xf32>
    %176 = tpu.matmul %174, %175, %cst_83 {dimension_numbers = #tpu.dot_dimension_numbers<[1], [0], [0], [1], [0, 0, 1, 1], [], []>} : vector<4x128xf32>, vector<128x128xf32>, vector<4x128xf32> -> vector<4x128xf32>
    %c0_84 = arith.constant 0 : index
    %c3200 = arith.constant 3200 : index
    %177 = vector.load %arg2[%c0_84, %c3200] : memref<1x7424xf32, #tpu.memory_space<vmem>>, vector<1x128xf32>
    %178 = vector.broadcast %177 : vector<1x128xf32> to vector<4x128xf32>
    %179 = arith.addf %176, %178 : vector<4x128xf32>
    %180 = arith.addf %174, %179 : vector<4x128xf32>
    %cst_85 = arith.constant dense<0.000000e+00> : vector<4xf32>
    %181 = vector.multi_reduction <add>, %180, %cst_85 [1] : vector<4x128xf32> to vector<4xf32>
    %182 = vector.shape_cast %181 : vector<4xf32> to vector<4x1xf32>
    %cst_86 = arith.constant 1.280000e+02 : f32
    %183 = vector.broadcast %cst_86 : f32 to vector<4x1xf32>
    %184 = arith.divf %182, %183 : vector<4x1xf32>
    %185 = vector.broadcast %184 : vector<4x1xf32> to vector<4x128xf32>
    %186 = arith.subf %180, %185 : vector<4x128xf32>
    %187 = arith.mulf %186, %186 : vector<4x128xf32>
    %cst_87 = arith.constant dense<0.000000e+00> : vector<4xf32>
    %188 = vector.multi_reduction <add>, %187, %cst_87 [1] : vector<4x128xf32> to vector<4xf32>
    %189 = vector.shape_cast %188 : vector<4xf32> to vector<4x1xf32>
    %cst_88 = arith.constant 1.280000e+02 : f32
    %190 = vector.broadcast %cst_88 : f32 to vector<4x1xf32>
    %191 = arith.divf %189, %190 : vector<4x1xf32>
    %192 = vector.broadcast %184 : vector<4x1xf32> to vector<4x128xf32>
    %193 = arith.subf %180, %192 : vector<4x128xf32>
    %cst_89 = arith.constant 9.99999974E-6 : f32
    %194 = vector.broadcast %cst_89 : f32 to vector<4x1xf32>
    %195 = arith.addf %191, %194 : vector<4x1xf32>
    %196 = math.rsqrt %195 : vector<4x1xf32>
    %197 = vector.broadcast %196 : vector<4x1xf32> to vector<4x128xf32>
    %198 = arith.mulf %193, %197 : vector<4x128xf32>
    %c0_90 = arith.constant 0 : index
    %c3328 = arith.constant 3328 : index
    %199 = vector.load %arg2[%c0_90, %c3328] : memref<1x7424xf32, #tpu.memory_space<vmem>>, vector<1x128xf32>
    %200 = vector.broadcast %199 : vector<1x128xf32> to vector<4x128xf32>
    %201 = arith.mulf %198, %200 : vector<4x128xf32>
    %c0_91 = arith.constant 0 : index
    %c3456 = arith.constant 3456 : index
    %202 = vector.load %arg2[%c0_91, %c3456] : memref<1x7424xf32, #tpu.memory_space<vmem>>, vector<1x128xf32>
    %203 = vector.broadcast %202 : vector<1x128xf32> to vector<4x128xf32>
    %204 = arith.addf %201, %203 : vector<4x128xf32>
    %205 = arith.addf %204, %116 : vector<4x128xf32>
    %c288_92 = arith.constant 288 : index
    %c0_93 = arith.constant 0 : index
    %206 = vector.load %arg1[%c288_92, %c0_93] : memref<2368x128xf32, #tpu.memory_space<vmem>>, vector<128x128xf32>
    %cst_94 = arith.constant dense<0.000000e+00> : vector<4x128xf32>
    %207 = tpu.matmul %205, %206, %cst_94 {dimension_numbers = #tpu.dot_dimension_numbers<[1], [0], [0], [1], [0, 0, 1, 1], [], []>} : vector<4x128xf32>, vector<128x128xf32>, vector<4x128xf32> -> vector<4x128xf32>
    %208 = arith.subf %205, %207 : vector<4x128xf32>
    %209 = arith.mulf %208, %208 : vector<4x128xf32>
    %cst_95 = arith.constant dense<0.000000e+00> : vector<4x128xf32>
    %210 = tpu.matmul %209, %206, %cst_95 {dimension_numbers = #tpu.dot_dimension_numbers<[1], [0], [0], [1], [0, 0, 1, 1], [], []>} : vector<4x128xf32>, vector<128x128xf32>, vector<4x128xf32> -> vector<4x128xf32>
    %cst_96 = arith.constant 9.99999974E-6 : f32
    %211 = vector.broadcast %cst_96 : f32 to vector<4x128xf32>
    %212 = arith.addf %210, %211 : vector<4x128xf32>
    %213 = math.rsqrt %212 : vector<4x128xf32>
    %214 = arith.mulf %208, %213 : vector<4x128xf32>
    %c0_97 = arith.constant 0 : index
    %c3584 = arith.constant 3584 : index
    %215 = vector.load %arg2[%c0_97, %c3584] : memref<1x7424xf32, #tpu.memory_space<vmem>>, vector<1x128xf32>
    %216 = vector.broadcast %215 : vector<1x128xf32> to vector<4x128xf32>
    %217 = arith.mulf %214, %216 : vector<4x128xf32>
    %c0_98 = arith.constant 0 : index
    %c3712 = arith.constant 3712 : index
    %218 = vector.load %arg2[%c0_98, %c3712] : memref<1x7424xf32, #tpu.memory_space<vmem>>, vector<1x128xf32>
    %219 = vector.broadcast %218 : vector<1x128xf32> to vector<4x128xf32>
    %220 = arith.addf %217, %219 : vector<4x128xf32>
    %cst_99 = arith.constant 5.000000e-01 : f32
    %221 = vector.broadcast %cst_99 : f32 to vector<4x128xf32>
    %222 = arith.mulf %221, %220 : vector<4x128xf32>
    %223 = math.tanh %222 : vector<4x128xf32>
    %cst_100 = arith.constant 5.000000e-01 : f32
    %224 = vector.broadcast %cst_100 : f32 to vector<4x128xf32>
    %225 = arith.mulf %224, %223 : vector<4x128xf32>
    %cst_101 = arith.constant 5.000000e-01 : f32
    %226 = vector.broadcast %cst_101 : f32 to vector<4x128xf32>
    %227 = arith.addf %225, %226 : vector<4x128xf32>
    %228 = arith.mulf %220, %227 : vector<4x128xf32>
    %c1056 = arith.constant 1056 : index
    %c0_102 = arith.constant 0 : index
    %229 = vector.load %arg1[%c1056, %c0_102] : memref<2368x128xf32, #tpu.memory_space<vmem>>, vector<128x128xf32>
    %cst_103 = arith.constant dense<0.000000e+00> : vector<4x128xf32>
    %230 = tpu.matmul %228, %229, %cst_103 {dimension_numbers = #tpu.dot_dimension_numbers<[1], [0], [0], [1], [0, 0, 1, 1], [], []>} : vector<4x128xf32>, vector<128x128xf32>, vector<4x128xf32> -> vector<4x128xf32>
    %c0_104 = arith.constant 0 : index
    %c3840 = arith.constant 3840 : index
    %231 = vector.load %arg2[%c0_104, %c3840] : memref<1x7424xf32, #tpu.memory_space<vmem>>, vector<1x128xf32>
    %232 = vector.broadcast %231 : vector<1x128xf32> to vector<4x128xf32>
    %233 = arith.addf %230, %232 : vector<4x128xf32>
    %234 = vector.extract_strided_slice %34 {offsets = [0, 192], sizes = [4, 128], strides = [1, 1]} : vector<4x416xf32> to vector<4x128xf32>
    %235 = arith.addf %233, %234 : vector<4x128xf32>
    %c288_105 = arith.constant 288 : index
    %c0_106 = arith.constant 0 : index
    %236 = vector.load %arg1[%c288_105, %c0_106] : memref<2368x128xf32, #tpu.memory_space<vmem>>, vector<128x128xf32>
    %cst_107 = arith.constant dense<0.000000e+00> : vector<4x128xf32>
    %237 = tpu.matmul %235, %236, %cst_107 {dimension_numbers = #tpu.dot_dimension_numbers<[1], [0], [0], [1], [0, 0, 1, 1], [], []>} : vector<4x128xf32>, vector<128x128xf32>, vector<4x128xf32> -> vector<4x128xf32>
    %238 = arith.subf %235, %237 : vector<4x128xf32>
    %239 = arith.mulf %238, %238 : vector<4x128xf32>
    %cst_108 = arith.constant dense<0.000000e+00> : vector<4x128xf32>
    %240 = tpu.matmul %239, %236, %cst_108 {dimension_numbers = #tpu.dot_dimension_numbers<[1], [0], [0], [1], [0, 0, 1, 1], [], []>} : vector<4x128xf32>, vector<128x128xf32>, vector<4x128xf32> -> vector<4x128xf32>
    %cst_109 = arith.constant 9.99999974E-6 : f32
    %241 = vector.broadcast %cst_109 : f32 to vector<4x128xf32>
    %242 = arith.addf %240, %241 : vector<4x128xf32>
    %243 = math.rsqrt %242 : vector<4x128xf32>
    %244 = arith.mulf %238, %243 : vector<4x128xf32>
    %c0_110 = arith.constant 0 : index
    %c3968 = arith.constant 3968 : index
    %245 = vector.load %arg2[%c0_110, %c3968] : memref<1x7424xf32, #tpu.memory_space<vmem>>, vector<1x128xf32>
    %246 = vector.broadcast %245 : vector<1x128xf32> to vector<4x128xf32>
    %247 = arith.mulf %244, %246 : vector<4x128xf32>
    %c0_111 = arith.constant 0 : index
    %c4096 = arith.constant 4096 : index
    %248 = vector.load %arg2[%c0_111, %c4096] : memref<1x7424xf32, #tpu.memory_space<vmem>>, vector<1x128xf32>
    %249 = vector.broadcast %248 : vector<1x128xf32> to vector<4x128xf32>
    %250 = arith.addf %247, %249 : vector<4x128xf32>
    %cst_112 = arith.constant 5.000000e-01 : f32
    %251 = vector.broadcast %cst_112 : f32 to vector<4x128xf32>
    %252 = arith.mulf %251, %250 : vector<4x128xf32>
    %253 = math.tanh %252 : vector<4x128xf32>
    %cst_113 = arith.constant 5.000000e-01 : f32
    %254 = vector.broadcast %cst_113 : f32 to vector<4x128xf32>
    %255 = arith.mulf %254, %253 : vector<4x128xf32>
    %cst_114 = arith.constant 5.000000e-01 : f32
    %256 = vector.broadcast %cst_114 : f32 to vector<4x128xf32>
    %257 = arith.addf %255, %256 : vector<4x128xf32>
    %258 = arith.mulf %250, %257 : vector<4x128xf32>
    %c1184 = arith.constant 1184 : index
    %c0_115 = arith.constant 0 : index
    %259 = vector.load %arg1[%c1184, %c0_115] : memref<2368x128xf32, #tpu.memory_space<vmem>>, vector<128x128xf32>
    %cst_116 = arith.constant dense<0.000000e+00> : vector<4x128xf32>
    %260 = tpu.matmul %258, %259, %cst_116 {dimension_numbers = #tpu.dot_dimension_numbers<[1], [0], [0], [1], [0, 0, 1, 1], [], []>} : vector<4x128xf32>, vector<128x128xf32>, vector<4x128xf32> -> vector<4x128xf32>
    %c0_117 = arith.constant 0 : index
    %c4224 = arith.constant 4224 : index
    %261 = vector.load %arg2[%c0_117, %c4224] : memref<1x7424xf32, #tpu.memory_space<vmem>>, vector<1x128xf32>
    %262 = vector.broadcast %261 : vector<1x128xf32> to vector<4x128xf32>
    %263 = arith.addf %260, %262 : vector<4x128xf32>
    %c1312 = arith.constant 1312 : index
    %c0_118 = arith.constant 0 : index
    %264 = vector.load %arg1[%c1312, %c0_118] : memref<2368x128xf32, #tpu.memory_space<vmem>>, vector<128x128xf32>
    %cst_119 = arith.constant dense<0.000000e+00> : vector<4x128xf32>
    %265 = tpu.matmul %263, %264, %cst_119 {dimension_numbers = #tpu.dot_dimension_numbers<[1], [0], [0], [1], [0, 0, 1, 1], [], []>} : vector<4x128xf32>, vector<128x128xf32>, vector<4x128xf32> -> vector<4x128xf32>
    %c0_120 = arith.constant 0 : index
    %c4352 = arith.constant 4352 : index
    %266 = vector.load %arg2[%c0_120, %c4352] : memref<1x7424xf32, #tpu.memory_space<vmem>>, vector<1x128xf32>
    %267 = vector.broadcast %266 : vector<1x128xf32> to vector<4x128xf32>
    %268 = arith.addf %265, %267 : vector<4x128xf32>
    %269 = arith.addf %263, %268 : vector<4x128xf32>
    %cst_121 = arith.constant dense<0.000000e+00> : vector<4xf32>
    %270 = vector.multi_reduction <add>, %269, %cst_121 [1] : vector<4x128xf32> to vector<4xf32>
    %271 = vector.shape_cast %270 : vector<4xf32> to vector<4x1xf32>
    %cst_122 = arith.constant 1.280000e+02 : f32
    %272 = vector.broadcast %cst_122 : f32 to vector<4x1xf32>
    %273 = arith.divf %271, %272 : vector<4x1xf32>
    %274 = vector.broadcast %273 : vector<4x1xf32> to vector<4x128xf32>
    %275 = arith.subf %269, %274 : vector<4x128xf32>
    %276 = arith.mulf %275, %275 : vector<4x128xf32>
    %cst_123 = arith.constant dense<0.000000e+00> : vector<4xf32>
    %277 = vector.multi_reduction <add>, %276, %cst_123 [1] : vector<4x128xf32> to vector<4xf32>
    %278 = vector.shape_cast %277 : vector<4xf32> to vector<4x1xf32>
    %cst_124 = arith.constant 1.280000e+02 : f32
    %279 = vector.broadcast %cst_124 : f32 to vector<4x1xf32>
    %280 = arith.divf %278, %279 : vector<4x1xf32>
    %281 = vector.broadcast %273 : vector<4x1xf32> to vector<4x128xf32>
    %282 = arith.subf %269, %281 : vector<4x128xf32>
    %cst_125 = arith.constant 9.99999974E-6 : f32
    %283 = vector.broadcast %cst_125 : f32 to vector<4x1xf32>
    %284 = arith.addf %280, %283 : vector<4x1xf32>
    %285 = math.rsqrt %284 : vector<4x1xf32>
    %286 = vector.broadcast %285 : vector<4x1xf32> to vector<4x128xf32>
    %287 = arith.mulf %282, %286 : vector<4x128xf32>
    %c0_126 = arith.constant 0 : index
    %c4480 = arith.constant 4480 : index
    %288 = vector.load %arg2[%c0_126, %c4480] : memref<1x7424xf32, #tpu.memory_space<vmem>>, vector<1x128xf32>
    %289 = vector.broadcast %288 : vector<1x128xf32> to vector<4x128xf32>
    %290 = arith.mulf %287, %289 : vector<4x128xf32>
    %c0_127 = arith.constant 0 : index
    %c4608 = arith.constant 4608 : index
    %291 = vector.load %arg2[%c0_127, %c4608] : memref<1x7424xf32, #tpu.memory_space<vmem>>, vector<1x128xf32>
    %292 = vector.broadcast %291 : vector<1x128xf32> to vector<4x128xf32>
    %293 = arith.addf %290, %292 : vector<4x128xf32>
    %294 = arith.addf %293, %205 : vector<4x128xf32>
    %c1696 = arith.constant 1696 : index
    %c0_128 = arith.constant 0 : index
    %295 = vector.load %arg1[%c1696, %c0_128] : memref<2368x128xf32, #tpu.memory_space<vmem>>, vector<128x64xf32>
    %cst_129 = arith.constant dense<0.000000e+00> : vector<4x64xf32>
    %296 = tpu.matmul %294, %295, %cst_129 {dimension_numbers = #tpu.dot_dimension_numbers<[1], [0], [0], [1], [0, 0, 1, 1], [], []>} : vector<4x128xf32>, vector<128x64xf32>, vector<4x64xf32> -> vector<4x64xf32>
    %c1824 = arith.constant 1824 : index
    %c0_130 = arith.constant 0 : index
    %297 = vector.load %arg1[%c1824, %c0_130] : memref<2368x128xf32, #tpu.memory_space<vmem>>, vector<128x64xf32>
    %cst_131 = arith.constant dense<0.000000e+00> : vector<4x64xf32>
    %298 = tpu.matmul %205, %297, %cst_131 {dimension_numbers = #tpu.dot_dimension_numbers<[1], [0], [0], [1], [0, 0, 1, 1], [], []>} : vector<4x128xf32>, vector<128x64xf32>, vector<4x64xf32> -> vector<4x64xf32>
    %299 = arith.addf %296, %298 : vector<4x64xf32>
    %c0_132 = arith.constant 0 : index
    %c5376 = arith.constant 5376 : index
    %300 = vector.load %arg2[%c0_132, %c5376] : memref<1x7424xf32, #tpu.memory_space<vmem>>, vector<1x64xf32>
    %301 = vector.broadcast %300 : vector<1x64xf32> to vector<4x64xf32>
    %302 = arith.addf %299, %301 : vector<4x64xf32>
    %c160 = arith.constant 160 : index
    %c0_133 = arith.constant 0 : index
    %303 = vector.load %arg1[%c160, %c0_133] : memref<2368x128xf32, #tpu.memory_space<vmem>>, vector<128x128xf32>
    %cst_134 = arith.constant dense<0.000000e+00> : vector<4x128xf32>
    %304 = tpu.matmul %294, %303, %cst_134 {dimension_numbers = #tpu.dot_dimension_numbers<[1], [0], [0], [1], [0, 0, 1, 1], [], []>} : vector<4x128xf32>, vector<128x128xf32>, vector<4x128xf32> -> vector<4x128xf32>
    %305 = arith.subf %294, %304 : vector<4x128xf32>
    %306 = arith.mulf %305, %305 : vector<4x128xf32>
    %cst_135 = arith.constant dense<0.000000e+00> : vector<4x128xf32>
    %307 = tpu.matmul %306, %303, %cst_135 {dimension_numbers = #tpu.dot_dimension_numbers<[1], [0], [0], [1], [0, 0, 1, 1], [], []>} : vector<4x128xf32>, vector<128x128xf32>, vector<4x128xf32> -> vector<4x128xf32>
    %cst_136 = arith.constant 9.99999974E-6 : f32
    %308 = vector.broadcast %cst_136 : f32 to vector<4x128xf32>
    %309 = arith.addf %307, %308 : vector<4x128xf32>
    %310 = math.rsqrt %309 : vector<4x128xf32>
    %311 = arith.mulf %305, %310 : vector<4x128xf32>
    %c0_137 = arith.constant 0 : index
    %c4736 = arith.constant 4736 : index
    %312 = vector.load %arg2[%c0_137, %c4736] : memref<1x7424xf32, #tpu.memory_space<vmem>>, vector<1x128xf32>
    %313 = vector.broadcast %312 : vector<1x128xf32> to vector<4x128xf32>
    %314 = arith.mulf %311, %313 : vector<4x128xf32>
    %c0_138 = arith.constant 0 : index
    %c4864 = arith.constant 4864 : index
    %315 = vector.load %arg2[%c0_138, %c4864] : memref<1x7424xf32, #tpu.memory_space<vmem>>, vector<1x128xf32>
    %316 = vector.broadcast %315 : vector<1x128xf32> to vector<4x128xf32>
    %317 = arith.addf %314, %316 : vector<4x128xf32>
    %cst_139 = arith.constant 5.000000e-01 : f32
    %318 = vector.broadcast %cst_139 : f32 to vector<4x128xf32>
    %319 = arith.mulf %318, %317 : vector<4x128xf32>
    %320 = math.tanh %319 : vector<4x128xf32>
    %cst_140 = arith.constant 5.000000e-01 : f32
    %321 = vector.broadcast %cst_140 : f32 to vector<4x128xf32>
    %322 = arith.mulf %321, %320 : vector<4x128xf32>
    %cst_141 = arith.constant 5.000000e-01 : f32
    %323 = vector.broadcast %cst_141 : f32 to vector<4x128xf32>
    %324 = arith.addf %322, %323 : vector<4x128xf32>
    %325 = arith.mulf %317, %324 : vector<4x128xf32>
    %c160_142 = arith.constant 160 : index
    %c0_143 = arith.constant 0 : index
    %326 = vector.load %arg1[%c160_142, %c0_143] : memref<2368x128xf32, #tpu.memory_space<vmem>>, vector<128x128xf32>
    %cst_144 = arith.constant dense<0.000000e+00> : vector<4x128xf32>
    %327 = tpu.matmul %205, %326, %cst_144 {dimension_numbers = #tpu.dot_dimension_numbers<[1], [0], [0], [1], [0, 0, 1, 1], [], []>} : vector<4x128xf32>, vector<128x128xf32>, vector<4x128xf32> -> vector<4x128xf32>
    %328 = arith.subf %205, %327 : vector<4x128xf32>
    %329 = arith.mulf %328, %328 : vector<4x128xf32>
    %cst_145 = arith.constant dense<0.000000e+00> : vector<4x128xf32>
    %330 = tpu.matmul %329, %326, %cst_145 {dimension_numbers = #tpu.dot_dimension_numbers<[1], [0], [0], [1], [0, 0, 1, 1], [], []>} : vector<4x128xf32>, vector<128x128xf32>, vector<4x128xf32> -> vector<4x128xf32>
    %cst_146 = arith.constant 9.99999974E-6 : f32
    %331 = vector.broadcast %cst_146 : f32 to vector<4x128xf32>
    %332 = arith.addf %330, %331 : vector<4x128xf32>
    %333 = math.rsqrt %332 : vector<4x128xf32>
    %334 = arith.mulf %328, %333 : vector<4x128xf32>
    %c0_147 = arith.constant 0 : index
    %c4992 = arith.constant 4992 : index
    %335 = vector.load %arg2[%c0_147, %c4992] : memref<1x7424xf32, #tpu.memory_space<vmem>>, vector<1x128xf32>
    %336 = vector.broadcast %335 : vector<1x128xf32> to vector<4x128xf32>
    %337 = arith.mulf %334, %336 : vector<4x128xf32>
    %c0_148 = arith.constant 0 : index
    %c5120 = arith.constant 5120 : index
    %338 = vector.load %arg2[%c0_148, %c5120] : memref<1x7424xf32, #tpu.memory_space<vmem>>, vector<1x128xf32>
    %339 = vector.broadcast %338 : vector<1x128xf32> to vector<4x128xf32>
    %340 = arith.addf %337, %339 : vector<4x128xf32>
    %cst_149 = arith.constant 5.000000e-01 : f32
    %341 = vector.broadcast %cst_149 : f32 to vector<4x128xf32>
    %342 = arith.mulf %341, %340 : vector<4x128xf32>
    %343 = math.tanh %342 : vector<4x128xf32>
    %cst_150 = arith.constant 5.000000e-01 : f32
    %344 = vector.broadcast %cst_150 : f32 to vector<4x128xf32>
    %345 = arith.mulf %344, %343 : vector<4x128xf32>
    %cst_151 = arith.constant 5.000000e-01 : f32
    %346 = vector.broadcast %cst_151 : f32 to vector<4x128xf32>
    %347 = arith.addf %345, %346 : vector<4x128xf32>
    %348 = arith.mulf %340, %347 : vector<4x128xf32>
    %c1440 = arith.constant 1440 : index
    %c0_152 = arith.constant 0 : index
    %349 = vector.load %arg1[%c1440, %c0_152] : memref<2368x128xf32, #tpu.memory_space<vmem>>, vector<128x64xf32>
    %cst_153 = arith.constant dense<0.000000e+00> : vector<4x64xf32>
    %350 = tpu.matmul %325, %349, %cst_153 {dimension_numbers = #tpu.dot_dimension_numbers<[1], [0], [0], [1], [0, 0, 1, 1], [], []>} : vector<4x128xf32>, vector<128x64xf32>, vector<4x64xf32> -> vector<4x64xf32>
    %c1568 = arith.constant 1568 : index
    %c0_154 = arith.constant 0 : index
    %351 = vector.load %arg1[%c1568, %c0_154] : memref<2368x128xf32, #tpu.memory_space<vmem>>, vector<128x64xf32>
    %cst_155 = arith.constant dense<0.000000e+00> : vector<4x64xf32>
    %352 = tpu.matmul %348, %351, %cst_155 {dimension_numbers = #tpu.dot_dimension_numbers<[1], [0], [0], [1], [0, 0, 1, 1], [], []>} : vector<4x128xf32>, vector<128x64xf32>, vector<4x64xf32> -> vector<4x64xf32>
    %353 = arith.addf %350, %352 : vector<4x64xf32>
    %c0_156 = arith.constant 0 : index
    %c5248 = arith.constant 5248 : index
    %354 = vector.load %arg2[%c0_156, %c5248] : memref<1x7424xf32, #tpu.memory_space<vmem>>, vector<1x64xf32>
    %355 = vector.broadcast %354 : vector<1x64xf32> to vector<4x64xf32>
    %356 = arith.addf %353, %355 : vector<4x64xf32>
    %357 = vector.extract_strided_slice %34 {offsets = [0, 320], sizes = [4, 64], strides = [1, 1]} : vector<4x416xf32> to vector<4x64xf32>
    %358 = arith.addf %356, %357 : vector<4x64xf32>
    %c96_157 = arith.constant 96 : index
    %c0_158 = arith.constant 0 : index
    %359 = vector.load %arg1[%c96_157, %c0_158] : memref<2368x128xf32, #tpu.memory_space<vmem>>, vector<64x64xf32>
    %cst_159 = arith.constant dense<0.000000e+00> : vector<4x64xf32>
    %360 = tpu.matmul %358, %359, %cst_159 {dimension_numbers = #tpu.dot_dimension_numbers<[1], [0], [0], [1], [0, 0, 1, 1], [], []>} : vector<4x64xf32>, vector<64x64xf32>, vector<4x64xf32> -> vector<4x64xf32>
    %361 = arith.subf %358, %360 : vector<4x64xf32>
    %362 = arith.mulf %361, %361 : vector<4x64xf32>
    %cst_160 = arith.constant dense<0.000000e+00> : vector<4x64xf32>
    %363 = tpu.matmul %362, %359, %cst_160 {dimension_numbers = #tpu.dot_dimension_numbers<[1], [0], [0], [1], [0, 0, 1, 1], [], []>} : vector<4x64xf32>, vector<64x64xf32>, vector<4x64xf32> -> vector<4x64xf32>
    %cst_161 = arith.constant 9.99999974E-6 : f32
    %364 = vector.broadcast %cst_161 : f32 to vector<4x64xf32>
    %365 = arith.addf %363, %364 : vector<4x64xf32>
    %366 = math.rsqrt %365 : vector<4x64xf32>
    %367 = arith.mulf %361, %366 : vector<4x64xf32>
    %c0_162 = arith.constant 0 : index
    %c5504 = arith.constant 5504 : index
    %368 = vector.load %arg2[%c0_162, %c5504] : memref<1x7424xf32, #tpu.memory_space<vmem>>, vector<1x64xf32>
    %369 = vector.broadcast %368 : vector<1x64xf32> to vector<4x64xf32>
    %370 = arith.mulf %367, %369 : vector<4x64xf32>
    %c0_163 = arith.constant 0 : index
    %c5632 = arith.constant 5632 : index
    %371 = vector.load %arg2[%c0_163, %c5632] : memref<1x7424xf32, #tpu.memory_space<vmem>>, vector<1x64xf32>
    %372 = vector.broadcast %371 : vector<1x64xf32> to vector<4x64xf32>
    %373 = arith.addf %370, %372 : vector<4x64xf32>
    %cst_164 = arith.constant 5.000000e-01 : f32
    %374 = vector.broadcast %cst_164 : f32 to vector<4x64xf32>
    %375 = arith.mulf %374, %373 : vector<4x64xf32>
    %376 = math.tanh %375 : vector<4x64xf32>
    %cst_165 = arith.constant 5.000000e-01 : f32
    %377 = vector.broadcast %cst_165 : f32 to vector<4x64xf32>
    %378 = arith.mulf %377, %376 : vector<4x64xf32>
    %cst_166 = arith.constant 5.000000e-01 : f32
    %379 = vector.broadcast %cst_166 : f32 to vector<4x64xf32>
    %380 = arith.addf %378, %379 : vector<4x64xf32>
    %381 = arith.mulf %373, %380 : vector<4x64xf32>
    %c1952 = arith.constant 1952 : index
    %c0_167 = arith.constant 0 : index
    %382 = vector.load %arg1[%c1952, %c0_167] : memref<2368x128xf32, #tpu.memory_space<vmem>>, vector<64x64xf32>
    %cst_168 = arith.constant dense<0.000000e+00> : vector<4x64xf32>
    %383 = tpu.matmul %381, %382, %cst_168 {dimension_numbers = #tpu.dot_dimension_numbers<[1], [0], [0], [1], [0, 0, 1, 1], [], []>} : vector<4x64xf32>, vector<64x64xf32>, vector<4x64xf32> -> vector<4x64xf32>
    %c0_169 = arith.constant 0 : index
    %c5760 = arith.constant 5760 : index
    %384 = vector.load %arg2[%c0_169, %c5760] : memref<1x7424xf32, #tpu.memory_space<vmem>>, vector<1x64xf32>
    %385 = vector.broadcast %384 : vector<1x64xf32> to vector<4x64xf32>
    %386 = arith.addf %383, %385 : vector<4x64xf32>
    %c2016 = arith.constant 2016 : index
    %c0_170 = arith.constant 0 : index
    %387 = vector.load %arg1[%c2016, %c0_170] : memref<2368x128xf32, #tpu.memory_space<vmem>>, vector<64x64xf32>
    %cst_171 = arith.constant dense<0.000000e+00> : vector<4x64xf32>
    %388 = tpu.matmul %386, %387, %cst_171 {dimension_numbers = #tpu.dot_dimension_numbers<[1], [0], [0], [1], [0, 0, 1, 1], [], []>} : vector<4x64xf32>, vector<64x64xf32>, vector<4x64xf32> -> vector<4x64xf32>
    %c0_172 = arith.constant 0 : index
    %c5888 = arith.constant 5888 : index
    %389 = vector.load %arg2[%c0_172, %c5888] : memref<1x7424xf32, #tpu.memory_space<vmem>>, vector<1x64xf32>
    %390 = vector.broadcast %389 : vector<1x64xf32> to vector<4x64xf32>
    %391 = arith.addf %388, %390 : vector<4x64xf32>
    %392 = arith.addf %386, %391 : vector<4x64xf32>
    %cst_173 = arith.constant dense<0.000000e+00> : vector<4xf32>
    %393 = vector.multi_reduction <add>, %392, %cst_173 [1] : vector<4x64xf32> to vector<4xf32>
    %394 = vector.shape_cast %393 : vector<4xf32> to vector<4x1xf32>
    %cst_174 = arith.constant 6.400000e+01 : f32
    %395 = vector.broadcast %cst_174 : f32 to vector<4x1xf32>
    %396 = arith.divf %394, %395 : vector<4x1xf32>
    %397 = vector.broadcast %396 : vector<4x1xf32> to vector<4x64xf32>
    %398 = arith.subf %392, %397 : vector<4x64xf32>
    %399 = arith.mulf %398, %398 : vector<4x64xf32>
    %cst_175 = arith.constant dense<0.000000e+00> : vector<4xf32>
    %400 = vector.multi_reduction <add>, %399, %cst_175 [1] : vector<4x64xf32> to vector<4xf32>
    %401 = vector.shape_cast %400 : vector<4xf32> to vector<4x1xf32>
    %cst_176 = arith.constant 6.400000e+01 : f32
    %402 = vector.broadcast %cst_176 : f32 to vector<4x1xf32>
    %403 = arith.divf %401, %402 : vector<4x1xf32>
    %404 = vector.broadcast %396 : vector<4x1xf32> to vector<4x64xf32>
    %405 = arith.subf %392, %404 : vector<4x64xf32>
    %cst_177 = arith.constant 9.99999974E-6 : f32
    %406 = vector.broadcast %cst_177 : f32 to vector<4x1xf32>
    %407 = arith.addf %403, %406 : vector<4x1xf32>
    %408 = math.rsqrt %407 : vector<4x1xf32>
    %409 = vector.broadcast %408 : vector<4x1xf32> to vector<4x64xf32>
    %410 = arith.mulf %405, %409 : vector<4x64xf32>
    %c0_178 = arith.constant 0 : index
    %c6016 = arith.constant 6016 : index
    %411 = vector.load %arg2[%c0_178, %c6016] : memref<1x7424xf32, #tpu.memory_space<vmem>>, vector<1x64xf32>
    %412 = vector.broadcast %411 : vector<1x64xf32> to vector<4x64xf32>
    %413 = arith.mulf %410, %412 : vector<4x64xf32>
    %c0_179 = arith.constant 0 : index
    %c6144 = arith.constant 6144 : index
    %414 = vector.load %arg2[%c0_179, %c6144] : memref<1x7424xf32, #tpu.memory_space<vmem>>, vector<1x64xf32>
    %415 = vector.broadcast %414 : vector<1x64xf32> to vector<4x64xf32>
    %416 = arith.addf %413, %415 : vector<4x64xf32>
    %417 = arith.addf %416, %302 : vector<4x64xf32>
    %c2208 = arith.constant 2208 : index
    %c0_180 = arith.constant 0 : index
    %418 = vector.load %arg1[%c2208, %c0_180] : memref<2368x128xf32, #tpu.memory_space<vmem>>, vector<64x32xf32>
    %cst_181 = arith.constant dense<0.000000e+00> : vector<4x32xf32>
    %419 = tpu.matmul %417, %418, %cst_181 {dimension_numbers = #tpu.dot_dimension_numbers<[1], [0], [0], [1], [0, 0, 1, 1], [], []>} : vector<4x64xf32>, vector<64x32xf32>, vector<4x32xf32> -> vector<4x32xf32>
    %c2272 = arith.constant 2272 : index
    %c0_182 = arith.constant 0 : index
    %420 = vector.load %arg1[%c2272, %c0_182] : memref<2368x128xf32, #tpu.memory_space<vmem>>, vector<64x32xf32>
    %cst_183 = arith.constant dense<0.000000e+00> : vector<4x32xf32>
    %421 = tpu.matmul %111, %420, %cst_183 {dimension_numbers = #tpu.dot_dimension_numbers<[1], [0], [0], [1], [0, 0, 1, 1], [], []>} : vector<4x64xf32>, vector<64x32xf32>, vector<4x32xf32> -> vector<4x32xf32>
    %422 = arith.addf %419, %421 : vector<4x32xf32>
    %c0_184 = arith.constant 0 : index
    %c6912 = arith.constant 6912 : index
    %423 = vector.load %arg2[%c0_184, %c6912] : memref<1x7424xf32, #tpu.memory_space<vmem>>, vector<1x32xf32>
    %424 = vector.broadcast %423 : vector<1x32xf32> to vector<4x32xf32>
    %425 = arith.addf %422, %424 : vector<4x32xf32>
    %c32 = arith.constant 32 : index
    %c0_185 = arith.constant 0 : index
    %426 = vector.load %arg1[%c32, %c0_185] : memref<2368x128xf32, #tpu.memory_space<vmem>>, vector<64x64xf32>
    %cst_186 = arith.constant dense<0.000000e+00> : vector<4x64xf32>
    %427 = tpu.matmul %417, %426, %cst_186 {dimension_numbers = #tpu.dot_dimension_numbers<[1], [0], [0], [1], [0, 0, 1, 1], [], []>} : vector<4x64xf32>, vector<64x64xf32>, vector<4x64xf32> -> vector<4x64xf32>
    %428 = arith.subf %417, %427 : vector<4x64xf32>
    %429 = arith.mulf %428, %428 : vector<4x64xf32>
    %cst_187 = arith.constant dense<0.000000e+00> : vector<4x64xf32>
    %430 = tpu.matmul %429, %426, %cst_187 {dimension_numbers = #tpu.dot_dimension_numbers<[1], [0], [0], [1], [0, 0, 1, 1], [], []>} : vector<4x64xf32>, vector<64x64xf32>, vector<4x64xf32> -> vector<4x64xf32>
    %cst_188 = arith.constant 9.99999974E-6 : f32
    %431 = vector.broadcast %cst_188 : f32 to vector<4x64xf32>
    %432 = arith.addf %430, %431 : vector<4x64xf32>
    %433 = math.rsqrt %432 : vector<4x64xf32>
    %434 = arith.mulf %428, %433 : vector<4x64xf32>
    %c0_189 = arith.constant 0 : index
    %c6272 = arith.constant 6272 : index
    %435 = vector.load %arg2[%c0_189, %c6272] : memref<1x7424xf32, #tpu.memory_space<vmem>>, vector<1x64xf32>
    %436 = vector.broadcast %435 : vector<1x64xf32> to vector<4x64xf32>
    %437 = arith.mulf %434, %436 : vector<4x64xf32>
    %c0_190 = arith.constant 0 : index
    %c6400 = arith.constant 6400 : index
    %438 = vector.load %arg2[%c0_190, %c6400] : memref<1x7424xf32, #tpu.memory_space<vmem>>, vector<1x64xf32>
    %439 = vector.broadcast %438 : vector<1x64xf32> to vector<4x64xf32>
    %440 = arith.addf %437, %439 : vector<4x64xf32>
    %cst_191 = arith.constant 5.000000e-01 : f32
    %441 = vector.broadcast %cst_191 : f32 to vector<4x64xf32>
    %442 = arith.mulf %441, %440 : vector<4x64xf32>
    %443 = math.tanh %442 : vector<4x64xf32>
    %cst_192 = arith.constant 5.000000e-01 : f32
    %444 = vector.broadcast %cst_192 : f32 to vector<4x64xf32>
    %445 = arith.mulf %444, %443 : vector<4x64xf32>
    %cst_193 = arith.constant 5.000000e-01 : f32
    %446 = vector.broadcast %cst_193 : f32 to vector<4x64xf32>
    %447 = arith.addf %445, %446 : vector<4x64xf32>
    %448 = arith.mulf %440, %447 : vector<4x64xf32>
    %c32_194 = arith.constant 32 : index
    %c0_195 = arith.constant 0 : index
    %449 = vector.load %arg1[%c32_194, %c0_195] : memref<2368x128xf32, #tpu.memory_space<vmem>>, vector<64x64xf32>
    %cst_196 = arith.constant dense<0.000000e+00> : vector<4x64xf32>
    %450 = tpu.matmul %111, %449, %cst_196 {dimension_numbers = #tpu.dot_dimension_numbers<[1], [0], [0], [1], [0, 0, 1, 1], [], []>} : vector<4x64xf32>, vector<64x64xf32>, vector<4x64xf32> -> vector<4x64xf32>
    %451 = arith.subf %111, %450 : vector<4x64xf32>
    %452 = arith.mulf %451, %451 : vector<4x64xf32>
    %cst_197 = arith.constant dense<0.000000e+00> : vector<4x64xf32>
    %453 = tpu.matmul %452, %449, %cst_197 {dimension_numbers = #tpu.dot_dimension_numbers<[1], [0], [0], [1], [0, 0, 1, 1], [], []>} : vector<4x64xf32>, vector<64x64xf32>, vector<4x64xf32> -> vector<4x64xf32>
    %cst_198 = arith.constant 9.99999974E-6 : f32
    %454 = vector.broadcast %cst_198 : f32 to vector<4x64xf32>
    %455 = arith.addf %453, %454 : vector<4x64xf32>
    %456 = math.rsqrt %455 : vector<4x64xf32>
    %457 = arith.mulf %451, %456 : vector<4x64xf32>
    %c0_199 = arith.constant 0 : index
    %c6528 = arith.constant 6528 : index
    %458 = vector.load %arg2[%c0_199, %c6528] : memref<1x7424xf32, #tpu.memory_space<vmem>>, vector<1x64xf32>
    %459 = vector.broadcast %458 : vector<1x64xf32> to vector<4x64xf32>
    %460 = arith.mulf %457, %459 : vector<4x64xf32>
    %c0_200 = arith.constant 0 : index
    %c6656 = arith.constant 6656 : index
    %461 = vector.load %arg2[%c0_200, %c6656] : memref<1x7424xf32, #tpu.memory_space<vmem>>, vector<1x64xf32>
    %462 = vector.broadcast %461 : vector<1x64xf32> to vector<4x64xf32>
    %463 = arith.addf %460, %462 : vector<4x64xf32>
    %cst_201 = arith.constant 5.000000e-01 : f32
    %464 = vector.broadcast %cst_201 : f32 to vector<4x64xf32>
    %465 = arith.mulf %464, %463 : vector<4x64xf32>
    %466 = math.tanh %465 : vector<4x64xf32>
    %cst_202 = arith.constant 5.000000e-01 : f32
    %467 = vector.broadcast %cst_202 : f32 to vector<4x64xf32>
    %468 = arith.mulf %467, %466 : vector<4x64xf32>
    %cst_203 = arith.constant 5.000000e-01 : f32
    %469 = vector.broadcast %cst_203 : f32 to vector<4x64xf32>
    %470 = arith.addf %468, %469 : vector<4x64xf32>
    %471 = arith.mulf %463, %470 : vector<4x64xf32>
    %c2080 = arith.constant 2080 : index
    %c0_204 = arith.constant 0 : index
    %472 = vector.load %arg1[%c2080, %c0_204] : memref<2368x128xf32, #tpu.memory_space<vmem>>, vector<64x32xf32>
    %cst_205 = arith.constant dense<0.000000e+00> : vector<4x32xf32>
    %473 = tpu.matmul %448, %472, %cst_205 {dimension_numbers = #tpu.dot_dimension_numbers<[1], [0], [0], [1], [0, 0, 1, 1], [], []>} : vector<4x64xf32>, vector<64x32xf32>, vector<4x32xf32> -> vector<4x32xf32>
    %c2144 = arith.constant 2144 : index
    %c0_206 = arith.constant 0 : index
    %474 = vector.load %arg1[%c2144, %c0_206] : memref<2368x128xf32, #tpu.memory_space<vmem>>, vector<64x32xf32>
    %cst_207 = arith.constant dense<0.000000e+00> : vector<4x32xf32>
    %475 = tpu.matmul %471, %474, %cst_207 {dimension_numbers = #tpu.dot_dimension_numbers<[1], [0], [0], [1], [0, 0, 1, 1], [], []>} : vector<4x64xf32>, vector<64x32xf32>, vector<4x32xf32> -> vector<4x32xf32>
    %476 = arith.addf %473, %475 : vector<4x32xf32>
    %c0_208 = arith.constant 0 : index
    %c6784 = arith.constant 6784 : index
    %477 = vector.load %arg2[%c0_208, %c6784] : memref<1x7424xf32, #tpu.memory_space<vmem>>, vector<1x32xf32>
    %478 = vector.broadcast %477 : vector<1x32xf32> to vector<4x32xf32>
    %479 = arith.addf %476, %478 : vector<4x32xf32>
    %480 = vector.extract_strided_slice %34 {offsets = [0, 384], sizes = [4, 32], strides = [1, 1]} : vector<4x416xf32> to vector<4x32xf32>
    %481 = arith.addf %479, %480 : vector<4x32xf32>
    %c0_209 = arith.constant 0 : index
    %c0_210 = arith.constant 0 : index
    %482 = vector.load %arg1[%c0_209, %c0_210] : memref<2368x128xf32, #tpu.memory_space<vmem>>, vector<32x32xf32>
    %cst_211 = arith.constant dense<0.000000e+00> : vector<4x32xf32>
    %483 = tpu.matmul %481, %482, %cst_211 {dimension_numbers = #tpu.dot_dimension_numbers<[1], [0], [0], [1], [0, 0, 1, 1], [], []>} : vector<4x32xf32>, vector<32x32xf32>, vector<4x32xf32> -> vector<4x32xf32>
    %484 = arith.subf %481, %483 : vector<4x32xf32>
    %485 = arith.mulf %484, %484 : vector<4x32xf32>
    %cst_212 = arith.constant dense<0.000000e+00> : vector<4x32xf32>
    %486 = tpu.matmul %485, %482, %cst_212 {dimension_numbers = #tpu.dot_dimension_numbers<[1], [0], [0], [1], [0, 0, 1, 1], [], []>} : vector<4x32xf32>, vector<32x32xf32>, vector<4x32xf32> -> vector<4x32xf32>
    %cst_213 = arith.constant 9.99999974E-6 : f32
    %487 = vector.broadcast %cst_213 : f32 to vector<4x32xf32>
    %488 = arith.addf %486, %487 : vector<4x32xf32>
    %489 = math.rsqrt %488 : vector<4x32xf32>
    %490 = arith.mulf %484, %489 : vector<4x32xf32>
    %c0_214 = arith.constant 0 : index
    %c7040 = arith.constant 7040 : index
    %491 = vector.load %arg2[%c0_214, %c7040] : memref<1x7424xf32, #tpu.memory_space<vmem>>, vector<1x32xf32>
    %492 = vector.broadcast %491 : vector<1x32xf32> to vector<4x32xf32>
    %493 = arith.mulf %490, %492 : vector<4x32xf32>
    %c0_215 = arith.constant 0 : index
    %c7168 = arith.constant 7168 : index
    %494 = vector.load %arg2[%c0_215, %c7168] : memref<1x7424xf32, #tpu.memory_space<vmem>>, vector<1x32xf32>
    %495 = vector.broadcast %494 : vector<1x32xf32> to vector<4x32xf32>
    %496 = arith.addf %493, %495 : vector<4x32xf32>
    %cst_216 = arith.constant 5.000000e-01 : f32
    %497 = vector.broadcast %cst_216 : f32 to vector<4x32xf32>
    %498 = arith.mulf %497, %496 : vector<4x32xf32>
    %499 = math.tanh %498 : vector<4x32xf32>
    %cst_217 = arith.constant 5.000000e-01 : f32
    %500 = vector.broadcast %cst_217 : f32 to vector<4x32xf32>
    %501 = arith.mulf %500, %499 : vector<4x32xf32>
    %cst_218 = arith.constant 5.000000e-01 : f32
    %502 = vector.broadcast %cst_218 : f32 to vector<4x32xf32>
    %503 = arith.addf %501, %502 : vector<4x32xf32>
    %504 = arith.mulf %496, %503 : vector<4x32xf32>
    %c2336 = arith.constant 2336 : index
    %c0_219 = arith.constant 0 : index
    %505 = vector.load %arg1[%c2336, %c0_219] : memref<2368x128xf32, #tpu.memory_space<vmem>>, vector<32x32xf32>
    %cst_220 = arith.constant dense<0.000000e+00> : vector<4x32xf32>
    %506 = tpu.matmul %504, %505, %cst_220 {dimension_numbers = #tpu.dot_dimension_numbers<[1], [0], [0], [1], [0, 0, 1, 1], [], []>} : vector<4x32xf32>, vector<32x32xf32>, vector<4x32xf32> -> vector<4x32xf32>
    %c0_221 = arith.constant 0 : index
    %c7296 = arith.constant 7296 : index
    %507 = vector.load %arg2[%c0_221, %c7296] : memref<1x7424xf32, #tpu.memory_space<vmem>>, vector<1x32xf32>
    %508 = vector.broadcast %507 : vector<1x32xf32> to vector<4x32xf32>
    %509 = arith.addf %506, %508 : vector<4x32xf32>
    %510 = arith.addf %509, %425 : vector<4x32xf32>
    %c0_222 = arith.constant 0 : index
    %c0_223 = arith.constant 0 : index
    %511 = vector.load %arg1[%c0_222, %c0_223] : memref<2368x128xf32, #tpu.memory_space<vmem>>, vector<32x32xf32>
    %cst_224 = arith.constant dense<0.000000e+00> : vector<4x32xf32>
    %512 = tpu.matmul %510, %511, %cst_224 {dimension_numbers = #tpu.dot_dimension_numbers<[1], [0], [0], [1], [0, 0, 1, 1], [], []>} : vector<4x32xf32>, vector<32x32xf32>, vector<4x32xf32> -> vector<4x32xf32>
    %513 = arith.subf %510, %512 : vector<4x32xf32>
    %514 = arith.mulf %513, %513 : vector<4x32xf32>
    %cst_225 = arith.constant dense<0.000000e+00> : vector<4x32xf32>
    %515 = tpu.matmul %514, %511, %cst_225 {dimension_numbers = #tpu.dot_dimension_numbers<[1], [0], [0], [1], [0, 0, 1, 1], [], []>} : vector<4x32xf32>, vector<32x32xf32>, vector<4x32xf32> -> vector<4x32xf32>
    %cst_226 = arith.constant 9.99999974E-6 : f32
    %516 = vector.broadcast %cst_226 : f32 to vector<4x32xf32>
    %517 = arith.addf %515, %516 : vector<4x32xf32>
    %518 = math.rsqrt %517 : vector<4x32xf32>
    %519 = arith.mulf %513, %518 : vector<4x32xf32>
    %c0_227 = arith.constant 0 : index
    %c512 = arith.constant 512 : index
    %520 = vector.load %arg2[%c0_227, %c512] : memref<1x7424xf32, #tpu.memory_space<vmem>>, vector<1x32xf32>
    %521 = vector.broadcast %520 : vector<1x32xf32> to vector<4x32xf32>
    %522 = arith.mulf %519, %521 : vector<4x32xf32>
    %c0_228 = arith.constant 0 : index
    %c640 = arith.constant 640 : index
    %523 = vector.load %arg2[%c0_228, %c640] : memref<1x7424xf32, #tpu.memory_space<vmem>>, vector<1x32xf32>
    %524 = vector.broadcast %523 : vector<1x32xf32> to vector<4x32xf32>
    %525 = arith.addf %522, %524 : vector<4x32xf32>
    %cst_229 = arith.constant 5.000000e-01 : f32
    %526 = vector.broadcast %cst_229 : f32 to vector<4x32xf32>
    %527 = arith.mulf %526, %525 : vector<4x32xf32>
    %528 = math.tanh %527 : vector<4x32xf32>
    %cst_230 = arith.constant 5.000000e-01 : f32
    %529 = vector.broadcast %cst_230 : f32 to vector<4x32xf32>
    %530 = arith.mulf %529, %528 : vector<4x32xf32>
    %cst_231 = arith.constant 5.000000e-01 : f32
    %531 = vector.broadcast %cst_231 : f32 to vector<4x32xf32>
    %532 = arith.addf %530, %531 : vector<4x32xf32>
    %533 = arith.mulf %525, %532 : vector<4x32xf32>
    %c512_232 = arith.constant 512 : index
    %c0_233 = arith.constant 0 : index
    %534 = vector.load %arg1[%c512_232, %c0_233] : memref<2368x128xf32, #tpu.memory_space<vmem>>, vector<32x16xf32>
    %cst_234 = arith.constant dense<0.000000e+00> : vector<4x16xf32>
    %535 = tpu.matmul %533, %534, %cst_234 {dimension_numbers = #tpu.dot_dimension_numbers<[1], [0], [0], [1], [0, 0, 1, 1], [], []>} : vector<4x32xf32>, vector<32x16xf32>, vector<4x16xf32> -> vector<4x16xf32>
    %c0_235 = arith.constant 0 : index
    %c768 = arith.constant 768 : index
    %536 = vector.load %arg2[%c0_235, %c768] : memref<1x7424xf32, #tpu.memory_space<vmem>>, vector<1x16xf32>
    %537 = vector.broadcast %536 : vector<1x16xf32> to vector<4x16xf32>
    %538 = arith.addf %535, %537 : vector<4x16xf32>
    %c0_236 = arith.constant 0 : index
    %c0_237 = arith.constant 0 : index
    %539 = vector.load %arg4[%c0_236, %c0_237] : memref<4x16xf32, #tpu.memory_space<vmem>>, vector<4x16xf32>
    tpu.vector_store %arg4[%c0_236, %c0_237], %538 {strides = array<i32>} : memref<4x16xf32, #tpu.memory_space<vmem>>, vector<4x16xf32>,
    return
  }
}

</mosaic_0001>

<bundles_post_ra>
// kernel: _forward_single.1
= control target key start
LH: loop header
LB: loop body
LE: loop exit
PB: predicated region body
PF: predicated region fallthrough
CT: control target
= control target key end

     0   :  { %9 = vsyncpa [#allocation3], 0  ;;  %s2986_s0 = inlined_call_operand.vmem [shape: f32[4,65], index: 0, kind: input, shape index: {}]   ;;  %s2987_s1 = inlined_call_operand.hbm [shape: f32[2368,128], index: 1, kind: input, shape index: {}]   ;;  %s2988_s2 = inlined_call_operand.hbm [shape: f32[1,7424], index: 2, kind: input, shape index: {}]   ;;  %s2989_s3 = inlined_call_operand.hbm [shape: f32[32,416], index: 3, kind: input, shape index: {}]   ;;  %s2990_s4 = inlined_call_operand.hbm [shape: f32[4,16], index: 4, kind: output, shape index: {}]  }
   0x1   :  { %10 = vsyncpa [#allocation6], 0  ;;  %s32_s17 = sshll.u32 %s2988_s2, 4  ;;  %s33_s17 = int_to_ptr.hbm [resolvable:$true] %s32_s17 }
   0x2   :  { %11 = vsyncpa [#allocation4], 0  ;;  %s2517_s18 = smov [#allocation5]   ;;  %s18_s22 = sshll.u32 %s2987_s1, 4  ;;  %s19_s22 = int_to_ptr.hbm [resolvable:$true] %s18_s22 }
   0x3   :  { %s34_s19 = sshll.u32 %s2517_s18, 4  ;;  %s2518_s23 = smov [#allocation2]   ;;  %s35_s19 = int_to_ptr.vmem [resolvable:$true] %s34_s19 }
   0x4   :  { %37 = dma.hbm_to_vmem [thread:$0]  %s33_s17, 928, %s35_s19, [#allocation6]  }
   0x5   :  { %s20_s24 = sshll.u32 %s2518_s23, 4  ;;  %s2519_s25 = smov 128   ;;  %s21_s24 = int_to_ptr.vmem [resolvable:$true] %s20_s24 }
   0x6   :  { %s2520_s26 = smov 8   ;;  %s42_s2 = sshll.u32 %s2989_s3, 4  ;;  %s43_s2 = int_to_ptr.hbm [resolvable:$true] %s42_s2 }
   0x7   :  { %26 = dma.hbm_to_vmem [thread:$0]  %s19_s22, 37888, %s21_s24, [#allocation3], %s2519_s25, %s2519_s25, %s2520_s26  }
   0x8   :  { %s2521_s29 = smov [#allocation7]   ;;  %s2522_s5 = smov 512  }
   0x9   :  { %s44_s30 = sshll.u32 %s2521_s29, 4  ;;  %s2523_s6 = smov 32   ;;  %s45_s30 = int_to_ptr.vmem [resolvable:$true] %s44_s30 }
   0xa   :  { %50 = dma.hbm_to_vmem [thread:$0]  %s43_s2, 2048, %s45_s30, [#allocation6], %s2522_s5, %s2522_s5, %s2523_s6  }
   0xb   :  { %2511 = dma.done.wait [#allocation3], 37888  }
   0xc   :  { %2512 = vsyncadd [#allocation3], 4294929408 }
   0xd   :  { %2513 = dma.done.wait [#allocation6], 2976  }
   0xe   :  { %2514 = vsyncadd [#allocation6], 4294964320  ;;  %v2568_v0 = vld [vmem:[%s2986_s0] sm:$0xf]  ;;  %v67_v1 = vld [vmem:[#allocation2 + $0x1b8] sm:$0xff]  ;;  %s2524_s8 = smov 112  }
   0xf   :  { %v66_v2 = vld [vmem:[#allocation2 + $0x1b0] sm:$0xff]  ;;  %73 = vrot.lane.b32.xlu0 %v2568_v0, %s2524_s8  ;;  %90 = vmatpush.msra.mxu0 %v67_v1  ;;  %v65_v3 = vld [vmem:[#allocation2 + $0x1a8] sm:$0xff]  ;;  %v64_v4 = vld [vmem:[#allocation2 + $0x1a0] sm:$0xff]  ;;  %vm75_vm0 = vcmask 261120   ;;  %s2525_s3 = smov 80   ;;  %v2526_v38 = vmov 64  }
  0x10   :  { %v106_v6 = vld [vmem:[#allocation2 + $0x1d8] sm:$0xff]  ;;  %v105_v7 = vld [vmem:[#allocation2 + $0x1d0] sm:$0xff]  ;;  %v104_v8 = vld [vmem:[#allocation2 + $0x1c8] sm:$0xff]  ;;  %2280 = vset.pattern.permute.xlu1 %v2526_v38  ;;  %2281 = vset.pattern.permute.xlu0 %v2526_v38  ;;  %vm254_vm1 = vcmask 130048   ;;  %s2527_s0 = smov 64   ;;  %vm459_vm5 = vcmask 523264  }
  0x11   :  { %91 = vmatpush.msra.mxu0 %v66_v2  ;;  %126 = vmatpush.msra.mxu1 %v106_v6  ;;  %v103_v9 = vld [vmem:[#allocation2 + $0x1c0] sm:$0xff]  ;;  %v153_v20 = vld [vmem:[#allocation7 + $0x70] sm:$0xff]  ;;  %v154_v21 = vld [vmem:[#allocation7 + $0x78] sm:$0xff]  ;;  %vm885_vm15 = vcmask 1043456   ;;  %s2530_s9 = smov [#allocation8]   ;;  %s2218_s13 = sshll.u32 %s2990_s4, 4  ;;  %s2219_s13 = int_to_ptr.hbm [resolvable:$true] %s2218_s13 }
  0x12   :  { %v2282_v10 = vld [vmem:[#allocation5] ss:$0 sm:$0xff]  ;;  %v152_v19 = vld [vmem:[#allocation7 + $0x68] sm:$0xff]  ;;  %v149_v24 = vld [vmem:[#allocation7 + $0x50] sm:$0xff]  ;;  %308 = vperm.xlu1 %2280, %v2568_v0   ;;  %s2216_s10 = sshll.u32 %s2530_s9, 4  ;;  %s2217_s10 = int_to_ptr.vmem [resolvable:$true] %s2216_s10 }
  0x13   :  { %92 = vmatpush.msra.mxu0 %v65_v3  ;;  %127 = vmatpush.msra.mxu1 %v105_v7  ;;  %v151_v18 = vld [vmem:[#allocation7 + $0x60] sm:$0xff]  ;;  %v148_v23 = vld [vmem:[#allocation7 + $0x48] sm:$0xff]  ;;  %v150_v25 = vld [vmem:[#allocation7 + $0x58] sm:$0xff] }
  0x14   :  { %180 = vmatpush.msra.mxu2 %v151_v18  ;;  %200 = vmatpush.msra.mxu3 %v152_v19  ;;  %v147_v22 = vld [vmem:[#allocation7 + $0x40] sm:$0xff]  ;;  %v144_v27 = vld [vmem:[#allocation7 + $0x28] sm:$0xff]  ;;  %v145_v28 = vld [vmem:[#allocation7 + $0x30] sm:$0xff] }
  0x15   :  { %93 = vmatpush.msra.mxu0 %v64_v4  ;;  %128 = vmatpush.msra.mxu1 %v104_v8  ;;  %v143_v26 = vld [vmem:[#allocation7 + $0x20] sm:$0xff]  ;;  %v146_v29 = vld [vmem:[#allocation7 + $0x38] sm:$0xff]  ;;  %v140_v31 = vld [vmem:[#allocation7 + $0x8] sm:$0xff] }
  0x16   :  { %181 = vmatpush.msra.mxu2 %v147_v22  ;;  %201 = vmatpush.msra.mxu3 %v148_v23  ;;  %v139_v30 = vld [vmem:[#allocation7] sm:$0xff]  ;;  %v141_v32 = vld [vmem:[#allocation7 + $0x10] sm:$0xff]  ;;  %v142_v33 = vld [vmem:[#allocation7 + $0x18] sm:$0xff] }
  0x17   :  { %283 = vrot.lane.b32.xlu0 %v2568_v0, %s2525_s3  ;;  %129 = vmatpush.msra.mxu1 %v103_v9  ;;  %v278_v34 = vld [vmem:[#allocation2 + $0x1f8] sm:$0xff]  ;;  %v249_v35 = vld [vmem:[#allocation2 + $0x1e8] sm:$0xff]  ;;  %v277_v36 = vld [vmem:[#allocation2 + $0x1f0] sm:$0xff] }
  0x18   :  { %220 = vmatpush.msrb.mxu0 %v153_v20  ;;  %182 = vmatpush.msra.mxu2 %v143_v26  ;;  %v248_v37 = vld [vmem:[#allocation2 + $0x1e0] sm:$0xff]  ;;  %v347_v48 = vld [vmem:[#allocation2 + $0x18] sm:$0xff]  ;;  %v346_v50 = vld [vmem:[#allocation2 + $0x10] sm:$0xff] }
  0x19   :  { %240 = vmatpush.msrb.mxu1 %v154_v21  ;;  %202 = vmatpush.msra.mxu3 %v144_v27  ;;  %v2283_v39 = vld [vmem:[#allocation5 + $0x1] ss:$0 sm:$0xff]  ;;  %v316_v49 = vld [vmem:[#allocation2 + $0x258] sm:$0xff]  ;;  %v315_v51 = vld [vmem:[#allocation2 + $0x250] sm:$0xff] }
  0x1a   :  { %221 = vmatpush.msrb.mxu0 %v149_v24  ;;  %183 = vmatpush.msra.mxu2 %v139_v30  ;;  %v345_v52 = vld [vmem:[#allocation2 + $0x8] sm:$0xff]  ;;  %v344_v54 = vld [vmem:[#allocation2] sm:$0xff]  ;;  %v458_v23 = vld [vmem:[#allocation2 + $0x98] sm:$0xff] }
  0x1b   :  { %241 = vmatpush.msrb.mxu1 %v150_v25  ;;  %203 = vmatpush.msra.mxu3 %v140_v31  ;;  %v314_v53 = vld [vmem:[#allocation2 + $0x248] sm:$0xff]  ;;  %v313_v55 = vld [vmem:[#allocation2 + $0x240] sm:$0xff]  ;;  %v457_v24 = vld [vmem:[#allocation2 + $0x90] sm:$0xff] }
  0x1c   :  { %222 = vmatpush.msrb.mxu0 %v145_v28  ;;  %271 = vmatpush.msrb.mxu2 %v249_v35  ;;  %v155_v56 = vld [vmem:[#allocation5 + $0x7] sm:$0xf]  ;;  %v2285_v1 = vld [vmem:[#allocation5 + $0x2] ss:$0 sm:$0xff]  ;;  %v454_v30 = vld [vmem:[#allocation2 + $0x78] sm:$0xff] }
  0x1d   :  { %242 = vmatpush.msrb.mxu1 %v146_v29  ;;  %301 = vmatpush.msrb.mxu3 %v278_v34  ;;  %v157_v57 = vperm.slane %v155_v56, 0  ;;  %v158_v58 = vperm.slane %v155_v56, 1  ;;  %v159_v63 = vperm.slane %v155_v56, 2  ;;  %v419_v20 = vld [vmem:[#allocation2 + $0x220] sm:$0xff]  ;;  %v456_v26 = vld [vmem:[#allocation2 + $0x88] sm:$0xff] }
  0x1e   :  { %223 = vmatpush.msrb.mxu0 %v141_v32  ;;  %272 = vmatpush.msrb.mxu2 %v248_v37  ;;  %v455_v28 = vld [vmem:[#allocation2 + $0x80] sm:$0xff]  ;;  %v2287_v32 = vld [vmem:[#allocation5 + $0xb] ss:$0 sm:$0xff]  ;;  %v2288_v35 = vld [vmem:[#allocation5 + $0xc] ss:$0 sm:$0xff] }
  0x1f   :  { %243 = vmatpush.msrb.mxu1 %v142_v33  ;;  %302 = vmatpush.msrb.mxu3 %v277_v36  ;;  %v539_v56 = vld [vmem:[#allocation2 + $0x288] sm:$0xff] }
  0x81   :  { %v74_v5 = vpop.permute.xlu0 %73 }
  0x82   :  { %2229 = vmatmul.msk.f32.vlgmr.msra.gmra.mxu0 %vm75_vm0, %v74_v5 }
  0x83   :  { %336 = vmatpush.msra.mxu0 %v316_v49 }
  0x84   :  { %v309_v3 = vpop.permute.xlu1 %308 }
  0x85   :  { %337 = vmatpush.msra.mxu0 %v315_v51 }
  0x87   :  { %338 = vmatpush.msra.mxu0 %v314_v53 }
  0x89   :  { %v284_v47 = vpop.permute.xlu0 %283  ;;  %339 = vmatpush.msra.mxu0 %v313_v55  ;;  %v540_v55 = vld [vmem:[#allocation2 + $0x290] sm:$0xff] }
  0xff   :  { %v95_v11 = vpop.f32.mrf.mxu0 }
 0x100   :  { %v96_v12 = vadd.f32 %v2282_v10, %v95_v11 }
 0x102   :  { %v98_v13 = vmul.f32 0.5, %v96_v12 }
 0x104   :  { %2336 = vtanh.f32 %v98_v13 }
 0x10a   :  { %v2337_v14 = vpop.eup %2336 }
 0x10b   :  { %v100_v15 = vmul.f32 0.5, %v2337_v14 }
 0x10d   :  { %v101_v16 = vadd.f32 0.5, %v100_v15  ;;  %v422_v15 = vld [vmem:[#allocation2 + $0x238] sm:$0xff] }
 0x10f   :  { %v102_v17 = vmul.f32 %v101_v16, %v96_v12  ;;  %v421_v16 = vld [vmem:[#allocation2 + $0x230] sm:$0xff] }
 0x111   :  { %2230 = vmatmul.msk.f32.vlgmr.msra.gmra.mxu1 %vm75_vm0, %v102_v17  ;;  %v420_v17 = vld [vmem:[#allocation2 + $0x228] sm:$0xff] }
 0x112   :  { %360 = vmatpush.msra.mxu1 %v347_v48 }
 0x114   :  { %361 = vmatpush.msra.mxu1 %v346_v50 }
 0x116   :  { %362 = vmatpush.msra.mxu1 %v345_v52 }
 0x118   :  { %363 = vmatpush.msra.mxu1 %v344_v54 }
 0x18e   :  { %v131_v40 = vpop.f32.mrf.mxu1 }
 0x18f   :  { %v132_v41 = vadd.f32 %v2283_v39, %v131_v40 }
 0x191   :  { %v134_v42 = vmul.f32 0.5, %v132_v41 }
 0x193   :  { %2338 = vtanh.f32 %v134_v42 }
 0x199   :  { %v2339_v43 = vpop.eup %2338 }
 0x19a   :  { %v136_v44 = vmul.f32 0.5, %v2339_v43  ;;  %v453_v43 = vld [vmem:[#allocation2 + $0x70] sm:$0xff] }
 0x19c   :  { %v137_v45 = vadd.f32 0.5, %v136_v44  ;;  %v452_v44 = vld [vmem:[#allocation2 + $0x68] sm:$0xff] }
 0x19e   :  { %v138_v46 = vmul.f32 %v137_v45, %v132_v41  ;;  %v451_v45 = vld [vmem:[#allocation2 + $0x60] sm:$0xff] }
 0x1a0   :  { %2231 = vmatmul.msk.f32.vlgmr.msra.gmra.mxu2 %vm75_vm0, %v138_v46  ;;  %2232 = vmatmul.msk.f32.vlgmr.msra.gmra.mxu3 %vm75_vm0, %v138_v46 }
 0x1a1   :  { %2233 = vmatmul.msk.f32.vlgmr.msrb.gmra.mxu0 %vm75_vm0, %v138_v46  ;;  %2234 = vmatmul.msk.f32.vlgmr.msrb.gmra.mxu1 %vm75_vm0, %v138_v46  ;;  %v2289_v46 = vld [vmem:[#allocation5 + $0xd] ss:$0 sm:$0xff] }
 0x1a2   :  { %385 = vmatpush.msra.mxu2 %v347_v48  ;;  %442 = vmatpush.msra.mxu3 %v422_v15  ;;  %v2291_v15 = vld [vmem:[#allocation5 + $0x10] ss:$0 sm:$0xff] }
 0x1a3   :  { %471 = vmatpush.msrb.mxu0 %v458_v23  ;;  %496 = vmatpush.msrb.mxu1 %v458_v23 }
 0x1a4   :  { %386 = vmatpush.msra.mxu2 %v346_v50  ;;  %443 = vmatpush.msra.mxu3 %v421_v16 }
 0x1a5   :  { %472 = vmatpush.msrb.mxu0 %v457_v24  ;;  %497 = vmatpush.msrb.mxu1 %v457_v24 }
 0x1a6   :  { %387 = vmatpush.msra.mxu2 %v345_v52  ;;  %444 = vmatpush.msra.mxu3 %v420_v17 }
 0x1a7   :  { %473 = vmatpush.msrb.mxu0 %v456_v26  ;;  %498 = vmatpush.msrb.mxu1 %v456_v26 }
 0x1a8   :  { %2236 = vmatmul.msk.f32.vlgmr.msrb.gmra.mxu3 %vm254_vm1, %v284_v47  ;;  %2235 = vmatmul.msk.f32.vlgmr.msrb.gmra.mxu2 %vm254_vm1, %v2568_v0  ;;  %v2284_v0 = vld [vmem:[#allocation5 + $0x3] ss:$0 sm:$0xff] }
 0x1a9   :  { %388 = vmatpush.msra.mxu2 %v344_v54  ;;  %445 = vmatpush.msra.mxu3 %v419_v20  ;;  %v541_v54 = vld [vmem:[#allocation2 + $0x298] sm:$0xff] }
 0x1aa   :  { %474 = vmatpush.msrb.mxu0 %v455_v28  ;;  %499 = vmatpush.msrb.mxu1 %v455_v28 }
 0x1ab   :  { %557 = vmatpush.msrb.mxu2 %v541_v54  ;;  %v2618_v54 = vld [vmem:[#allocation2 + $0x178] sm:$0xff] }
 0x1ac   :  { %475 = vmatpush.msrb.mxu0 %v454_v30  ;;  %500 = vmatpush.msrb.mxu1 %v454_v30 }
 0x1ad   :  { %558 = vmatpush.msrb.mxu2 %v540_v55 }
 0x1ae   :  { %476 = vmatpush.msrb.mxu0 %v453_v43  ;;  %501 = vmatpush.msrb.mxu1 %v453_v43 }
 0x1af   :  { %559 = vmatpush.msrb.mxu2 %v539_v56  ;;  %v2622_v56 = vld [vmem:[#allocation2 + $0x170] sm:$0xff] }
 0x1b0   :  { %477 = vmatpush.msrb.mxu0 %v452_v44  ;;  %502 = vmatpush.msrb.mxu1 %v452_v44 }
 0x1b2   :  { %478 = vmatpush.msrb.mxu0 %v451_v45  ;;  %503 = vmatpush.msrb.mxu1 %v451_v45 }
 0x21e   :  { %v225_v2 = vpop.f32.mrf.mxu0  ;;  %v2585_v11 = vpop.f32.mrf.mxu1 }
 0x21f   :  { %v226_v6 = vadd.f32 %v225_v2, %v159_v63  ;;  %v534_v63 = vld [vmem:[#allocation2 + $0x260] sm:$0xff]  ;;  %v577_v2 = vld [vmem:[#allocation2 + $0x318] sm:$0xff] }
 0x220   :  { %593 = vmatpush.msrb.mxu3 %v577_v2  ;;  %v2638_v2 = vld [vmem:[#allocation2 + $0x150] sm:$0xff] }
 0x223   :  { %v185_v59 = vpop.f32.mrf.mxu2  ;;  %v205_v60 = vpop.f32.mrf.mxu3 }
 0x224   :  { %v2580_v61 = vadd.f32 %v185_v59, %v157_v57  ;;  %v206_v62 = vadd.f32 %v205_v60, %v158_v58  ;;  %v538_v57 = vld [vmem:[#allocation2 + $0x280] sm:$0xff]  ;;  %v537_v60 = vld [vmem:[#allocation2 + $0x278] sm:$0xff] }
 0x225   :  { %560 = vmatpush.msrb.mxu2 %v538_v57  ;;  %v2294_v57 = vld [vmem:[#allocation5 + $0x12] ss:$0 sm:$0xff] }
 0x226   :  { %715 = vrot.lane.b32.xlu2 %v206_v62, %s2527_s0  ;;  %713 = vrot.lane.b32.xlu1 %v2580_v61, %s2527_s0  ;;  %v535_v62 = vld [vmem:[#allocation2 + $0x268] sm:$0xff] }
 0x227   :  { %561 = vmatpush.msrb.mxu2 %v537_v60 }
 0x22b   :  { %v304_v4 = vpop.f32.mrf.mxu3  ;;  %v274_v5 = vpop.f32.mrf.mxu2 }
 0x22c   :  { %v305_v7 = vadd.f32 %v2284_v0, %v304_v4  ;;  %v275_v8 = vadd.f32 %v2285_v1, %v274_v5  ;;  %v575_v5 = vld [vmem:[#allocation2 + $0x308] sm:$0xff] }
 0x22e   :  { %v311_v9 = vmul.f32 %v309_v3, %v305_v7  ;;  %1035 = vrot.lane.b32.xlu1 %v226_v6, %s2527_s0  ;;  %v576_v3 = vld [vmem:[#allocation2 + $0x310] sm:$0xff]  ;;  %v574_v7 = vld [vmem:[#allocation2 + $0x300] sm:$0xff] }
 0x22f   :  { %594 = vmatpush.msrb.mxu3 %v576_v3 }
 0x230   :  { %v312_v10 = vadd.f32 %v311_v9, %v275_v8  ;;  %v573_v9 = vld [vmem:[#allocation2 + $0x2f8] sm:$0xff] }
 0x231   :  { %595 = vmatpush.msrb.mxu3 %v575_v5  ;;  %v2646_v5 = vld [vmem:[#allocation2 + $0x140] sm:$0xff] }
 0x232   :  { %2237 = vmatmul.msk.f32.vlgmr.msra.gmra.mxu0 %vm75_vm0, %v312_v10  ;;  %2238 = vmatmul.msk.f32.vlgmr.msra.gmra.mxu1 %vm75_vm0, %v312_v10 }
 0x233   :  { %613 = vmatpush.msra.mxu0 %v458_v23  ;;  %638 = vmatpush.msra.mxu1 %v458_v23  ;;  %v572_v23 = vld [vmem:[#allocation2 + $0x2f0] sm:$0xff] }
 0x234   :  { %596 = vmatpush.msrb.mxu3 %v574_v7 }
 0x235   :  { %614 = vmatpush.msra.mxu0 %v457_v24  ;;  %639 = vmatpush.msra.mxu1 %v457_v24  ;;  %v571_v24 = vld [vmem:[#allocation2 + $0x2e8] sm:$0xff] }
 0x236   :  { %597 = vmatpush.msrb.mxu3 %v573_v9 }
 0x237   :  { %615 = vmatpush.msra.mxu0 %v456_v26  ;;  %640 = vmatpush.msra.mxu1 %v456_v26  ;;  %v2286_v26 = vld [vmem:[#allocation5 + $0xe] ss:$0 sm:$0xff] }
 0x238   :  { %598 = vmatpush.msrb.mxu3 %v572_v23 }
 0x239   :  { %616 = vmatpush.msra.mxu0 %v455_v28  ;;  %641 = vmatpush.msra.mxu1 %v455_v28 }
 0x23a   :  { %599 = vmatpush.msrb.mxu3 %v571_v24 }
 0x23b   :  { %617 = vmatpush.msra.mxu0 %v454_v30  ;;  %642 = vmatpush.msra.mxu1 %v454_v30 }
 0x23d   :  { %618 = vmatpush.msra.mxu0 %v453_v43  ;;  %643 = vmatpush.msra.mxu1 %v453_v43  ;;  %v677_v43 = vld [vmem:[#allocation2 + $0x2a8] sm:$0xff] }
 0x23f   :  { %619 = vmatpush.msra.mxu0 %v452_v44  ;;  %644 = vmatpush.msra.mxu1 %v452_v44  ;;  %v676_v44 = vld [vmem:[#allocation2 + $0x2a0] sm:$0xff] }
 0x241   :  { %620 = vmatpush.msra.mxu0 %v451_v45  ;;  %645 = vmatpush.msra.mxu1 %v451_v45 }
 0x2af   :  { %v365_v12 = vpop.f32.mrf.mxu1  ;;  %v2591_v50 = vpop.f32.mrf.mxu0 }
 0x2b0   :  { %v368_v13 = vsub.f32 %v312_v10, %v365_v12  ;;  %v2290_v12 = vld [vmem:[#allocation5 + $0xf] ss:$0 sm:$0xff] }
 0x2b2   :  { %v369_v14 = vmul.f32 %v368_v13, %v368_v13 }
 0x2b4   :  { %2239 = vmatmul.msk.f32.vlgmr.msra.gmra.mxu2 %vm75_vm0, %v369_v14 }
 0x337   :  { %v390_v18 = vpop.f32.mrf.mxu2 }
 0x338   :  { %v391_v19 = vadd.f32 1e-05, %v390_v18 }
 0x33a   :  { %2340 = vrsqrt.f32 %v391_v19  ;;  %vm399_vm3 = vweird.f32 %v391_v19 }
 0x340   :  { %v2341_v21 = vpop.eup %2340 }
 0x341   :  { %v394_v22 = vmul.f32 %v2341_v21, %v391_v19  ;;  %vm400_vm2 = vweird.f32 %v2341_v21 }
 0x342   :  { %vm401_vm4 = vmor %vm399_vm3, %vm400_vm2 }
 0x343   :  { %v395_v25 = vmul.f32 %v2341_v21, %v394_v22 }
 0x345   :  { %v396_v27 = vmul.f32 0.5, %v395_v25  ;;  %v570_v25 = vld [vmem:[#allocation2 + $0x2e0] sm:$0xff] }
 0x346   :  { %600 = vmatpush.msrb.mxu3 %v570_v25 }
 0x347   :  { %v397_v29 = vsub.f32 1.5, %v396_v27  ;;  %v2292_v27 = vld [vmem:[#allocation5 + $0x11] ss:$0 sm:$0xff] }
 0x349   :  { %v398_v31 = vmul.f32 %v2341_v21, %v397_v29  ;;  %v342_v29 = vadd.f32 %v2286_v26, %v2591_v50  ;;  %v2610_v50 = vld [vmem:[#allocation2 + $0x188] sm:$0xff]  ;;  %v819_v26 = vld [vmem:[#allocation2 + $0x398] sm:$0xff] }
 0x34b   :  { %v402_v33 = vsel %vm401_vm4, %v2341_v21, %v398_v31 }
 0x34c   :  { %v403_v34 = vmul.f32 %v402_v33, %v368_v13 }
 0x34e   :  { %v408_v36 = vmul.f32 %v2287_v32, %v403_v34 }
 0x350   :  { %v413_v37 = vadd.f32 %v2288_v35, %v408_v36  ;;  %v683_v35 = vld [vmem:[#allocation2 + $0x2d8] sm:$0xff]  ;;  %v682_v36 = vld [vmem:[#allocation2 + $0x2d0] sm:$0xff] }
 0x352   :  { %v414_v38 = vmul.f32 0.5, %v413_v37 }
 0x354   :  { %2342 = vtanh.f32 %v414_v38  ;;  %v680_v38 = vld [vmem:[#allocation2 + $0x2c0] sm:$0xff] }
 0x35a   :  { %v2343_v39 = vpop.eup %2342 }
 0x35b   :  { %v416_v40 = vmul.f32 0.5, %v2343_v39 }
 0x35d   :  { %v417_v41 = vadd.f32 0.5, %v416_v40 }
 0x35f   :  { %v418_v42 = vmul.f32 %v417_v41, %v413_v37  ;;  %v681_v37 = vld [vmem:[#allocation2 + $0x2c8] sm:$0xff]  ;;  %v679_v41 = vld [vmem:[#allocation2 + $0x2b8] sm:$0xff] }
 0x361   :  { %2240 = vmatmul.msk.f32.vlgmr.msra.gmra.mxu3 %vm75_vm0, %v418_v42  ;;  %v678_v42 = vld [vmem:[#allocation2 + $0x2b0] sm:$0xff] }
 0x3e4   :  { %v447_v47 = vpop.f32.mrf.mxu3 }
 0x3e5   :  { %v448_v48 = vadd.f32 %v2289_v46, %v447_v47  ;;  %v2604_v47 = vld [vmem:[#allocation2 + $0x198] sm:$0xff] }
 0x3e6   :  { %736 = vmatpush.msra.mxu3 %v2604_v47 }
 0x3e7   :  { %v450_v49 = vadd.f32 %v448_v48, %v2580_v61  ;;  %v536_v61 = vld [vmem:[#allocation2 + $0x270] sm:$0xff] }
 0x3e8   :  { %562 = vmatpush.msrb.mxu2 %v536_v61  ;;  %v2606_v48 = vld [vmem:[#allocation2 + $0x190] sm:$0xff] }
 0x3e9   :  { %2241 = vmatmul.msk.f32.vlgmr.msrb.gmra.mxu0 %vm459_vm5, %v450_v49  ;;  %737 = vmatpush.msra.mxu3 %v2606_v48  ;;  %v2295_v61 = vld [vmem:[#allocation5 + $0x13] ss:$0 sm:$0xff] }
 0x3ea   :  { %563 = vmatpush.msrb.mxu2 %v535_v62  ;;  %758 = vmatpush.msrb.mxu0 %v2604_v47  ;;  %v2630_v62 = vld [vmem:[#allocation2 + $0x160] sm:$0xff] }
 0x3eb   :  { %738 = vmatpush.msra.mxu3 %v2610_v50 }
 0x3ec   :  { %564 = vmatpush.msrb.mxu2 %v534_v63  ;;  %759 = vmatpush.msrb.mxu0 %v2606_v48 }
 0x3ee   :  { %699 = vmatpush.msra.mxu2 %v683_v35  ;;  %760 = vmatpush.msrb.mxu0 %v2610_v50  ;;  %v811_v35 = vld [vmem:[#allocation2 + $0x358] sm:$0xff] }
 0x3f0   :  { %700 = vmatpush.msra.mxu2 %v682_v36  ;;  %v810_v36 = vld [vmem:[#allocation2 + $0x350] sm:$0xff] }
 0x3f2   :  { %701 = vmatpush.msra.mxu2 %v681_v37  ;;  %v809_v37 = vld [vmem:[#allocation2 + $0x348] sm:$0xff] }
 0x3f4   :  { %702 = vmatpush.msra.mxu2 %v680_v38  ;;  %v808_v38 = vld [vmem:[#allocation2 + $0x340] sm:$0xff] }
 0x3f6   :  { %703 = vmatpush.msra.mxu2 %v679_v41  ;;  %v807_v41 = vld [vmem:[#allocation2 + $0x338] sm:$0xff] }
 0x3f8   :  { %704 = vmatpush.msra.mxu2 %v678_v42  ;;  %v806_v42 = vld [vmem:[#allocation2 + $0x330] sm:$0xff] }
 0x3fa   :  { %705 = vmatpush.msra.mxu2 %v677_v43  ;;  %v805_v43 = vld [vmem:[#allocation2 + $0x328] sm:$0xff] }
 0x3fc   :  { %706 = vmatpush.msra.mxu2 %v676_v44  ;;  %v804_v44 = vld [vmem:[#allocation2 + $0x320] sm:$0xff] }
 0x466   :  { %v480_v51 = vpop.f32.mrf.mxu0 }
 0x467   :  { %v483_v52 = vsub.f32 %v450_v49, %v480_v51 }
 0x469   :  { %v484_v53 = vmul.f32 %v483_v52, %v483_v52 }
 0x46b   :  { %2242 = vmatmul.msk.f32.vlgmr.msrb.gmra.mxu1 %vm459_vm5, %v484_v53 }
 0x46c   :  { %824 = vmatpush.msrb.mxu1 %v819_v26  ;;  %v847_v26 = vld [vmem:[#allocation2 + $0x3b8] sm:$0xff] }
 0x4e8   :  { %v505_v58 = vpop.f32.mrf.mxu1 }
 0x4e9   :  { %v506_v59 = vadd.f32 1e-05, %v505_v58 }
 0x4eb   :  { %2344 = vrsqrt.f32 %v506_v59  ;;  %vm514_vm7 = vweird.f32 %v506_v59 }
 0x4f1   :  { %v2345_v0 = vpop.eup %2344 }
 0x4f2   :  { %v509_v1 = vmul.f32 %v2345_v0, %v506_v59  ;;  %vm515_vm6 = vweird.f32 %v2345_v0  ;;  %v2626_v59 = vld [vmem:[#allocation2 + $0x168] sm:$0xff] }
 0x4f3   :  { %vm516_vm8 = vmor %vm514_vm7, %vm515_vm6 }
 0x4f4   :  { %v510_v4 = vmul.f32 %v2345_v0, %v509_v1 }
 0x4f6   :  { %v511_v6 = vmul.f32 0.5, %v510_v4  ;;  %v2642_v4 = vld [vmem:[#allocation2 + $0x148] sm:$0xff] }
 0x4f8   :  { %v512_v8 = vsub.f32 1.5, %v511_v6  ;;  %v2650_v6 = vld [vmem:[#allocation2 + $0x138] sm:$0xff] }
 0x4fa   :  { %v513_v10 = vmul.f32 %v2345_v0, %v512_v8 }
 0x4fc   :  { %v517_v13 = vsel %vm516_vm8, %v2345_v0, %v513_v10  ;;  %v2634_v0 = vld [vmem:[#allocation2 + $0x158] sm:$0xff] }
 0x4fd   :  { %v518_v14 = vmul.f32 %v517_v13, %v483_v52  ;;  %v2614_v52 = vld [vmem:[#allocation2 + $0x180] sm:$0xff]  ;;  %v2661_v13 = vld [vmem:[#allocation2 + $0x128] sm:$0xff] }
 0x4fe   :  { %739 = vmatpush.msra.mxu3 %v2614_v52  ;;  %761 = vmatpush.msrb.mxu0 %v2614_v52 }
 0x4ff   :  { %v523_v16 = vmul.f32 %v2290_v12, %v518_v14  ;;  %v2657_v12 = vld [vmem:[#allocation2 + $0x130] sm:$0xff]  ;;  %v2664_v14 = vld [vmem:[#allocation2 + $0x120] sm:$0xff] }
 0x500   :  { %740 = vmatpush.msra.mxu3 %v2618_v54  ;;  %762 = vmatpush.msrb.mxu0 %v2618_v54 }
 0x501   :  { %v528_v17 = vadd.f32 %v2291_v15, %v523_v16  ;;  %v2296_v15 = vld [vmem:[#allocation5 + $0x14] ss:$0 sm:$0xff]  ;;  %v714_v16 = vpop.permute.xlu1 %713 }
 0x502   :  { %741 = vmatpush.msra.mxu3 %v2622_v56  ;;  %763 = vmatpush.msrb.mxu0 %v2622_v56 }
 0x503   :  { %v529_v18 = vmul.f32 0.5, %v528_v17 }
 0x504   :  { %742 = vmatpush.msra.mxu3 %v2626_v59  ;;  %764 = vmatpush.msrb.mxu0 %v2626_v59 }
 0x505   :  { %2346 = vtanh.f32 %v529_v18  ;;  %v2697_v18 = vpop.permute.xlu2 %715 }
 0x506   :  { %743 = vmatpush.msra.mxu3 %v2630_v62  ;;  %765 = vmatpush.msrb.mxu0 %v2630_v62 }
 0x508   :  { %744 = vmatpush.msra.mxu3 %v2634_v0  ;;  %766 = vmatpush.msrb.mxu0 %v2634_v0 }
 0x50a   :  { %745 = vmatpush.msra.mxu3 %v2638_v2  ;;  %767 = vmatpush.msrb.mxu0 %v2638_v2 }
 0x50b   :  { %v2347_v19 = vpop.eup %2346 }
 0x50c   :  { %v531_v20 = vmul.f32 0.5, %v2347_v19  ;;  %746 = vmatpush.msra.mxu3 %v2642_v4  ;;  %768 = vmatpush.msrb.mxu0 %v2642_v4 }
 0x50e   :  { %v532_v21 = vadd.f32 0.5, %v531_v20  ;;  %747 = vmatpush.msra.mxu3 %v2646_v5  ;;  %769 = vmatpush.msrb.mxu0 %v2646_v5  ;;  %v717_v20 = vsel %vm459_vm5, %v714_v16, %v2697_v18 }
 0x510   :  { %v533_v22 = vmul.f32 %v532_v21, %v528_v17  ;;  %748 = vmatpush.msra.mxu3 %v2650_v6  ;;  %770 = vmatpush.msrb.mxu0 %v2650_v6 }
 0x512   :  { %2243 = vmatmul.msk.f32.vlgmr.msrb.gmra.mxu2 %vm459_vm5, %v533_v22  ;;  %749 = vmatpush.msra.mxu3 %v2657_v12 }
 0x513   :  { %771 = vmatpush.msrb.mxu0 %v2657_v12 }
 0x514   :  { %750 = vmatpush.msra.mxu3 %v2661_v13 }
 0x515   :  { %772 = vmatpush.msrb.mxu0 %v2661_v13 }
 0x516   :  { %751 = vmatpush.msra.mxu3 %v2664_v14 }
 0x517   :  { %773 = vmatpush.msrb.mxu0 %v2664_v14 }
 0x595   :  { %v566_v28 = vpop.f32.mrf.mxu2 }
 0x596   :  { %v567_v30 = vadd.f32 %v2292_v27, %v566_v28  ;;  %v818_v27 = vld [vmem:[#allocation2 + $0x390] sm:$0xff]  ;;  %v817_v28 = vld [vmem:[#allocation2 + $0x388] sm:$0xff] }
 0x597   :  { %825 = vmatpush.msrb.mxu1 %v818_v27  ;;  %v846_v27 = vld [vmem:[#allocation2 + $0x3b0] sm:$0xff] }
 0x598   :  { %v2596_v31 = vadd.f32 %v567_v30, %v342_v29  ;;  %v816_v29 = vld [vmem:[#allocation2 + $0x380] sm:$0xff]  ;;  %v815_v30 = vld [vmem:[#allocation2 + $0x378] sm:$0xff] }
 0x599   :  { %826 = vmatpush.msrb.mxu1 %v817_v28 }
 0x59a   :  { %2244 = vmatmul.msk.f32.vlgmr.msrb.gmra.mxu3 %vm459_vm5, %v2596_v31  ;;  %2245 = vmatmul.msk.f32.vlgmr.msra.gmra.mxu0 %vm459_vm5, %v2596_v31 }
 0x59b   :  { %926 = vmatpush.msrb.mxu3 %v2604_v47  ;;  %948 = vmatpush.msra.mxu0 %v2604_v47 }
 0x59c   :  { %827 = vmatpush.msrb.mxu1 %v816_v29 }
 0x59d   :  { %927 = vmatpush.msrb.mxu3 %v2606_v48  ;;  %949 = vmatpush.msra.mxu0 %v2606_v48 }
 0x59e   :  { %828 = vmatpush.msrb.mxu1 %v815_v30 }
 0x59f   :  { %928 = vmatpush.msrb.mxu3 %v2610_v50  ;;  %950 = vmatpush.msra.mxu0 %v2610_v50 }
 0x5a1   :  { %929 = vmatpush.msrb.mxu3 %v2614_v52  ;;  %951 = vmatpush.msra.mxu0 %v2614_v52 }
 0x5a3   :  { %930 = vmatpush.msrb.mxu3 %v2618_v54  ;;  %952 = vmatpush.msra.mxu0 %v2618_v54 }
 0x5a5   :  { %931 = vmatpush.msrb.mxu3 %v2622_v56  ;;  %953 = vmatpush.msra.mxu0 %v2622_v56 }
 0x5a7   :  { %932 = vmatpush.msrb.mxu3 %v2626_v59  ;;  %954 = vmatpush.msra.mxu0 %v2626_v59 }
 0x5a9   :  { %933 = vmatpush.msrb.mxu3 %v2630_v62  ;;  %955 = vmatpush.msra.mxu0 %v2630_v62 }
 0x5ab   :  { %934 = vmatpush.msrb.mxu3 %v2634_v0  ;;  %956 = vmatpush.msra.mxu0 %v2634_v0 }
 0x5ad   :  { %935 = vmatpush.msrb.mxu3 %v2638_v2  ;;  %957 = vmatpush.msra.mxu0 %v2638_v2 }
 0x5af   :  { %936 = vmatpush.msrb.mxu3 %v2642_v4  ;;  %958 = vmatpush.msra.mxu0 %v2642_v4 }
 0x5b1   :  { %937 = vmatpush.msrb.mxu3 %v2646_v5  ;;  %959 = vmatpush.msra.mxu0 %v2646_v5 }
 0x5b3   :  { %938 = vmatpush.msrb.mxu3 %v2650_v6  ;;  %960 = vmatpush.msra.mxu0 %v2650_v6 }
 0x5b5   :  { %939 = vmatpush.msrb.mxu3 %v2657_v12  ;;  %961 = vmatpush.msra.mxu0 %v2657_v12 }
 0x5b7   :  { %940 = vmatpush.msrb.mxu3 %v2661_v13  ;;  %962 = vmatpush.msra.mxu0 %v2661_v13 }
 0x5b9   :  { %941 = vmatpush.msrb.mxu3 %v2664_v14  ;;  %963 = vmatpush.msra.mxu0 %v2664_v14 }
 0x617   :  { %v622_v32 = vpop.f32.mrf.mxu0 }
 0x618   :  { %v625_v33 = vsub.f32 %v2596_v31, %v622_v32  ;;  %v814_v32 = vld [vmem:[#allocation2 + $0x370] sm:$0xff] }
 0x619   :  { %829 = vmatpush.msrb.mxu1 %v814_v32  ;;  %v845_v32 = vld [vmem:[#allocation2 + $0x3a8] sm:$0xff] }
 0x61a   :  { %v626_v34 = vmul.f32 %v625_v33, %v625_v33 }
 0x61c   :  { %2246 = vmatmul.msk.f32.vlgmr.msra.gmra.mxu1 %vm459_vm5, %v626_v34  ;;  %v812_v34 = vld [vmem:[#allocation2 + $0x360] sm:$0xff] }
 0x61d   :  { %v2721_v22 = vpop.f32.mrf.mxu3 }
 0x699   :  { %v647_v39 = vpop.f32.mrf.mxu1 }
 0x69a   :  { %v648_v40 = vadd.f32 1e-05, %v647_v39 }
 0x69c   :  { %2348 = vrsqrt.f32 %v648_v40  ;;  %vm656_vm10 = vweird.f32 %v648_v40 }
 0x6a2   :  { %v2349_v45 = vpop.eup %2348 }
 0x6a3   :  { %v651_v46 = vmul.f32 %v2349_v45, %v648_v40  ;;  %vm657_vm9 = vweird.f32 %v2349_v45 }
 0x6a4   :  { %vm658_vm11 = vmor %vm656_vm10, %vm657_vm9 }
 0x6a5   :  { %v652_v49 = vmul.f32 %v2349_v45, %v651_v46 }
 0x6a7   :  { %v653_v51 = vmul.f32 0.5, %v652_v49  ;;  %v859_v49 = vld [vmem:[#allocation2 + $0x418] sm:$0xff] }
 0x6a8   :  { %864 = vmatpush.msrb.mxu2 %v859_v49  ;;  %v2301_v49 = vld [vmem:[#allocation5 + $0x1a] ss:$0 sm:$0xff] }
 0x6a9   :  { %v654_v53 = vsub.f32 1.5, %v653_v51  ;;  %v858_v51 = vld [vmem:[#allocation2 + $0x410] sm:$0xff] }
 0x6aa   :  { %865 = vmatpush.msrb.mxu2 %v858_v51 }
 0x6ab   :  { %v655_v55 = vmul.f32 %v2349_v45, %v654_v53 }
 0x6ad   :  { %v659_v58 = vsel %vm658_vm11, %v2349_v45, %v655_v55  ;;  %v857_v55 = vld [vmem:[#allocation2 + $0x408] sm:$0xff] }
 0x6ae   :  { %v660_v60 = vmul.f32 %v659_v58, %v625_v33  ;;  %v813_v33 = vld [vmem:[#allocation2 + $0x368] sm:$0xff]  ;;  %v856_v58 = vld [vmem:[#allocation2 + $0x400] sm:$0xff]  ;;  %866 = vmatpush.msrb.mxu2 %v857_v55  ;;  %v2302_v55 = vld [vmem:[#allocation5 + $0x1b] ss:$0 sm:$0xff] }
 0x6af   :  { %830 = vmatpush.msrb.mxu1 %v813_v33  ;;  %v844_v33 = vld [vmem:[#allocation2 + $0x3a0] sm:$0xff] }
 0x6b0   :  { %v665_v63 = vmul.f32 %v2294_v57, %v660_v60  ;;  %867 = vmatpush.msrb.mxu2 %v856_v58 }
 0x6b1   :  { %831 = vmatpush.msrb.mxu1 %v812_v34 }
 0x6b2   :  { %v670_v1 = vadd.f32 %v2295_v61, %v665_v63  ;;  %v855_v61 = vld [vmem:[#allocation2 + $0x3f8] sm:$0xff] }
 0x6b3   :  { %832 = vmatpush.msrb.mxu1 %v811_v35  ;;  %868 = vmatpush.msrb.mxu2 %v855_v61 }
 0x6b4   :  { %v671_v3 = vmul.f32 0.5, %v670_v1 }
 0x6b5   :  { %833 = vmatpush.msrb.mxu1 %v810_v36 }
 0x6b6   :  { %2350 = vtanh.f32 %v671_v3  ;;  %v2297_v3 = vld [vmem:[#allocation5 + $0x16] ss:$0 sm:$0xff] }
 0x6b7   :  { %834 = vmatpush.msrb.mxu1 %v809_v37 }
 0x6b9   :  { %835 = vmatpush.msrb.mxu1 %v808_v38 }
 0x6bb   :  { %836 = vmatpush.msrb.mxu1 %v807_v41 }
 0x6bc   :  { %v2351_v7 = vpop.eup %2350 }
 0x6bd   :  { %v673_v8 = vmul.f32 0.5, %v2351_v7  ;;  %837 = vmatpush.msrb.mxu1 %v806_v42 }
 0x6bf   :  { %v674_v9 = vadd.f32 0.5, %v673_v8  ;;  %838 = vmatpush.msrb.mxu1 %v805_v43  ;;  %v853_v8 = vld [vmem:[#allocation2 + $0x3e8] sm:$0xff] }
 0x6c1   :  { %v675_v10 = vmul.f32 %v674_v9, %v670_v1  ;;  %839 = vmatpush.msrb.mxu1 %v804_v44  ;;  %v854_v1 = vld [vmem:[#allocation2 + $0x3f0] sm:$0xff] }
 0x6c2   :  { %869 = vmatpush.msrb.mxu2 %v854_v1 }
 0x6c3   :  { %2247 = vmatmul.msk.f32.vlgmr.msra.gmra.mxu2 %vm459_vm5, %v675_v10  ;;  %v2298_v10 = vld [vmem:[#allocation5 + $0x17] ss:$0 sm:$0xff] }
 0x6c4   :  { %870 = vmatpush.msrb.mxu2 %v853_v8  ;;  %v1009_v8 = vld [vmem:[#allocation2 + $0x498] sm:$0xff] }
 0x6c5   :  { %1014 = vmatpush.msra.mxu1 %v1009_v8  ;;  %v2760_v8 = vld [vmem:[#allocation2 + $0x108] sm:$0xff] }
 0x746   :  { %v708_v17 = vpop.f32.mrf.mxu2 }
 0x747   :  { %v709_v19 = vadd.f32 %v2296_v15, %v708_v17  ;;  %v852_v15 = vld [vmem:[#allocation2 + $0x3e0] sm:$0xff]  ;;  %v851_v17 = vld [vmem:[#allocation2 + $0x3d8] sm:$0xff] }
 0x748   :  { %871 = vmatpush.msrb.mxu2 %v852_v15  ;;  %v1006_v15 = vld [vmem:[#allocation2 + $0x480] sm:$0xff] }
 0x749   :  { %v719_v21 = vadd.f32 %v717_v20, %v709_v19  ;;  %v850_v20 = vld [vmem:[#allocation2 + $0x3d0] sm:$0xff] }
 0x74a   :  { %872 = vmatpush.msrb.mxu2 %v851_v17  ;;  %v1003_v17 = vld [vmem:[#allocation2 + $0x468] sm:$0xff] }
 0x74b   :  { %752 = vmatmul.f32.vlgmr.msra.gmra.mxu3 %v719_v21 }
 0x74c   :  { %1062 = vmatpush.msra.mxu3 %v2604_v47  ;;  %873 = vmatpush.msrb.mxu2 %v850_v20  ;;  %v1001_v20 = vld [vmem:[#allocation2 + $0x458] sm:$0xff] }
 0x74e   :  { %1063 = vmatpush.msra.mxu3 %v2606_v48 }
 0x750   :  { %1064 = vmatpush.msra.mxu3 %v2610_v50 }
 0x752   :  { %1065 = vmatpush.msra.mxu3 %v2614_v52 }
 0x754   :  { %1066 = vmatpush.msra.mxu3 %v2618_v54 }
 0x756   :  { %1067 = vmatpush.msra.mxu3 %v2622_v56 }
 0x758   :  { %1068 = vmatpush.msra.mxu3 %v2626_v59 }
 0x75a   :  { %1069 = vmatpush.msra.mxu3 %v2630_v62 }
 0x75c   :  { %1070 = vmatpush.msra.mxu3 %v2634_v0 }
 0x75e   :  { %1071 = vmatpush.msra.mxu3 %v2638_v2 }
 0x760   :  { %1072 = vmatpush.msra.mxu3 %v2642_v4 }
 0x762   :  { %1073 = vmatpush.msra.mxu3 %v2646_v5 }
 0x764   :  { %1074 = vmatpush.msra.mxu3 %v2650_v6 }
 0x766   :  { %1075 = vmatpush.msra.mxu3 %v2657_v12 }
 0x768   :  { %1076 = vmatpush.msra.mxu3 %v2661_v13 }
 0x76a   :  { %1077 = vmatpush.msra.mxu3 %v2664_v14 }
 0x7ce   :  { %v753_v23 = vpop.f32.mrf.mxu3 }
 0x7cf   :  { %v756_v24 = vsub.f32 %v719_v21, %v753_v23  ;;  %v849_v23 = vld [vmem:[#allocation2 + $0x3c8] sm:$0xff] }
 0x7d0   :  { %874 = vmatpush.msrb.mxu2 %v849_v23  ;;  %v999_v23 = vld [vmem:[#allocation2 + $0x448] sm:$0xff] }
 0x7d1   :  { %v757_v25 = vmul.f32 %v756_v24, %v756_v24 }
 0x7d3   :  { %774 = vmatmul.f32.vlgmr.msrb.gmra.mxu0 %v757_v25  ;;  %v848_v25 = vld [vmem:[#allocation2 + $0x3c0] sm:$0xff] }
 0x7d4   :  { %875 = vmatpush.msrb.mxu2 %v848_v25  ;;  %v998_v25 = vld [vmem:[#allocation2 + $0x440] sm:$0xff] }
 0x7d6   :  { %876 = vmatpush.msrb.mxu2 %v847_v26 }
 0x7d8   :  { %877 = vmatpush.msrb.mxu2 %v846_v27 }
 0x7da   :  { %878 = vmatpush.msrb.mxu2 %v845_v32 }
 0x7dc   :  { %879 = vmatpush.msrb.mxu2 %v844_v33 }
 0x7de   :  { %1040 = vmatpush.msra.mxu2 %v2604_v47  ;;  %v2299_v47 = vld [vmem:[#allocation5 + $0x18] ss:$0 sm:$0xff] }
 0x7e0   :  { %1041 = vmatpush.msra.mxu2 %v2606_v48 }
 0x7e2   :  { %1042 = vmatpush.msra.mxu2 %v2610_v50 }
 0x7e4   :  { %1043 = vmatpush.msra.mxu2 %v2614_v52  ;;  %v2300_v52 = vld [vmem:[#allocation5 + $0x19] ss:$0 sm:$0xff] }
 0x7e6   :  { %1044 = vmatpush.msra.mxu2 %v2618_v54 }
 0x7e8   :  { %1045 = vmatpush.msra.mxu2 %v2622_v56 }
 0x7ea   :  { %1046 = vmatpush.msra.mxu2 %v2626_v59 }
 0x7ec   :  { %1047 = vmatpush.msra.mxu2 %v2630_v62 }
 0x7ee   :  { %1048 = vmatpush.msra.mxu2 %v2634_v0  ;;  %v2528_v0 = vmov 128.0  }
 0x7f0   :  { %1049 = vmatpush.msra.mxu2 %v2638_v2 }
 0x7f2   :  { %1050 = vmatpush.msra.mxu2 %v2642_v4 }
 0x7f4   :  { %1051 = vmatpush.msra.mxu2 %v2646_v5 }
 0x7f6   :  { %1052 = vmatpush.msra.mxu2 %v2650_v6 }
 0x7f8   :  { %1053 = vmatpush.msra.mxu2 %v2657_v12 }
 0x7fa   :  { %1054 = vmatpush.msra.mxu2 %v2661_v13 }
 0x7fc   :  { %1055 = vmatpush.msra.mxu2 %v2664_v14 }
 0x850   :  { %v775_v39 = vpop.f32.mrf.mxu0 }
 0x851   :  { %v776_v40 = vadd.f32 1e-05, %v775_v39 }
 0x853   :  { %2352 = vrsqrt.f32 %v776_v40  ;;  %vm784_vm13 = vweird.f32 %v776_v40 }
 0x859   :  { %v2353_v45 = vpop.eup %2352 }
 0x85a   :  { %v779_v46 = vmul.f32 %v2353_v45, %v776_v40  ;;  %vm785_vm12 = vweird.f32 %v2353_v45 }
 0x85b   :  { %vm786_vm14 = vmor %vm784_vm13, %vm785_vm12 }
 0x85c   :  { %v780_v53 = vmul.f32 %v2353_v45, %v779_v46 }
 0x85e   :  { %v781_v57 = vmul.f32 0.5, %v780_v53  ;;  %v2293_v53 = vld [vmem:[#allocation5 + $0x15] ss:$0 sm:$0xff] }
 0x860   :  { %v782_v60 = vsub.f32 1.5, %v781_v57 }
 0x862   :  { %v783_v63 = vmul.f32 %v2353_v45, %v782_v60  ;;  %v603_v60 = vadd.f32 %v2293_v53, %v2721_v22  ;;  %v1004_v22 = vld [vmem:[#allocation2 + $0x470] sm:$0xff]  ;;  %v1238_v53 = vld [vmem:[#allocation2 + $0x720] sm:$0xff] }
 0x864   :  { %v787_v7 = vsel %vm786_vm14, %v2353_v45, %v783_v63 }
 0x865   :  { %v788_v9 = vmul.f32 %v787_v7, %v756_v24 }
 0x867   :  { %v793_v16 = vmul.f32 %v2297_v3, %v788_v9  ;;  %v1008_v9 = vld [vmem:[#allocation2 + $0x490] sm:$0xff] }
 0x868   :  { %1015 = vmatpush.msra.mxu1 %v1008_v9  ;;  %v2763_v9 = vld [vmem:[#allocation2 + $0x100] sm:$0xff] }
 0x869   :  { %v798_v19 = vadd.f32 %v2298_v10, %v793_v16  ;;  %v1007_v10 = vld [vmem:[#allocation2 + $0x488] sm:$0xff]  ;;  %v1005_v16 = vld [vmem:[#allocation2 + $0x478] sm:$0xff] }
 0x86a   :  { %1016 = vmatpush.msra.mxu1 %v1007_v10  ;;  %v2766_v10 = vld [vmem:[#allocation2 + $0xf8] sm:$0xff] }
 0x86b   :  { %v799_v21 = vmul.f32 0.5, %v798_v19 }
 0x86c   :  { %1017 = vmatpush.msra.mxu1 %v1006_v15  ;;  %v2773_v15 = vld [vmem:[#allocation2 + $0xe8] sm:$0xff] }
 0x86d   :  { %2354 = vtanh.f32 %v799_v21  ;;  %v1000_v21 = vld [vmem:[#allocation2 + $0x450] sm:$0xff] }
 0x86e   :  { %2356 = vrcp.f32 %v2528_v0  ;;  %1018 = vmatpush.msra.mxu1 %v1005_v16  ;;  %v2776_v16 = vld [vmem:[#allocation2 + $0xe0] sm:$0xff] }
 0x870   :  { %1019 = vmatpush.msra.mxu1 %v1004_v22  ;;  %v2779_v22 = vld [vmem:[#allocation2 + $0xd8] sm:$0xff] }
 0x872   :  { %1020 = vmatpush.msra.mxu1 %v1003_v17  ;;  %v2782_v17 = vld [vmem:[#allocation2 + $0xd0] sm:$0xff] }
 0x873   :  { %v2355_v24 = vpop.eup %2354 }
 0x874   :  { %v801_v28 = vmul.f32 0.5, %v2355_v24  ;;  %v2357_v2 = vpop.eup %2356  ;;  %v997_v24 = vld [vmem:[#allocation2 + $0x438] sm:$0xff] }
 0x875   :  { %v890_v4 = vmul.f32 128.0, %v2357_v2  ;;  %vm894_vm1 = vweird.f32 %v2357_v2 }
 0x876   :  { %v802_v29 = vadd.f32 0.5, %v801_v28  ;;  %v996_v28 = vld [vmem:[#allocation2 + $0x430] sm:$0xff] }
 0x877   :  { %v891_v5 = vsub.f32 1.0, %v890_v4  ;;  %v2303_v4 = vld [vmem:[#allocation5 + $0x1c] ss:$0 sm:$0xff] }
 0x878   :  { %v803_v30 = vmul.f32 %v802_v29, %v798_v19  ;;  %v1002_v19 = vld [vmem:[#allocation2 + $0x460] sm:$0xff]  ;;  %v995_v29 = vld [vmem:[#allocation2 + $0x428] sm:$0xff] }
 0x879   :  { %v892_v6 = vmul.f32 %v2357_v2, %v891_v5  ;;  %1021 = vmatpush.msra.mxu1 %v1002_v19  ;;  %v2785_v19 = vld [vmem:[#allocation2 + $0xc8] sm:$0xff] }
 0x87a   :  { %840 = vmatmul.f32.vlgmr.msrb.gmra.mxu1 %v803_v30  ;;  %v994_v30 = vld [vmem:[#allocation2 + $0x420] sm:$0xff] }
 0x87b   :  { %v893_v12 = vadd.f32 %v2357_v2, %v892_v6  ;;  %1022 = vmatpush.msra.mxu1 %v1001_v20  ;;  %v1247_v6 = vld [vmem:[#allocation2 + $0x768] sm:$0xff]  ;;  %v2788_v20 = vld [vmem:[#allocation2 + $0xc0] sm:$0xff] }
 0x87d   :  { %v2740_v13 = vsel %vm894_vm1, %v2357_v2, %v893_v12  ;;  %1023 = vmatpush.msra.mxu1 %v1000_v21  ;;  %v1248_v2 = vld [vmem:[#allocation2 + $0x770] sm:$0xff]  ;;  %v2791_v21 = vld [vmem:[#allocation2 + $0xb8] sm:$0xff] }
 0x87f   :  { %1024 = vmatpush.msra.mxu1 %v999_v23  ;;  %v2794_v23 = vld [vmem:[#allocation2 + $0xb0] sm:$0xff] }
 0x881   :  { %1025 = vmatpush.msra.mxu1 %v998_v25  ;;  %v2797_v25 = vld [vmem:[#allocation2 + $0xa8] sm:$0xff] }
 0x883   :  { %1026 = vmatpush.msra.mxu1 %v997_v24  ;;  %v2403_v24 = vld [vmem:[#allocation2 + $0x90] sm:$0xff] }
 0x885   :  { %1027 = vmatpush.msra.mxu1 %v996_v28  ;;  %v2404_v28 = vld [vmem:[#allocation2 + $0x88] sm:$0xff] }
 0x887   :  { %1028 = vmatpush.msra.mxu1 %v995_v29  ;;  %v2405_v29 = vld [vmem:[#allocation2 + $0x80] sm:$0xff] }
 0x889   :  { %1029 = vmatpush.msra.mxu1 %v994_v30  ;;  %v2406_v30 = vld [vmem:[#allocation2 + $0x78] sm:$0xff] }
 0x8f7   :  { %v841_v48 = vpop.f32.mrf.mxu1 }
 0x8f8   :  { %v842_v50 = vadd.f32 %v2299_v47, %v841_v48  ;;  %v1253_v47 = vld [vmem:[#allocation2 + $0x798] sm:$0xff]  ;;  %v1252_v48 = vld [vmem:[#allocation2 + $0x790] sm:$0xff] }
 0x8fa   :  { %880 = vmatmul.f32.vlgmr.msrb.gmra.mxu2 %v842_v50 }
 0x8fb   :  { %1254 = vmatpush.msrb.mxu2 %v1253_v47  ;;  %v2409_v47 = vld [vmem:[#allocation2 + $0x60] sm:$0xff] }
 0x8fd   :  { %1255 = vmatpush.msrb.mxu2 %v1252_v48 }
 0x97d   :  { %v881_v54 = vpop.f32.mrf.mxu2 }
 0x97e   :  { %v882_v56 = vadd.f32 %v2300_v52, %v881_v54  ;;  %v1251_v52 = vld [vmem:[#allocation2 + $0x788] sm:$0xff] }
 0x97f   :  { %1256 = vmatpush.msrb.mxu2 %v1251_v52 }
 0x980   :  { %v884_v59 = vadd.f32 %v882_v56, %v842_v50  ;;  %v1250_v56 = vld [vmem:[#allocation2 + $0x780] sm:$0xff] }
 0x981   :  { %1257 = vmatpush.msrb.mxu2 %v1250_v56  ;;  %v1122_v56 = vld [vmem:[#allocation2 + $0x510] sm:$0xff] }
 0x982   :  { %v886_v62 = vsel %vm885_vm15, %v884_v59, 0.0 }
 0x983   :  { %887 = vadd.xlane.f32.xlu2 %v886_v62  ;;  %v1249_v62 = vld [vmem:[#allocation2 + $0x778] sm:$0xff] }
 0x984   :  { %1258 = vmatpush.msrb.mxu2 %v1249_v62  ;;  %v1120_v62 = vld [vmem:[#allocation2 + $0x500] sm:$0xff] }
 0x986   :  { %1259 = vmatpush.msrb.mxu2 %v1248_v2  ;;  %v1118_v2 = vld [vmem:[#allocation2 + $0x4f0] sm:$0xff] }
 0x988   :  { %1260 = vmatpush.msrb.mxu2 %v1247_v6  ;;  %v1115_v6 = vld [vmem:[#allocation2 + $0x4d8] sm:$0xff] }
 0x9f6   :  { %v888_v14 = vpop.xlane.xlu2 %887 }
 0x9f7   :  { %v896_v34 = vmul.f32 %v2740_v13, %v888_v14  ;;  %v2304_v14 = vld [vmem:[#allocation5 + $0x1d] ss:$0 sm:$0xff] }
 0x9f9   :  { %v897_v35 = vsub.f32 %v884_v59, %v896_v34  ;;  %v1246_v34 = vld [vmem:[#allocation2 + $0x760] sm:$0xff] }
 0x9fa   :  { %1261 = vmatpush.msrb.mxu2 %v1246_v34  ;;  %v1112_v34 = vld [vmem:[#allocation2 + $0x4c0] sm:$0xff] }
 0x9fb   :  { %v898_v36 = vmul.f32 %v897_v35, %v897_v35 }
 0x9fd   :  { %v899_v37 = vsel %vm885_vm15, %v898_v36, 0.0  ;;  %v1245_v36 = vld [vmem:[#allocation2 + $0x758] sm:$0xff] }
 0x9fe   :  { %900 = vadd.xlane.f32.xlu0 %v899_v37  ;;  %1262 = vmatpush.msrb.mxu2 %v1245_v36 }
 0xa71   :  { %v901_v38 = vpop.xlane.xlu0 %900 }
 0xa72   :  { %v902_v39 = vmul.f32 %v901_v38, %v2740_v13  ;;  %v1244_v38 = vld [vmem:[#allocation2 + $0x750] sm:$0xff] }
 0xa73   :  { %1263 = vmatpush.msrb.mxu2 %v1244_v38  ;;  %v1110_v38 = vld [vmem:[#allocation2 + $0x4b0] sm:$0xff] }
 0xa74   :  { %v903_v40 = vadd.f32 1e-05, %v902_v39 }
 0xa76   :  { %2358 = vrsqrt.f32 %v903_v40  ;;  %vm910_vm3 = vweird.f32 %v903_v40 }
 0xa7c   :  { %v2359_v41 = vpop.eup %2358 }
 0xa7d   :  { %v905_v42 = vmul.f32 %v2359_v41, %v903_v40  ;;  %vm911_vm2 = vweird.f32 %v2359_v41  ;;  %v1243_v40 = vld [vmem:[#allocation2 + $0x748] sm:$0xff] }
 0xa7e   :  { %vm912_vm4 = vmor %vm910_vm3, %vm911_vm2  ;;  %1264 = vmatpush.msrb.mxu2 %v1243_v40  ;;  %v1108_v40 = vld [vmem:[#allocation2 + $0x4a0] sm:$0xff] }
 0xa7f   :  { %v906_v43 = vmul.f32 %v2359_v41, %v905_v42  ;;  %v1241_v42 = vld [vmem:[#allocation2 + $0x738] sm:$0xff] }
 0xa81   :  { %v907_v44 = vmul.f32 0.5, %v906_v43 }
 0xa83   :  { %v908_v45 = vsub.f32 1.5, %v907_v44 }
 0xa85   :  { %v909_v46 = vmul.f32 %v2359_v41, %v908_v45 }
 0xa87   :  { %v913_v51 = vsel %vm912_vm4, %v2359_v41, %v909_v46  ;;  %v1242_v41 = vld [vmem:[#allocation2 + $0x740] sm:$0xff] }
 0xa88   :  { %v914_v57 = vmul.f32 %v913_v51, %v897_v35  ;;  %1265 = vmatpush.msrb.mxu2 %v1242_v41  ;;  %v1239_v51 = vld [vmem:[#allocation2 + $0x728] sm:$0xff] }
 0xa8a   :  { %v919_v58 = vmul.f32 %v2301_v49, %v914_v57  ;;  %1266 = vmatpush.msrb.mxu2 %v1241_v42  ;;  %v1240_v49 = vld [vmem:[#allocation2 + $0x730] sm:$0xff]  ;;  %v2750_v57 = vpop.permute.xlu1 %1035 }
 0xa8c   :  { %v924_v61 = vadd.f32 %v2302_v55, %v919_v58  ;;  %1267 = vmatpush.msrb.mxu2 %v1240_v49  ;;  %v2305_v55 = vld [vmem:[#allocation5 + $0x1e] ss:$0 sm:$0xff] }
 0xa8e   :  { %v2746_v63 = vadd.f32 %v924_v61, %v603_v60  ;;  %1268 = vmatpush.msrb.mxu2 %v1239_v51  ;;  %v1037_v61 = vsel %vm459_vm5, %v2697_v18, %v2750_v57  ;;  %v2770_v18 = vld [vmem:[#allocation2 + $0xf0] sm:$0xff]  ;;  %v1160_v51 = vld [vmem:[#allocation2 + $0x580] sm:$0xff] }
 0xa90   :  { %942 = vmatmul.f32.vlgmr.msrb.gmra.mxu3 %v2746_v63  ;;  %1269 = vmatpush.msrb.mxu2 %v1238_v53 }
 0xb13   :  { %v943_v1 = vpop.f32.mrf.mxu3 }
 0xb14   :  { %v946_v3 = vsub.f32 %v2746_v63, %v943_v1 }
 0xb16   :  { %v947_v7 = vmul.f32 %v946_v3, %v946_v3 }
 0xb18   :  { %964 = vmatmul.f32.vlgmr.msra.gmra.mxu0 %v947_v7  ;;  %v2757_v7 = vld [vmem:[#allocation2 + $0x110] sm:$0xff] }
 0xb95   :  { %v965_v26 = vpop.f32.mrf.mxu0 }
 0xb96   :  { %v966_v27 = vadd.f32 1e-05, %v965_v26  ;;  %v2800_v26 = vld [vmem:[#allocation2 + $0xa0] sm:$0xff] }
 0xb98   :  { %2360 = vrsqrt.f32 %v966_v27  ;;  %vm974_vm7 = vweird.f32 %v966_v27 }
 0xb9e   :  { %v2361_v32 = vpop.eup %2360 }
 0xb9f   :  { %v969_v33 = vmul.f32 %v2361_v32, %v966_v27  ;;  %vm975_vm6 = vweird.f32 %v2361_v32  ;;  %v2402_v27 = vld [vmem:[#allocation2 + $0x98] sm:$0xff] }
 0xba0   :  { %vm976_vm8 = vmor %vm974_vm7, %vm975_vm6 }
 0xba1   :  { %v970_v50 = vmul.f32 %v2361_v32, %v969_v33  ;;  %v2408_v33 = vld [vmem:[#allocation2 + $0x68] sm:$0xff] }
 0xba3   :  { %v971_v54 = vmul.f32 0.5, %v970_v50 }
 0xba5   :  { %v972_v59 = vsub.f32 1.5, %v971_v54  ;;  %v1123_v54 = vld [vmem:[#allocation2 + $0x518] sm:$0xff] }
 0xba6   :  { %1128 = vmatpush.msrb.mxu0 %v1123_v54  ;;  %v1151_v54 = vld [vmem:[#allocation2 + $0x538] sm:$0xff] }
 0xba7   :  { %v973_v0 = vmul.f32 %v2361_v32, %v972_v59  ;;  %v1121_v59 = vld [vmem:[#allocation2 + $0x508] sm:$0xff] }
 0xba8   :  { %1129 = vmatpush.msrb.mxu0 %v1122_v56  ;;  %v1150_v56 = vld [vmem:[#allocation2 + $0x530] sm:$0xff] }
 0xba9   :  { %v977_v5 = vsel %vm976_vm8, %v2361_v32, %v973_v0  ;;  %v2407_v32 = vld [vmem:[#allocation2 + $0x70] sm:$0xff]  ;;  %v1119_v0 = vld [vmem:[#allocation2 + $0x4f8] sm:$0xff] }
 0xbaa   :  { %v978_v12 = vmul.f32 %v977_v5, %v946_v3  ;;  %v2755_v3 = vld [vmem:[#allocation2 + $0x118] sm:$0xff]  ;;  %1130 = vmatpush.msrb.mxu0 %v1121_v59  ;;  %v1116_v5 = vld [vmem:[#allocation2 + $0x4e0] sm:$0xff] }
 0xbac   :  { %v983_v35 = vmul.f32 %v2303_v4, %v978_v12  ;;  %1131 = vmatpush.msrb.mxu0 %v1120_v62  ;;  %v1117_v4 = vld [vmem:[#allocation2 + $0x4e8] sm:$0xff]  ;;  %v1114_v12 = vld [vmem:[#allocation2 + $0x4d0] sm:$0xff] }
 0xbae   :  { %v988_v37 = vadd.f32 %v2304_v14, %v983_v35  ;;  %1132 = vmatpush.msrb.mxu0 %v1119_v0  ;;  %v1113_v14 = vld [vmem:[#allocation2 + $0x4c8] sm:$0xff] }
 0xbb0   :  { %v989_v39 = vmul.f32 0.5, %v988_v37  ;;  %1133 = vmatpush.msrb.mxu0 %v1118_v2 }
 0xbb2   :  { %2362 = vtanh.f32 %v989_v39  ;;  %1134 = vmatpush.msrb.mxu0 %v1117_v4  ;;  %v1109_v39 = vld [vmem:[#allocation2 + $0x4a8] sm:$0xff] }
 0xbb3   :  { %v1149_v4 = vld [vmem:[#allocation2 + $0x528] sm:$0xff] }
 0xbb4   :  { %1135 = vmatpush.msrb.mxu0 %v1116_v5  ;;  %v1148_v5 = vld [vmem:[#allocation2 + $0x520] sm:$0xff] }
 0xbb6   :  { %1136 = vmatpush.msrb.mxu0 %v1115_v6  ;;  %v2308_v6 = vld [vmem:[#allocation5 + $0x21] ss:$0 sm:$0xff] }
 0xbb8   :  { %v2363_v43 = vpop.eup %2362  ;;  %1137 = vmatpush.msrb.mxu0 %v1114_v12 }
 0xbb9   :  { %v991_v44 = vmul.f32 0.5, %v2363_v43  ;;  %v1163_v43 = vld [vmem:[#allocation2 + $0x598] sm:$0xff] }
 0xbba   :  { %1138 = vmatpush.msrb.mxu0 %v1113_v14  ;;  %1168 = vmatpush.msrb.mxu1 %v1163_v43  ;;  %v1233_v43 = vld [vmem:[#allocation2 + $0x6f8] sm:$0xff] }
 0xbbb   :  { %v992_v45 = vadd.f32 0.5, %v991_v44  ;;  %v1162_v44 = vld [vmem:[#allocation2 + $0x590] sm:$0xff] }
 0xbbc   :  { %1139 = vmatpush.msrb.mxu0 %v1112_v34  ;;  %1169 = vmatpush.msrb.mxu1 %v1162_v44  ;;  %v2309_v34 = vld [vmem:[#allocation5 + $0x22] ss:$0 sm:$0xff]  ;;  %v1232_v44 = vld [vmem:[#allocation2 + $0x6f0] sm:$0xff] }
 0xbbd   :  { %v993_v46 = vmul.f32 %v992_v45, %v988_v37  ;;  %v1111_v37 = vld [vmem:[#allocation2 + $0x4b8] sm:$0xff] }
 0xbbe   :  { %1140 = vmatpush.msrb.mxu0 %v1111_v37 }
 0xbbf   :  { %1030 = vmatmul.f32.vlgmr.msra.gmra.mxu1 %v993_v46  ;;  %v1161_v46 = vld [vmem:[#allocation2 + $0x588] sm:$0xff] }
 0xbc0   :  { %1141 = vmatpush.msrb.mxu0 %v1110_v38  ;;  %1170 = vmatpush.msrb.mxu1 %v1161_v46  ;;  %v1230_v46 = vld [vmem:[#allocation2 + $0x6e0] sm:$0xff] }
 0xbc2   :  { %1142 = vmatpush.msrb.mxu0 %v1109_v39  ;;  %1171 = vmatpush.msrb.mxu1 %v1160_v51  ;;  %v1237_v39 = vld [vmem:[#allocation2 + $0x718] sm:$0xff]  ;;  %v1228_v51 = vld [vmem:[#allocation2 + $0x6d0] sm:$0xff] }
 0xbc3   :  { %1274 = vmatpush.msrb.mxu3 %v1237_v39  ;;  %v1468_v39 = vld [vmem:[#allocation2 + $0x628] sm:$0xff] }
 0xbc4   :  { %1143 = vmatpush.msrb.mxu0 %v1108_v40  ;;  %v1236_v40 = vld [vmem:[#allocation2 + $0x710] sm:$0xff] }
 0xbc5   :  { %1275 = vmatpush.msrb.mxu3 %v1236_v40  ;;  %v1467_v40 = vld [vmem:[#allocation2 + $0x620] sm:$0xff] }
 0xbc6   :  { %1315 = vmatpush.msra.mxu0 %v2755_v3 }
 0xbc8   :  { %1316 = vmatpush.msra.mxu0 %v2757_v7 }
 0xbca   :  { %1317 = vmatpush.msra.mxu0 %v2760_v8 }
 0xbcc   :  { %1318 = vmatpush.msra.mxu0 %v2763_v9 }
 0xbce   :  { %1319 = vmatpush.msra.mxu0 %v2766_v10 }
 0xbd0   :  { %1320 = vmatpush.msra.mxu0 %v2770_v18 }
 0xbd2   :  { %1321 = vmatpush.msra.mxu0 %v2773_v15 }
 0xbd4   :  { %1322 = vmatpush.msra.mxu0 %v2776_v16 }
 0xbd6   :  { %1323 = vmatpush.msra.mxu0 %v2779_v22 }
 0xbd8   :  { %1324 = vmatpush.msra.mxu0 %v2782_v17 }
 0xbda   :  { %1325 = vmatpush.msra.mxu0 %v2785_v19 }
 0xbdc   :  { %1326 = vmatpush.msra.mxu0 %v2788_v20 }
 0xbde   :  { %1327 = vmatpush.msra.mxu0 %v2791_v21 }
 0xbe0   :  { %1328 = vmatpush.msra.mxu0 %v2794_v23 }
 0xbe2   :  { %1329 = vmatpush.msra.mxu0 %v2797_v25 }
 0xbe4   :  { %1330 = vmatpush.msra.mxu0 %v2800_v26 }
 0xc3c   :  { %v1031_v58 = vpop.f32.mrf.mxu1 }
 0xc3d   :  { %v1032_v60 = vadd.f32 %v2305_v55, %v1031_v58  ;;  %v1159_v55 = vld [vmem:[#allocation2 + $0x578] sm:$0xff] }
 0xc3e   :  { %1172 = vmatpush.msrb.mxu1 %v1159_v55  ;;  %v1226_v55 = vld [vmem:[#allocation2 + $0x6c0] sm:$0xff] }
 0xc3f   :  { %v1039_v1 = vadd.f32 %v1037_v61, %v1032_v60  ;;  %v1158_v60 = vld [vmem:[#allocation2 + $0x570] sm:$0xff]  ;;  %v2306_v61 = vld [vmem:[#allocation5 + $0x1f] ss:$0 sm:$0xff] }
 0xc40   :  { %1173 = vmatpush.msrb.mxu1 %v1158_v60 }
 0xc41   :  { %1056 = vmatmul.f32.vlgmr.msra.gmra.mxu2 %v1039_v1 }
 0xc42   :  { %1383 = vmatpush.msra.mxu2 %v2755_v3 }
 0xc44   :  { %1384 = vmatpush.msra.mxu2 %v2757_v7 }
 0xc46   :  { %1385 = vmatpush.msra.mxu2 %v2760_v8 }
 0xc48   :  { %1386 = vmatpush.msra.mxu2 %v2763_v9 }
 0xc49   :  { %1270 = vmatmul.f32.vlgmr.msrb.gmra.mxu2 %v2746_v63 }
 0xc4a   :  { %1387 = vmatpush.msra.mxu2 %v2766_v10 }
 0xc4c   :  { %1388 = vmatpush.msra.mxu2 %v2770_v18 }
 0xc4e   :  { %1389 = vmatpush.msra.mxu2 %v2773_v15 }
 0xc50   :  { %1390 = vmatpush.msra.mxu2 %v2776_v16 }
 0xc52   :  { %1391 = vmatpush.msra.mxu2 %v2779_v22 }
 0xc54   :  { %1392 = vmatpush.msra.mxu2 %v2782_v17 }
 0xc56   :  { %1393 = vmatpush.msra.mxu2 %v2785_v19 }
 0xc58   :  { %1394 = vmatpush.msra.mxu2 %v2788_v20 }
 0xc5a   :  { %1395 = vmatpush.msra.mxu2 %v2791_v21 }
 0xc5c   :  { %1396 = vmatpush.msra.mxu2 %v2794_v23 }
 0xc5e   :  { %1397 = vmatpush.msra.mxu2 %v2797_v25 }
 0xc60   :  { %1398 = vmatpush.msra.mxu2 %v2800_v26 }
 0xc61   :  { %1399 = vmatmul.f32.vlgmr.msra.gmra.mxu2 %v2746_v63 }
 0xc62   :  { %1541 = vmatpush.msrb.mxu2 %v2402_v27 }
 0xc64   :  { %1542 = vmatpush.msrb.mxu2 %v2403_v24 }
 0xc66   :  { %1543 = vmatpush.msrb.mxu2 %v2404_v28 }
 0xc68   :  { %1544 = vmatpush.msrb.mxu2 %v2405_v29 }
 0xc6a   :  { %1545 = vmatpush.msrb.mxu2 %v2406_v30 }
 0xc6c   :  { %1546 = vmatpush.msrb.mxu2 %v2407_v32 }
 0xc6e   :  { %1547 = vmatpush.msrb.mxu2 %v2408_v33 }
 0xc70   :  { %1548 = vmatpush.msrb.mxu2 %v2409_v47 }
 0xc72   :  { %1566 = vmatpush.msra.mxu2 %v2402_v27  ;;  %v1157_v27 = vld [vmem:[#allocation2 + $0x568] sm:$0xff] }
 0xc73   :  { %1174 = vmatpush.msrb.mxu1 %v1157_v27 }
 0xc74   :  { %1567 = vmatpush.msra.mxu2 %v2403_v24 }
 0xc76   :  { %1568 = vmatpush.msra.mxu2 %v2404_v28  ;;  %v2307_v28 = vld [vmem:[#allocation5 + $0x20] ss:$0 sm:$0xff] }
 0xc78   :  { %1569 = vmatpush.msra.mxu2 %v2405_v29  ;;  %v1156_v29 = vld [vmem:[#allocation2 + $0x560] sm:$0xff] }
 0xc79   :  { %1175 = vmatpush.msrb.mxu1 %v1156_v29  ;;  %v1223_v29 = vld [vmem:[#allocation2 + $0x6a8] sm:$0xff] }
 0xc7a   :  { %1570 = vmatpush.msra.mxu2 %v2406_v30 }
 0xc7c   :  { %1571 = vmatpush.msra.mxu2 %v2407_v32  ;;  %v1155_v32 = vld [vmem:[#allocation2 + $0x558] sm:$0xff] }
 0xc7d   :  { %1176 = vmatpush.msrb.mxu1 %v1155_v32 }
 0xc7e   :  { %1572 = vmatpush.msra.mxu2 %v2408_v33 }
 0xc80   :  { %1573 = vmatpush.msra.mxu2 %v2409_v47  ;;  %v1154_v47 = vld [vmem:[#allocation2 + $0x550] sm:$0xff] }
 0xc81   :  { %1177 = vmatpush.msrb.mxu1 %v1154_v47 }
 0xcc4   :  { %v1057_v48 = vpop.f32.mrf.mxu2 }
 0xcc5   :  { %v2805_v50 = vsub.f32 %v1039_v1, %v1057_v48 }
 0xcc7   :  { %v1061_v52 = vmul.f32 %v2805_v50, %v2805_v50 }
 0xcc9   :  { %1078 = vmatmul.f32.vlgmr.msra.gmra.mxu3 %v1061_v52  ;;  %v1152_v52 = vld [vmem:[#allocation2 + $0x540] sm:$0xff] }
 0xd4c   :  { %v1079_v35 = vpop.f32.mrf.mxu3 }
 0xd4d   :  { %v1080_v36 = vadd.f32 1e-05, %v1079_v35 }
 0xd4f   :  { %2364 = vrsqrt.f32 %v1080_v36  ;;  %vm1088_vm10 = vweird.f32 %v1080_v36 }
 0xd55   :  { %v2365_v41 = vpop.eup %2364 }
 0xd56   :  { %v1083_v42 = vmul.f32 %v2365_v41, %v1080_v36  ;;  %vm1089_vm9 = vweird.f32 %v2365_v41 }
 0xd57   :  { %vm1090_vm11 = vmor %vm1088_vm10, %vm1089_vm9  ;;  %vm1675_vm10 = vcmask 519168  }
 0xd58   :  { %v1084_v45 = vmul.f32 %v2365_v41, %v1083_v42  ;;  %v1234_v42 = vld [vmem:[#allocation2 + $0x700] sm:$0xff] }
 0xd5a   :  { %v1085_v49 = vmul.f32 0.5, %v1084_v45  ;;  %v1231_v45 = vld [vmem:[#allocation2 + $0x6e8] sm:$0xff] }
 0xd5c   :  { %v1086_v53 = vsub.f32 1.5, %v1085_v49  ;;  %v1229_v49 = vld [vmem:[#allocation2 + $0x6d8] sm:$0xff] }
 0xd5e   :  { %v1087_v58 = vmul.f32 %v2365_v41, %v1086_v53  ;;  %v1227_v53 = vld [vmem:[#allocation2 + $0x6c8] sm:$0xff] }
 0xd60   :  { %v1091_v1 = vsel %vm1090_vm11, %v2365_v41, %v1087_v58  ;;  %v1235_v41 = vld [vmem:[#allocation2 + $0x708] sm:$0xff] }
 0xd61   :  { %v1092_v24 = vmul.f32 %v1091_v1, %v2805_v50  ;;  %v1153_v50 = vld [vmem:[#allocation2 + $0x548] sm:$0xff]  ;;  %1276 = vmatpush.msrb.mxu3 %v1235_v41 }
 0xd62   :  { %1178 = vmatpush.msrb.mxu1 %v1153_v50  ;;  %v1481_v50 = vld [vmem:[#allocation2 + $0x690] sm:$0xff] }
 0xd63   :  { %v1097_v30 = vmul.f32 %v2306_v61, %v1092_v24  ;;  %1277 = vmatpush.msrb.mxu3 %v1234_v42  ;;  %v1225_v24 = vld [vmem:[#allocation2 + $0x6b8] sm:$0xff] }
 0xd64   :  { %1179 = vmatpush.msrb.mxu1 %v1152_v52  ;;  %v1480_v52 = vld [vmem:[#allocation2 + $0x688] sm:$0xff] }
 0xd65   :  { %v1102_v33 = vadd.f32 %v2307_v28, %v1097_v30  ;;  %1278 = vmatpush.msrb.mxu3 %v1233_v43  ;;  %v1224_v28 = vld [vmem:[#allocation2 + $0x6b0] sm:$0xff]  ;;  %v1222_v30 = vld [vmem:[#allocation2 + $0x6a0] sm:$0xff]  ;;  %v1466_v43 = vld [vmem:[#allocation2 + $0x618] sm:$0xff] }
 0xd66   :  { %1180 = vmatpush.msrb.mxu1 %v1151_v54  ;;  %v1479_v54 = vld [vmem:[#allocation2 + $0x680] sm:$0xff] }
 0xd67   :  { %v1103_v48 = vmul.f32 0.5, %v1102_v33  ;;  %1279 = vmatpush.msrb.mxu3 %v1232_v44  ;;  %v1465_v44 = vld [vmem:[#allocation2 + $0x610] sm:$0xff] }
 0xd68   :  { %1181 = vmatpush.msrb.mxu1 %v1150_v56 }
 0xd69   :  { %2366 = vtanh.f32 %v1103_v48  ;;  %1280 = vmatpush.msrb.mxu3 %v1231_v45  ;;  %v1482_v48 = vld [vmem:[#allocation2 + $0x698] sm:$0xff] }
 0xd6a   :  { %1182 = vmatpush.msrb.mxu1 %v1149_v4  ;;  %v1475_v4 = vld [vmem:[#allocation2 + $0x660] sm:$0xff] }
 0xd6b   :  { %1281 = vmatpush.msrb.mxu3 %v1230_v46 }
 0xd6c   :  { %1183 = vmatpush.msrb.mxu1 %v1148_v5 }
 0xd6d   :  { %1282 = vmatpush.msrb.mxu3 %v1229_v49 }
 0xd6e   :  { %1337 = vmatpush.msra.mxu1 %v2755_v3 }
 0xd6f   :  { %v2367_v59 = vpop.eup %2366  ;;  %1283 = vmatpush.msrb.mxu3 %v1228_v51 }
 0xd70   :  { %v1105_v62 = vmul.f32 0.5, %v2367_v59  ;;  %1338 = vmatpush.msra.mxu1 %v2757_v7 }
 0xd71   :  { %1284 = vmatpush.msrb.mxu3 %v1227_v53  ;;  %v2313_v53 = vld [vmem:[#allocation5 + $0x27] ss:$0 sm:$0xff] }
 0xd72   :  { %v1106_v0 = vadd.f32 0.5, %v1105_v62  ;;  %1339 = vmatpush.msra.mxu1 %v2760_v8  ;;  %v1478_v62 = vld [vmem:[#allocation2 + $0x678] sm:$0xff] }
 0xd73   :  { %1285 = vmatpush.msrb.mxu3 %v1226_v55 }
 0xd74   :  { %v1107_v2 = vmul.f32 %v1106_v0, %v1102_v33  ;;  %1340 = vmatpush.msra.mxu1 %v2763_v9 }
 0xd75   :  { %1286 = vmatpush.msrb.mxu3 %v1225_v24 }
 0xd76   :  { %1144 = vmatmul.f32.vlgmr.msrb.gmra.mxu0 %v1107_v2  ;;  %1341 = vmatpush.msra.mxu1 %v2766_v10  ;;  %v1477_v2 = vld [vmem:[#allocation2 + $0x670] sm:$0xff] }
 0xd77   :  { %1287 = vmatpush.msrb.mxu3 %v1224_v28  ;;  %1483 = vmatpush.msrb.mxu0 %v1482_v48 }
 0xd78   :  { %1342 = vmatpush.msra.mxu1 %v2770_v18 }
 0xd79   :  { %1288 = vmatpush.msrb.mxu3 %v1223_v29  ;;  %1484 = vmatpush.msrb.mxu0 %v1481_v50  ;;  %v1727_v50 = vld [vmem:[#allocation2 + $0x8f8] sm:$0xff] }
 0xd7a   :  { %1343 = vmatpush.msra.mxu1 %v2773_v15 }
 0xd7b   :  { %1289 = vmatpush.msrb.mxu3 %v1222_v30  ;;  %1485 = vmatpush.msrb.mxu0 %v1480_v52  ;;  %v1726_v52 = vld [vmem:[#allocation2 + $0x8f0] sm:$0xff] }
 0xd7c   :  { %1344 = vmatpush.msra.mxu1 %v2776_v16 }
 0xd7d   :  { %1405 = vmatpush.msra.mxu3 %v2755_v3  ;;  %1486 = vmatpush.msrb.mxu0 %v1479_v54  ;;  %v1725_v54 = vld [vmem:[#allocation2 + $0x8e8] sm:$0xff] }
 0xd7e   :  { %1345 = vmatpush.msra.mxu1 %v2779_v22 }
 0xd7f   :  { %1406 = vmatpush.msra.mxu3 %v2757_v7  ;;  %1487 = vmatpush.msrb.mxu0 %v1478_v62 }
 0xd80   :  { %1346 = vmatpush.msra.mxu1 %v2782_v17 }
 0xd81   :  { %1407 = vmatpush.msra.mxu3 %v2760_v8  ;;  %1488 = vmatpush.msrb.mxu0 %v1477_v2 }
 0xd82   :  { %1347 = vmatpush.msra.mxu1 %v2785_v19 }
 0xd83   :  { %1408 = vmatpush.msra.mxu3 %v2763_v9 }
 0xd84   :  { %1348 = vmatpush.msra.mxu1 %v2788_v20 }
 0xd85   :  { %1409 = vmatpush.msra.mxu3 %v2766_v10 }
 0xd86   :  { %1349 = vmatpush.msra.mxu1 %v2791_v21 }
 0xd87   :  { %1410 = vmatpush.msra.mxu3 %v2770_v18 }
 0xd88   :  { %1350 = vmatpush.msra.mxu1 %v2794_v23 }
 0xd89   :  { %1411 = vmatpush.msra.mxu3 %v2773_v15 }
 0xd8a   :  { %1351 = vmatpush.msra.mxu1 %v2797_v25 }
 0xd8b   :  { %1412 = vmatpush.msra.mxu3 %v2776_v16 }
 0xd8c   :  { %1352 = vmatpush.msra.mxu1 %v2800_v26 }
 0xd8d   :  { %1413 = vmatpush.msra.mxu3 %v2779_v22 }
 0xd8f   :  { %1414 = vmatpush.msra.mxu3 %v2782_v17  ;;  %v2862_v17 = vpop.f32.mrf.mxu2 }
 0xd91   :  { %1415 = vmatpush.msra.mxu3 %v2785_v19 }
 0xd93   :  { %1416 = vmatpush.msra.mxu3 %v2788_v20 }
 0xd95   :  { %1417 = vmatpush.msra.mxu3 %v2791_v21  ;;  %v2311_v21 = vld [vmem:[#allocation5 + $0x24] ss:$0 sm:$0xff] }
 0xd97   :  { %1418 = vmatpush.msra.mxu3 %v2794_v23 }
 0xd99   :  { %1419 = vmatpush.msra.mxu3 %v2797_v25 }
 0xd9b   :  { %1420 = vmatpush.msra.mxu3 %v2800_v26  ;;  %v1400_v26 = vpop.f32.mrf.mxu2 }
 0xd9c   :  { %v1403_v33 = vsub.f32 %v2746_v63, %v1400_v26  ;;  %v1729_v26 = vld [vmem:[#allocation2 + $0x908] sm:$0xff] }
 0xd9e   :  { %v1404_v47 = vmul.f32 %v1403_v33, %v1403_v33 }
 0xdf3   :  { %v1145_v12 = vpop.f32.mrf.mxu0 }
 0xdf4   :  { %v1146_v14 = vadd.f32 %v2308_v6, %v1145_v12  ;;  %v1474_v6 = vld [vmem:[#allocation2 + $0x658] sm:$0xff]  ;;  %v1473_v12 = vld [vmem:[#allocation2 + $0x650] sm:$0xff] }
 0xdf6   :  { %1184 = vmatmul.f32.vlgmr.msrb.gmra.mxu1 %v1146_v14 }
 0xdf7   :  { %1503 = vmatpush.msrb.mxu1 %v1466_v43  ;;  %v2873_v43 = vld [vmem:[#allocation2 + $0x58] sm:$0xff] }
 0xdf9   :  { %1504 = vmatpush.msrb.mxu1 %v1465_v44  ;;  %v2875_v44 = vld [vmem:[#allocation2 + $0x50] sm:$0xff] }
 0xe73   :  { %v1185_v35 = vpop.f32.mrf.mxu1 }
 0xe74   :  { %v1186_v36 = vadd.f32 %v2309_v34, %v1185_v35  ;;  %v1471_v34 = vld [vmem:[#allocation2 + $0x640] sm:$0xff] }
 0xe76   :  { %v1188_v37 = vadd.f32 %v1186_v36, %v1146_v14  ;;  %v1472_v14 = vld [vmem:[#allocation2 + $0x648] sm:$0xff] }
 0xe78   :  { %v1189_v38 = vsel %vm885_vm15, %v1188_v37, 0.0 }
 0xe79   :  { %1190 = vadd.xlane.f32.xlu1 %v1189_v38  ;;  %v1469_v38 = vld [vmem:[#allocation2 + $0x630] sm:$0xff] }
 0xeec   :  { %v1191_v58 = vpop.xlane.xlu1 %1190 }
 0xeed   :  { %v1192_v60 = vmul.f32 %v1191_v58, %v2740_v13 }
 0xeef   :  { %v1193_v61 = vsub.f32 %v1188_v37, %v1192_v60  ;;  %v1470_v37 = vld [vmem:[#allocation2 + $0x638] sm:$0xff]  ;;  %v2314_v60 = vld [vmem:[#allocation5 + $0x28] ss:$0 sm:$0xff] }
 0xef1   :  { %v1194_v1 = vmul.f32 %v1193_v61, %v1193_v61 }
 0xef3   :  { %v1195_v27 = vsel %vm885_vm15, %v1194_v1, 0.0 }
 0xef4   :  { %1196 = vadd.xlane.f32.xlu2 %v1195_v27 }
 0xf67   :  { %v1197_v3 = vpop.xlane.xlu2 %1196 }
 0xf68   :  { %v1198_v7 = vmul.f32 %v1197_v3, %v2740_v13  ;;  %v2310_v13 = vld [vmem:[#allocation5 + $0x23] ss:$0 sm:$0xff]  ;;  %v1464_v3 = vld [vmem:[#allocation2 + $0x608] sm:$0xff] }
 0xf69   :  { %1505 = vmatpush.msrb.mxu1 %v1464_v3 }
 0xf6a   :  { %v1199_v8 = vadd.f32 1e-05, %v1198_v7  ;;  %v1463_v7 = vld [vmem:[#allocation2 + $0x600] sm:$0xff] }
 0xf6b   :  { %1506 = vmatpush.msrb.mxu1 %v1463_v7 }
 0xf6c   :  { %2368 = vrsqrt.f32 %v1199_v8  ;;  %vm1206_vm13 = vweird.f32 %v1199_v8 }
 0xf72   :  { %v2369_v9 = vpop.eup %2368 }
 0xf73   :  { %v1201_v10 = vmul.f32 %v2369_v9, %v1199_v8  ;;  %vm1207_vm12 = vweird.f32 %v2369_v9  ;;  %v1462_v8 = vld [vmem:[#allocation2 + $0x5f8] sm:$0xff] }
 0xf74   :  { %vm1208_vm14 = vmor %vm1206_vm13, %vm1207_vm12  ;;  %1507 = vmatpush.msrb.mxu1 %v1462_v8 }
 0xf75   :  { %v1202_v18 = vmul.f32 %v2369_v9, %v1201_v10  ;;  %v1460_v10 = vld [vmem:[#allocation2 + $0x5e8] sm:$0xff] }
 0xf77   :  { %v1203_v15 = vmul.f32 0.5, %v1202_v18  ;;  %v1459_v18 = vld [vmem:[#allocation2 + $0x5e0] sm:$0xff] }
 0xf79   :  { %v1204_v16 = vsub.f32 1.5, %v1203_v15  ;;  %v1458_v15 = vld [vmem:[#allocation2 + $0x5d8] sm:$0xff] }
 0xf7b   :  { %v1205_v22 = vmul.f32 %v2369_v9, %v1204_v16  ;;  %v1457_v16 = vld [vmem:[#allocation2 + $0x5d0] sm:$0xff] }
 0xf7d   :  { %v1209_v19 = vsel %vm1208_vm14, %v2369_v9, %v1205_v22  ;;  %v1461_v9 = vld [vmem:[#allocation2 + $0x5f0] sm:$0xff]  ;;  %v1456_v22 = vld [vmem:[#allocation2 + $0x5c8] sm:$0xff] }
 0xf7e   :  { %v1210_v20 = vmul.f32 %v1209_v19, %v1193_v61  ;;  %1508 = vmatpush.msrb.mxu1 %v1461_v9  ;;  %v1454_v19 = vld [vmem:[#allocation2 + $0x5b8] sm:$0xff] }
 0xf7f   :  { %v1611_v9 = vld [vmem:[#allocation2 + $0x7d8] sm:$0xff] }
 0xf80   :  { %v1215_v23 = vmul.f32 %v2310_v13, %v1210_v20  ;;  %1509 = vmatpush.msrb.mxu1 %v1460_v10  ;;  %v1455_v13 = vld [vmem:[#allocation2 + $0x5c0] sm:$0xff]  ;;  %v1453_v20 = vld [vmem:[#allocation2 + $0x5b0] sm:$0xff] }
 0xf81   :  { %v1610_v10 = vld [vmem:[#allocation2 + $0x7d0] sm:$0xff] }
 0xf82   :  { %v1220_v32 = vadd.f32 %v2311_v21, %v1215_v23  ;;  %1510 = vmatpush.msrb.mxu1 %v1459_v18  ;;  %v1452_v21 = vld [vmem:[#allocation2 + $0x5a8] sm:$0xff]  ;;  %v1451_v23 = vld [vmem:[#allocation2 + $0x5a0] sm:$0xff] }
 0xf83   :  { %v1609_v18 = vld [vmem:[#allocation2 + $0x7c8] sm:$0xff] }
 0xf84   :  { %v1221_v25 = vadd.f32 %v1220_v32, %v2746_v63  ;;  %v1476_v63 = vld [vmem:[#allocation2 + $0x668] sm:$0xff]  ;;  %1511 = vmatpush.msrb.mxu1 %v1458_v15  ;;  %v1731_v32 = vld [vmem:[#allocation2 + $0x918] sm:$0xff]  ;;  %v1608_v15 = vld [vmem:[#allocation2 + $0x7c0] sm:$0xff] }
 0xf85   :  { %1489 = vmatpush.msrb.mxu0 %v1476_v63 }
 0xf86   :  { %1290 = vmatmul.f32.vlgmr.msrb.gmra.mxu3 %v1221_v25  ;;  %1331 = vmatmul.f32.vlgmr.msra.gmra.mxu0 %v1221_v25 }
 0xf87   :  { %1490 = vmatpush.msrb.mxu0 %v1475_v4  ;;  %1512 = vmatpush.msrb.mxu1 %v1457_v16 }
 0xf88   :  { %1627 = vmatpush.msrb.mxu3 %v1611_v9 }
 0xf89   :  { %1491 = vmatpush.msrb.mxu0 %v1474_v6  ;;  %1513 = vmatpush.msrb.mxu1 %v1456_v22 }
 0xf8a   :  { %1628 = vmatpush.msrb.mxu3 %v1610_v10 }
 0xf8b   :  { %1492 = vmatpush.msrb.mxu0 %v1473_v12  ;;  %1514 = vmatpush.msrb.mxu1 %v1455_v13  ;;  %v2315_v12 = vld [vmem:[#allocation5 + $0x25] ss:$0 sm:$0xff]  ;;  %v1607_v13 = vld [vmem:[#allocation2 + $0x7b8] sm:$0xff] }
 0xf8c   :  { %1629 = vmatpush.msrb.mxu3 %v1609_v18 }
 0xf8d   :  { %1493 = vmatpush.msrb.mxu0 %v1472_v14  ;;  %1515 = vmatpush.msrb.mxu1 %v1454_v19  ;;  %v1605_v19 = vld [vmem:[#allocation2 + $0x7a8] sm:$0xff] }
 0xf8e   :  { %1421 = vmatmul.f32.vlgmr.msra.gmra.mxu3 %v1404_v47  ;;  %v1728_v47 = vld [vmem:[#allocation2 + $0x900] sm:$0xff] }
 0xf8f   :  { %1494 = vmatpush.msrb.mxu0 %v1471_v34  ;;  %1516 = vmatpush.msrb.mxu1 %v1453_v20  ;;  %v1604_v20 = vld [vmem:[#allocation2 + $0x7a0] sm:$0xff] }
 0xf90   :  { %1630 = vmatpush.msrb.mxu3 %v1608_v15 }
 0xf91   :  { %1495 = vmatpush.msrb.mxu0 %v1470_v37  ;;  %1517 = vmatpush.msrb.mxu1 %v1452_v21 }
 0xf92   :  { %1631 = vmatpush.msrb.mxu3 %v1607_v13 }
 0xf93   :  { %1496 = vmatpush.msrb.mxu0 %v1469_v38  ;;  %1518 = vmatpush.msrb.mxu1 %v1451_v23 }
 0xf95   :  { %1497 = vmatpush.msrb.mxu0 %v1468_v39 }
 0xf97   :  { %1498 = vmatpush.msrb.mxu0 %v1467_v40 }
0x1003   :  { %v1332_v56 = vpop.f32.mrf.mxu0 }
0x1004   :  { %v2866_v59 = vsub.f32 %v1221_v25, %v1332_v56  ;;  %v1730_v25 = vld [vmem:[#allocation2 + $0x910] sm:$0xff] }
0x1006   :  { %v1336_v0 = vmul.f32 %v2866_v59, %v2866_v59 }
0x1008   :  { %1353 = vmatmul.f32.vlgmr.msra.gmra.mxu1 %v1336_v0  ;;  %v1724_v0 = vld [vmem:[#allocation2 + $0x8e0] sm:$0xff] }
0x1009   :  { %v2870_v5 = vpop.f32.mrf.mxu3  ;;  %1740 = vmatpush.msra.mxu1 %v1731_v32  ;;  %v1646_v32 = vld [vmem:[#allocation2 + $0x818] sm:$0xff] }
0x100a   :  { %1662 = vmatpush.msra.mxu0 %v1646_v32  ;;  %v1718_v32 = vld [vmem:[#allocation2 + $0x8b0] sm:$0xff] }
0x100b   :  { %1741 = vmatpush.msra.mxu1 %v1730_v25  ;;  %v1645_v25 = vld [vmem:[#allocation2 + $0x810] sm:$0xff] }
0x100c   :  { %1663 = vmatpush.msra.mxu0 %v1645_v25  ;;  %v1717_v25 = vld [vmem:[#allocation2 + $0x8a8] sm:$0xff] }
0x100d   :  { %1742 = vmatpush.msra.mxu1 %v1729_v26 }
0x100f   :  { %1743 = vmatpush.msra.mxu1 %v1728_v47 }
0x1011   :  { %v1422_v35 = vpop.f32.mrf.mxu3  ;;  %1744 = vmatpush.msra.mxu1 %v1727_v50 }
0x1012   :  { %v1423_v36 = vadd.f32 1e-05, %v1422_v35  ;;  %v2316_v35 = vld [vmem:[#allocation5 + $0x26] ss:$0 sm:$0xff] }
0x1013   :  { %1745 = vmatpush.msra.mxu1 %v1726_v52  ;;  %v1642_v52 = vld [vmem:[#allocation2 + $0x7f8] sm:$0xff] }
0x1014   :  { %2370 = vrsqrt.f32 %v1423_v36  ;;  %vm1431_vm1 = vweird.f32 %v1423_v36 }
0x1015   :  { %1746 = vmatpush.msra.mxu1 %v1725_v54 }
0x1017   :  { %1747 = vmatpush.msra.mxu1 %v1724_v0 }
0x101a   :  { %v2371_v41 = vpop.eup %2370 }
0x101b   :  { %v1426_v42 = vmul.f32 %v2371_v41, %v1423_v36  ;;  %vm1432_vm15 = vweird.f32 %v2371_v41 }
0x101c   :  { %vm1433_vm2 = vmor %vm1431_vm1, %vm1432_vm15 }
0x101d   :  { %v1427_v45 = vmul.f32 %v2371_v41, %v1426_v42 }
0x101f   :  { %v1428_v46 = vmul.f32 0.5, %v1427_v45  ;;  %v2878_v45 = vld [vmem:[#allocation2 + $0x48] sm:$0xff] }
0x1021   :  { %v1429_v49 = vsub.f32 1.5, %v1428_v46  ;;  %v2884_v46 = vld [vmem:[#allocation2 + $0x38] sm:$0xff] }
0x1023   :  { %v1430_v51 = vmul.f32 %v2371_v41, %v1429_v49  ;;  %v2889_v49 = vld [vmem:[#allocation2 + $0x30] sm:$0xff] }
0x1025   :  { %v1434_v55 = vsel %vm1433_vm2, %v2371_v41, %v1430_v51  ;;  %v2892_v51 = vld [vmem:[#allocation2 + $0x28] sm:$0xff] }
0x1026   :  { %v1435_v58 = vmul.f32 %v1434_v55, %v1403_v33  ;;  %v2901_v55 = vld [vmem:[#allocation2 + $0x18] sm:$0xff] }
0x1028   :  { %v1440_v61 = vmul.f32 %v2313_v53, %v1435_v58  ;;  %v2895_v53 = vld [vmem:[#allocation2 + $0x20] sm:$0xff]  ;;  %v2904_v58 = vld [vmem:[#allocation2 + $0x10] sm:$0xff] }
0x102a   :  { %v1445_v1 = vadd.f32 %v2314_v60, %v1440_v61  ;;  %v2907_v60 = vld [vmem:[#allocation2 + $0x8] sm:$0xff]  ;;  %v2910_v61 = vld [vmem:[#allocation2] sm:$0xff] }
0x102c   :  { %v1446_v27 = vmul.f32 0.5, %v1445_v1 }
0x102e   :  { %2372 = vtanh.f32 %v1446_v27 }
0x1034   :  { %v2373_v24 = vpop.eup %2372 }
0x1035   :  { %v1448_v28 = vmul.f32 0.5, %v2373_v24 }
0x1037   :  { %v1449_v29 = vadd.f32 0.5, %v1448_v28 }
0x1039   :  { %v1450_v30 = vmul.f32 %v1449_v29, %v1445_v1  ;;  %v2317_v1 = vld [vmem:[#allocation5 + $0x29] ss:$0 sm:$0xff] }
0x103b   :  { %1499 = vmatmul.f32.vlgmr.msrb.gmra.mxu0 %v1450_v30 }
0x1085   :  { %v1354_v33 = vpop.f32.mrf.mxu1 }
0x1086   :  { %v1355_v48 = vadd.f32 1e-05, %v1354_v33  ;;  %v1644_v33 = vld [vmem:[#allocation2 + $0x808] sm:$0xff] }
0x1087   :  { %1664 = vmatpush.msra.mxu0 %v1644_v33 }
0x1088   :  { %2374 = vrsqrt.f32 %v1355_v48  ;;  %vm1363_vm4 = vweird.f32 %v1355_v48 }
0x108e   :  { %v2375_v56 = vpop.eup %2374 }
0x108f   :  { %v1358_v62 = vmul.f32 %v2375_v56, %v1355_v48  ;;  %vm1364_vm3 = vweird.f32 %v2375_v56  ;;  %v1643_v48 = vld [vmem:[#allocation2 + $0x800] sm:$0xff] }
0x1090   :  { %vm1365_vm6 = vmor %vm1363_vm4, %vm1364_vm3  ;;  %1665 = vmatpush.msra.mxu0 %v1643_v48 }
0x1091   :  { %v1359_v2 = vmul.f32 %v2375_v56, %v1358_v62  ;;  %v2318_v62 = vld [vmem:[#allocation5 + $0x2b] ss:$0 sm:$0xff] }
0x1092   :  { %1666 = vmatpush.msra.mxu0 %v1642_v52 }
0x1093   :  { %v1360_v63 = vmul.f32 0.5, %v1359_v2 }
0x1095   :  { %v1361_v4 = vsub.f32 1.5, %v1360_v63  ;;  %v2319_v63 = vld [vmem:[#allocation5 + $0x2c] ss:$0 sm:$0xff] }
0x1097   :  { %v1362_v6 = vmul.f32 %v2375_v56, %v1361_v4 }
0x1099   :  { %v1366_v14 = vsel %vm1365_vm6, %v2375_v56, %v1362_v6  ;;  %v1641_v56 = vld [vmem:[#allocation2 + $0x7f0] sm:$0xff] }
0x109a   :  { %v1367_v34 = vmul.f32 %v1366_v14, %v2866_v59  ;;  %v2881_v59 = vld [vmem:[#allocation2 + $0x40] sm:$0xff]  ;;  %1667 = vmatpush.msra.mxu0 %v1641_v56  ;;  %v2322_v56 = vld [vmem:[#allocation5 + $0x2f] ss:$0 sm:$0xff] }
0x109c   :  { %v1372_v36 = vmul.f32 %v2315_v12, %v1367_v34 }
0x109e   :  { %v1377_v37 = vadd.f32 %v2316_v35, %v1372_v36 }
0x10a0   :  { %v1378_v38 = vmul.f32 0.5, %v1377_v37 }
0x10a2   :  { %2376 = vtanh.f32 %v1378_v38  ;;  %v1639_v38 = vld [vmem:[#allocation2 + $0x7e0] sm:$0xff] }
0x10a8   :  { %v2377_v39 = vpop.eup %2376 }
0x10a9   :  { %v1380_v40 = vmul.f32 0.5, %v2377_v39  ;;  %v2320_v39 = vld [vmem:[#allocation5 + $0x2d] ss:$0 sm:$0xff] }
0x10ab   :  { %v1381_v41 = vadd.f32 0.5, %v1380_v40 }
0x10ad   :  { %v1382_v42 = vmul.f32 %v1381_v41, %v1377_v37  ;;  %v1640_v37 = vld [vmem:[#allocation2 + $0x7e8] sm:$0xff] }
0x10ae   :  { %1668 = vmatpush.msra.mxu0 %v1640_v37 }
0x10af   :  { %1519 = vmatmul.f32.vlgmr.msrb.gmra.mxu1 %v1382_v42  ;;  %v2321_v42 = vld [vmem:[#allocation5 + $0x2e] ss:$0 sm:$0xff] }
0x10b0   :  { %1867 = vmatpush.msrb.mxu1 %v2873_v43  ;;  %1669 = vmatpush.msra.mxu0 %v1639_v38  ;;  %v1940_v38 = vld [vmem:[#allocation2 + $0x870] sm:$0xff] }
0x10b2   :  { %1868 = vmatpush.msrb.mxu1 %v2875_v44  ;;  %1821 = vmatpush.msrb.mxu0 %v2873_v43 }
0x10b4   :  { %1869 = vmatpush.msrb.mxu1 %v2878_v45  ;;  %1822 = vmatpush.msrb.mxu0 %v2875_v44 }
0x10b6   :  { %1870 = vmatpush.msrb.mxu1 %v2881_v59  ;;  %1823 = vmatpush.msrb.mxu0 %v2878_v45 }
0x10b7   :  { %2252 = vmatmul.msk.f32.vlgmr.msra.gmra.mxu1 %vm459_vm5, %v2596_v31 }
0x10b8   :  { %1871 = vmatpush.msrb.mxu1 %v2884_v46  ;;  %v1500_v27 = vpop.f32.mrf.mxu0  ;;  %1824 = vmatpush.msrb.mxu0 %v2881_v59 }
0x10ba   :  { %1872 = vmatpush.msrb.mxu1 %v2889_v49  ;;  %1825 = vmatpush.msrb.mxu0 %v2884_v46 }
0x10bc   :  { %1873 = vmatpush.msrb.mxu1 %v2892_v51  ;;  %1826 = vmatpush.msrb.mxu0 %v2889_v49 }
0x10be   :  { %1874 = vmatpush.msrb.mxu1 %v2895_v53  ;;  %1827 = vmatpush.msrb.mxu0 %v2892_v51 }
0x10bf   :  { %2256 = vmatmul.msk.f32.vlgmr.msrb.gmra.mxu1 %vm459_vm5, %v2596_v31 }
0x10c0   :  { %2013 = vmatpush.msra.mxu1 %v2901_v55  ;;  %1828 = vmatpush.msrb.mxu0 %v2895_v53 }
0x10c2   :  { %2014 = vmatpush.msra.mxu1 %v2904_v58 }
0x10c4   :  { %2015 = vmatpush.msra.mxu1 %v2907_v60 }
0x10c6   :  { %2016 = vmatpush.msra.mxu1 %v2910_v61 }
0x10c8   :  { %2119 = vmatpush.msrb.mxu1 %v2901_v55 }
0x10ca   :  { %2120 = vmatpush.msrb.mxu1 %v2904_v58 }
0x10cc   :  { %2121 = vmatpush.msrb.mxu1 %v2907_v60 }
0x10ce   :  { %2122 = vmatpush.msrb.mxu1 %v2910_v61 }
0x112c   :  { %v1520_v24 = vpop.f32.mrf.mxu1 }
0x112d   :  { %v1521_v28 = vadd.f32 %v1520_v24, %v1500_v27 }
0x112f   :  { %v1527_v29 = vadd.f32 %v2317_v1, %v1521_v28 }
0x1131   :  { %v1529_v30 = vadd.f32 %v1527_v29, %v2750_v57  ;;  %v1606_v57 = vld [vmem:[#allocation2 + $0x7b0] sm:$0xff]  ;;  %v2529_v29 = vmov 64.0  }
0x1132   :  { %1632 = vmatpush.msrb.mxu3 %v1606_v57  ;;  %v1723_v57 = vld [vmem:[#allocation2 + $0x8d8] sm:$0xff] }
0x1133   :  { %2248 = vmatmul.msk.f32.vlgmr.msrb.gmra.mxu2 %vm459_vm5, %v1529_v30 }
0x1134   :  { %1633 = vmatpush.msrb.mxu3 %v1605_v19  ;;  %1763 = vmatpush.msrb.mxu2 %v1723_v57  ;;  %v1722_v19 = vld [vmem:[#allocation2 + $0x8d0] sm:$0xff] }
0x1135   :  { %v1936_v57 = vld [vmem:[#allocation2 + $0x850] sm:$0xff] }
0x1136   :  { %1634 = vmatpush.msrb.mxu3 %v1604_v20  ;;  %1764 = vmatpush.msrb.mxu2 %v1722_v19  ;;  %v1721_v20 = vld [vmem:[#allocation2 + $0x8c8] sm:$0xff] }
0x1137   :  { %v1935_v19 = vld [vmem:[#allocation2 + $0x848] sm:$0xff] }
0x1138   :  { %1796 = vmatpush.msra.mxu3 %v2873_v43  ;;  %1765 = vmatpush.msrb.mxu2 %v1721_v20  ;;  %v1934_v20 = vld [vmem:[#allocation2 + $0x840] sm:$0xff] }
0x113a   :  { %1797 = vmatpush.msra.mxu3 %v2875_v44 }
0x113c   :  { %1798 = vmatpush.msra.mxu3 %v2878_v45 }
0x113e   :  { %1799 = vmatpush.msra.mxu3 %v2881_v59 }
0x1140   :  { %1800 = vmatpush.msra.mxu3 %v2884_v46 }
0x1142   :  { %1801 = vmatpush.msra.mxu3 %v2889_v49 }
0x1144   :  { %1802 = vmatpush.msra.mxu3 %v2892_v51 }
0x1146   :  { %1803 = vmatpush.msra.mxu3 %v2895_v53 }
0x11b6   :  { %v1550_v3 = vpop.f32.mrf.mxu2 }
0x11b7   :  { %v1553_v7 = vsub.f32 %v1529_v30, %v1550_v3 }
0x11b9   :  { %v1554_v8 = vmul.f32 %v1553_v7, %v1553_v7 }
0x11bb   :  { %2249 = vmatmul.msk.f32.vlgmr.msra.gmra.mxu2 %vm459_vm5, %v1554_v8 }
0x123e   :  { %v1575_v16 = vpop.f32.mrf.mxu2 }
0x123f   :  { %v1576_v22 = vadd.f32 1e-05, %v1575_v16 }
0x1241   :  { %2378 = vrsqrt.f32 %v1576_v22  ;;  %vm1584_vm8 = vweird.f32 %v1576_v22 }
0x1247   :  { %v2379_v21 = vpop.eup %2378 }
0x1248   :  { %v1579_v23 = vmul.f32 %v2379_v21, %v1576_v22  ;;  %vm1585_vm7 = vweird.f32 %v2379_v21 }
0x1249   :  { %vm1586_vm9 = vmor %vm1584_vm8, %vm1585_vm7 }
0x124a   :  { %v1580_v26 = vmul.f32 %v2379_v21, %v1579_v23  ;;  %v1719_v23 = vld [vmem:[#allocation2 + $0x8b8] sm:$0xff] }
0x124c   :  { %v1581_v47 = vmul.f32 0.5, %v1580_v26  ;;  %v1716_v26 = vld [vmem:[#allocation2 + $0x8a0] sm:$0xff] }
0x124e   :  { %v1582_v50 = vsub.f32 1.5, %v1581_v47 }
0x1250   :  { %v1583_v54 = vmul.f32 %v2379_v21, %v1582_v50 }
0x1252   :  { %v1587_v0 = vsel %vm1586_vm9, %v2379_v21, %v1583_v54  ;;  %v1720_v21 = vld [vmem:[#allocation2 + $0x8c0] sm:$0xff] }
0x1253   :  { %v1588_v2 = vmul.f32 %v1587_v0, %v1553_v7  ;;  %1766 = vmatpush.msrb.mxu2 %v1720_v21 }
0x1255   :  { %v1593_v4 = vmul.f32 %v2318_v62, %v1588_v2  ;;  %1767 = vmatpush.msrb.mxu2 %v1719_v23  ;;  %v2312_v62 = vld [vmem:[#allocation5 + $0x2a] ss:$0 sm:$0xff] }
0x1257   :  { %v1598_v6 = vadd.f32 %v2319_v63, %v1593_v4  ;;  %1768 = vmatpush.msrb.mxu2 %v1718_v32  ;;  %v1933_v32 = vld [vmem:[#allocation2 + $0x838] sm:$0xff] }
0x1259   :  { %v1599_v12 = vmul.f32 0.5, %v1598_v6  ;;  %1769 = vmatpush.msrb.mxu2 %v1717_v25  ;;  %v1932_v25 = vld [vmem:[#allocation2 + $0x830] sm:$0xff] }
0x125b   :  { %2380 = vtanh.f32 %v1599_v12  ;;  %1770 = vmatpush.msrb.mxu2 %v1716_v26  ;;  %v1931_v26 = vld [vmem:[#allocation2 + $0x828] sm:$0xff] }
0x125c   :  { %2382 = vrcp.f32 %v2529_v29  ;;  %v2325_v29 = vld [vmem:[#allocation5 + $0x33] ss:$0 sm:$0xff] }
0x125d   :  { %1892 = vmatpush.msra.mxu2 %v2873_v43 }
0x125f   :  { %1893 = vmatpush.msra.mxu2 %v2875_v44 }
0x1261   :  { %v2381_v14 = vpop.eup %2380  ;;  %1894 = vmatpush.msra.mxu2 %v2878_v45  ;;  %v2948_v45 = vpop.f32.mrf.mxu1 }
0x1262   :  { %v1601_v34 = vmul.f32 0.5, %v2381_v14  ;;  %v2383_v30 = vpop.eup %2382 }
0x1263   :  { %v1680_v3 = vmul.f32 64.0, %v2383_v30  ;;  %vm1684_vm11 = vweird.f32 %v2383_v30  ;;  %1895 = vmatpush.msra.mxu2 %v2881_v59 }
0x1264   :  { %v1602_v35 = vadd.f32 0.5, %v1601_v34 }
0x1265   :  { %v1681_v7 = vsub.f32 1.0, %v1680_v3  ;;  %1896 = vmatpush.msra.mxu2 %v2884_v46 }
0x1266   :  { %v1603_v36 = vmul.f32 %v1602_v35, %v1598_v6  ;;  %v1945_v35 = vld [vmem:[#allocation2 + $0x898] sm:$0xff] }
0x1267   :  { %v1682_v8 = vmul.f32 %v2383_v30, %v1681_v7  ;;  %1897 = vmatpush.msra.mxu2 %v2889_v49  ;;  %v1292_v49 = vadd.f32 %v2870_v5, %v2862_v17  ;;  %v2326_v7 = vld [vmem:[#allocation5 + $0x34] ss:$0 sm:$0xff] }
0x1268   :  { %2250 = vmatmul.msk.f32.vlgmr.msrb.gmra.mxu3 %vm459_vm5, %v1603_v36  ;;  %v1944_v36 = vld [vmem:[#allocation2 + $0x890] sm:$0xff] }
0x1269   :  { %v1683_v9 = vadd.f32 %v2383_v30, %v1682_v8  ;;  %1898 = vmatpush.msra.mxu2 %v2892_v51  ;;  %v2323_v51 = vld [vmem:[#allocation5 + $0x30] ss:$0 sm:$0xff]  ;;  %v1298_v2 = vadd.f32 %v2312_v62, %v1292_v49  ;;  %v1876_v6 = vpop.f32.mrf.mxu1  ;;  %1957 = vmatpush.msrb.mxu3 %v1945_v35 }
0x126a   :  { %v1879_v12 = vsub.f32 %v2596_v31, %v1876_v6 }
0x126b   :  { %v1685_v10 = vsel %vm1684_vm11, %v2383_v30, %v1683_v9  ;;  %1899 = vmatpush.msra.mxu2 %v2895_v53  ;;  %1958 = vmatpush.msrb.mxu3 %v1944_v36 }
0x126c   :  { %v1880_v17 = vmul.f32 %v1879_v12, %v1879_v12 }
0x12eb   :  { %v1636_v40 = vpop.f32.mrf.mxu3 }
0x12ec   :  { %v1637_v41 = vadd.f32 %v2320_v39, %v1636_v40  ;;  %v1939_v39 = vld [vmem:[#allocation2 + $0x868] sm:$0xff]  ;;  %v1938_v40 = vld [vmem:[#allocation2 + $0x860] sm:$0xff] }
0x12ee   :  { %2251 = vmatmul.msk.f32.vlgmr.msra.gmra.mxu0 %vm459_vm5, %v1637_v41 }
0x136b   :  { %v1671_v1 = vpop.f32.mrf.mxu0 }
0x136c   :  { %v1672_v27 = vadd.f32 %v2321_v42, %v1671_v1 }
0x136e   :  { %v1674_v24 = vadd.f32 %v1672_v27, %v1637_v41 }
0x1370   :  { %v1676_v28 = vsel %vm1675_vm10, %v1674_v24, 0.0 }
0x1371   :  { %1677 = vadd.xlane.f32.xlu2 %v1676_v28 }
0x13e4   :  { %v1678_v18 = vpop.xlane.xlu2 %1677 }
0x13e5   :  { %v1686_v15 = vmul.f32 %v1685_v10, %v1678_v18 }
0x13e7   :  { %v1687_v16 = vsub.f32 %v1674_v24, %v1686_v15 }
0x13e9   :  { %v1688_v22 = vmul.f32 %v1687_v16, %v1687_v16 }
0x13eb   :  { %v1689_v13 = vsel %vm1675_vm10, %v1688_v22, 0.0 }
0x13ec   :  { %1690 = vadd.xlane.f32.xlu0 %v1689_v13  ;;  %v1937_v13 = vld [vmem:[#allocation2 + $0x858] sm:$0xff] }
0x13ed   :  { %1980 = vmatpush.msra.mxu0 %v1937_v13 }
0x13ef   :  { %1981 = vmatpush.msra.mxu0 %v1936_v57  ;;  %v2324_v57 = vld [vmem:[#allocation5 + $0x36] ss:$0 sm:$0xff] }
0x13f1   :  { %1982 = vmatpush.msra.mxu0 %v1935_v19  ;;  %v2332_v19 = vld [vmem:[#allocation5 + $0x39] ss:$0 sm:$0xff] }
0x13f3   :  { %1983 = vmatpush.msra.mxu0 %v1934_v20 }
0x13f5   :  { %1984 = vmatpush.msra.mxu0 %v1933_v32 }
0x13f7   :  { %1985 = vmatpush.msra.mxu0 %v1932_v25 }
0x13f9   :  { %1986 = vmatpush.msra.mxu0 %v1931_v26 }
0x145f   :  { %v1691_v33 = vpop.xlane.xlu0 %1690 }
0x1460   :  { %v1692_v47 = vmul.f32 %v1691_v33, %v1685_v10  ;;  %v1930_v33 = vld [vmem:[#allocation2 + $0x820] sm:$0xff] }
0x1461   :  { %1987 = vmatpush.msra.mxu0 %v1930_v33 }
0x1462   :  { %v1693_v48 = vadd.f32 1e-05, %v1692_v47 }
0x1464   :  { %2384 = vrsqrt.f32 %v1693_v48  ;;  %vm1700_vm13 = vweird.f32 %v1693_v48 }
0x146a   :  { %v2385_v50 = vpop.eup %2384 }
0x146b   :  { %v1695_v43 = vmul.f32 %v2385_v50, %v1693_v48  ;;  %vm1701_vm12 = vweird.f32 %v2385_v50 }
0x146c   :  { %vm1702_vm14 = vmor %vm1700_vm13, %vm1701_vm12  ;;  %vm2209_vm12 = vcmask 125952  }
0x146d   :  { %v1696_v52 = vmul.f32 %v2385_v50, %v1695_v43 }
0x146f   :  { %v1697_v44 = vmul.f32 0.5, %v1696_v52 }
0x1471   :  { %v1698_v54 = vsub.f32 1.5, %v1697_v44 }
0x1473   :  { %v1699_v59 = vmul.f32 %v2385_v50, %v1698_v54  ;;  %v2327_v54 = vld [vmem:[#allocation5 + $0x31] ss:$0 sm:$0xff] }
0x1475   :  { %v1703_v46 = vsel %vm1702_vm14, %v2385_v50, %v1699_v59 }
0x1476   :  { %v1704_v0 = vmul.f32 %v1703_v46, %v1687_v16  ;;  %v2328_v46 = vld [vmem:[#allocation5 + $0x32] ss:$0 sm:$0xff] }
0x1478   :  { %v1709_v53 = vmul.f32 %v2322_v56, %v1704_v0 }
0x147a   :  { %v1714_v63 = vadd.f32 %v2323_v51, %v1709_v53 }
0x147c   :  { %v1715_v4 = vadd.f32 %v1714_v63, %v1298_v2 }
0x147e   :  { %2253 = vmatmul.msk.f32.vlgmr.msrb.gmra.mxu2 %vm459_vm5, %v1715_v4  ;;  %2254 = vmatmul.msk.f32.vlgmr.msra.gmra.mxu3 %vm459_vm5, %v1715_v4 }
0x147f   :  { %2038 = vmatpush.msrb.mxu2 %v2901_v55 }
0x1481   :  { %2039 = vmatpush.msrb.mxu2 %v2904_v58 }
0x1483   :  { %2040 = vmatpush.msrb.mxu2 %v2907_v60 }
0x1485   :  { %2041 = vmatpush.msrb.mxu2 %v2910_v61 }
0x1486   :  { %2257 = vmatmul.msk.f32.vlgmr.msra.gmra.mxu2 %vm459_vm5, %v1880_v17 }
0x1487   :  { %2144 = vmatpush.msra.mxu2 %v2901_v55  ;;  %v1943_v55 = vld [vmem:[#allocation2 + $0x888] sm:$0xff] }
0x1488   :  { %1959 = vmatpush.msrb.mxu3 %v1943_v55 }
0x1489   :  { %2145 = vmatpush.msra.mxu2 %v2904_v58  ;;  %v1942_v58 = vld [vmem:[#allocation2 + $0x880] sm:$0xff] }
0x148a   :  { %1960 = vmatpush.msrb.mxu3 %v1942_v58 }
0x148b   :  { %2146 = vmatpush.msra.mxu2 %v2907_v60 }
0x148d   :  { %2147 = vmatpush.msra.mxu2 %v2910_v61  ;;  %v1941_v61 = vld [vmem:[#allocation2 + $0x878] sm:$0xff] }
0x148e   :  { %1961 = vmatpush.msrb.mxu3 %v1941_v61  ;;  %v2074_v61 = vld [vmem:[#allocation2 + $0x930] sm:$0xff] }
0x1490   :  { %1962 = vmatpush.msrb.mxu3 %v1940_v38  ;;  %v2073_v38 = vld [vmem:[#allocation2 + $0x928] sm:$0xff] }
0x1492   :  { %1963 = vmatpush.msrb.mxu3 %v1939_v39 }
0x1494   :  { %1964 = vmatpush.msrb.mxu3 %v1938_v40 }
0x1501   :  { %v2964_v5 = vpop.f32.mrf.mxu2  ;;  %v1805_v31 = vpop.f32.mrf.mxu3 }
0x1502   :  { %v2966_v14 = vsub.f32 %v1715_v4, %v1805_v31  ;;  %v2414_v4 = vld [vmem:[#allocation5 + $0x7] sm:$0xf]  ;;  %v1773_v13 = vadd.f32 %v2964_v5, %v2948_v45 }
0x1503   :  { %v160_v6 = vperm.slane %v2414_v4, 3  ;;  %v2178_v5 = vld [vmem:[#allocation2 + $0x200] sm:$0xff] }
0x1504   :  { %v1809_v34 = vmul.f32 %v2966_v14, %v2966_v14 }
0x1505   :  { %v246_v35 = vadd.f32 %v2585_v11, %v160_v6 }
0x1506   :  { %2255 = vmatmul.msk.f32.vlgmr.msrb.gmra.mxu0 %vm459_vm5, %v1809_v34 }
0x1509   :  { %v1901_v37 = vpop.f32.mrf.mxu2 }
0x150a   :  { %v1902_v60 = vadd.f32 1e-05, %v1901_v37 }
0x150c   :  { %2386 = vrsqrt.f32 %v1902_v60  ;;  %vm1910_vm1 = vweird.f32 %v1902_v60 }
0x1512   :  { %v2387_v41 = vpop.eup %2386 }
0x1513   :  { %v1905_v42 = vmul.f32 %v2387_v41, %v1902_v60  ;;  %vm1911_vm15 = vweird.f32 %v2387_v41  ;;  %v2075_v60 = vld [vmem:[#allocation2 + $0x938] sm:$0xff] }
0x1514   :  { %vm1912_vm2 = vmor %vm1910_vm1, %vm1911_vm15  ;;  %2095 = vmatpush.msra.mxu3 %v2075_v60 }
0x1515   :  { %v1906_v1 = vmul.f32 %v2387_v41, %v1905_v42 }
0x1516   :  { %2096 = vmatpush.msra.mxu3 %v2074_v61 }
0x1517   :  { %v1907_v27 = vmul.f32 0.5, %v1906_v1 }
0x1518   :  { %2097 = vmatpush.msra.mxu3 %v2073_v38 }
0x1519   :  { %v1908_v24 = vsub.f32 1.5, %v1907_v27 }
0x151b   :  { %v1909_v28 = vmul.f32 %v2387_v41, %v1908_v24 }
0x151d   :  { %v1913_v30 = vsel %vm1912_vm2, %v2387_v41, %v1909_v28  ;;  %v2072_v41 = vld [vmem:[#allocation2 + $0x920] sm:$0xff] }
0x151e   :  { %v1914_v3 = vmul.f32 %v1913_v30, %v1879_v12  ;;  %v2329_v12 = vld [vmem:[#allocation5 + $0x35] ss:$0 sm:$0xff]  ;;  %2098 = vmatpush.msra.mxu3 %v2072_v41 }
0x1520   :  { %v1919_v8 = vmul.f32 %v2325_v29, %v1914_v3  ;;  %v2330_v29 = vld [vmem:[#allocation5 + $0x37] ss:$0 sm:$0xff] }
0x1522   :  { %v1924_v9 = vadd.f32 %v2326_v7, %v1919_v8  ;;  %v2331_v7 = vld [vmem:[#allocation5 + $0x38] ss:$0 sm:$0xff] }
0x1524   :  { %v1925_v10 = vmul.f32 0.5, %v1924_v9 }
0x1526   :  { %2388 = vtanh.f32 %v1925_v10 }
0x152c   :  { %v2389_v18 = vpop.eup %2388 }
0x152d   :  { %v1927_v15 = vmul.f32 0.5, %v2389_v18 }
0x152f   :  { %v1928_v16 = vadd.f32 0.5, %v1927_v15 }
0x1531   :  { %v1929_v22 = vmul.f32 %v1928_v16, %v1924_v9 }
0x1533   :  { %2258 = vmatmul.msk.f32.vlgmr.msrb.gmra.mxu3 %vm459_vm5, %v1929_v22 }
0x1583   :  { %v1830_v21 = vpop.f32.mrf.mxu0 }
0x1584   :  { %v1831_v23 = vadd.f32 1e-05, %v1830_v21  ;;  %v1779_v21 = vadd.f32 %v2324_v57, %v1773_v13 }
0x1586   :  { %2390 = vrsqrt.f32 %v1831_v23  ;;  %vm1839_vm4 = vweird.f32 %v1831_v23 }
0x158c   :  { %v2391_v47 = vpop.eup %2390 }
0x158d   :  { %v1834_v48 = vmul.f32 %v2391_v47, %v1831_v23  ;;  %vm1840_vm3 = vweird.f32 %v2391_v47 }
0x158e   :  { %vm1841_vm6 = vmor %vm1839_vm4, %vm1840_vm3 }
0x158f   :  { %v1835_v50 = vmul.f32 %v2391_v47, %v1834_v48  ;;  %v2180_v48 = vld [vmem:[#allocation2 + $0x210] sm:$0xff] }
0x1591   :  { %v1836_v43 = vmul.f32 0.5, %v1835_v50  ;;  %v2179_v50 = vld [vmem:[#allocation2 + $0x208] sm:$0xff] }
0x1593   :  { %v1837_v52 = vsub.f32 1.5, %v1836_v43 }
0x1595   :  { %v1838_v44 = vmul.f32 %v2391_v47, %v1837_v52 }
0x1597   :  { %v1842_v59 = vsel %vm1841_vm6, %v2391_v47, %v1838_v44  ;;  %v2181_v47 = vld [vmem:[#allocation2 + $0x218] sm:$0xff] }
0x1598   :  { %v1843_v56 = vmul.f32 %v1842_v59, %v2966_v14  ;;  %2201 = vmatpush.msrb.mxu3 %v2181_v47 }
0x159a   :  { %v1848_v49 = vmul.f32 %v2327_v54, %v1843_v56  ;;  %2202 = vmatpush.msrb.mxu3 %v2180_v48 }
0x159c   :  { %v1853_v62 = vadd.f32 %v2328_v46, %v1848_v49  ;;  %2203 = vmatpush.msrb.mxu3 %v2179_v50  ;;  %v2333_v49 = vld [vmem:[#allocation5 + $0x4] ss:$0 sm:$0xff] }
0x159e   :  { %v1854_v51 = vmul.f32 0.5, %v1853_v62  ;;  %2204 = vmatpush.msrb.mxu3 %v2178_v5 }
0x15a0   :  { %2392 = vtanh.f32 %v1854_v51 }
0x15a6   :  { %v2393_v0 = vpop.eup %2392 }
0x15a7   :  { %v1856_v53 = vmul.f32 0.5, %v2393_v0  ;;  %v2334_v0 = vld [vmem:[#allocation5 + $0x5] ss:$0 sm:$0xff] }
0x15a9   :  { %v1857_v2 = vadd.f32 0.5, %v1856_v53 }
0x15ab   :  { %v1858_v63 = vmul.f32 %v1857_v2, %v1853_v62 }
0x15ad   :  { %2259 = vmatmul.msk.f32.vlgmr.msra.gmra.mxu0 %vm459_vm5, %v1858_v63 }
0x15b6   :  { %v1966_v17 = vpop.f32.mrf.mxu3 }
0x162a   :  { %v1989_v31 = vpop.f32.mrf.mxu0 }
0x162b   :  { %v1990_v34 = vadd.f32 %v1989_v31, %v1966_v17  ;;  %v2335_v31 = vld [vmem:[#allocation5 + $0x6] ss:$0 sm:$0xff] }
0x162d   :  { %v1996_v14 = vadd.f32 %v2329_v12, %v1990_v34 }
0x162f   :  { %v1997_v36 = vadd.f32 %v1996_v14, %v246_v35 }
0x1631   :  { %2260 = vmatmul.msk.f32.vlgmr.msra.gmra.mxu1 %vm75_vm0, %v1997_v36 }
0x16ae   :  { %v2018_v55 = vpop.f32.mrf.mxu1 }
0x16af   :  { %v2021_v58 = vsub.f32 %v1997_v36, %v2018_v55 }
0x16b1   :  { %v2022_v37 = vmul.f32 %v2021_v58, %v2021_v58 }
0x16b3   :  { %2261 = vmatmul.msk.f32.vlgmr.msrb.gmra.mxu2 %vm75_vm0, %v2022_v37 }
0x1736   :  { %v2043_v39 = vpop.f32.mrf.mxu2 }
0x1737   :  { %v2044_v40 = vadd.f32 1e-05, %v2043_v39 }
0x1739   :  { %2394 = vrsqrt.f32 %v2044_v40  ;;  %vm2052_vm7 = vweird.f32 %v2044_v40 }
0x173f   :  { %v2395_v11 = vpop.eup %2394 }
0x1740   :  { %v2047_v42 = vmul.f32 %v2395_v11, %v2044_v40  ;;  %vm2053_vm5 = vweird.f32 %v2395_v11 }
0x1741   :  { %vm2054_vm8 = vmor %vm2052_vm7, %vm2053_vm5 }
0x1742   :  { %v2048_v1 = vmul.f32 %v2395_v11, %v2047_v42 }
0x1744   :  { %v2049_v27 = vmul.f32 0.5, %v2048_v1 }
0x1746   :  { %v2050_v24 = vsub.f32 1.5, %v2049_v27 }
0x1748   :  { %v2051_v28 = vmul.f32 %v2395_v11, %v2050_v24 }
0x174a   :  { %v2055_v30 = vsel %vm2054_vm8, %v2395_v11, %v2051_v28 }
0x174b   :  { %v2056_v3 = vmul.f32 %v2055_v30, %v2021_v58 }
0x174d   :  { %v2061_v8 = vmul.f32 %v2330_v29, %v2056_v3 }
0x174f   :  { %v2066_v9 = vadd.f32 %v2331_v7, %v2061_v8 }
0x1751   :  { %v2067_v10 = vmul.f32 0.5, %v2066_v9 }
0x1753   :  { %2396 = vtanh.f32 %v2067_v10 }
0x1759   :  { %v2397_v18 = vpop.eup %2396 }
0x175a   :  { %v2069_v15 = vmul.f32 0.5, %v2397_v18 }
0x175c   :  { %v2070_v16 = vadd.f32 0.5, %v2069_v15 }
0x175e   :  { %v2071_v22 = vmul.f32 %v2070_v16, %v2066_v9 }
0x1760   :  { %2262 = vmatmul.msk.f32.vlgmr.msra.gmra.mxu3 %vm75_vm0, %v2071_v22 }
0x17e3   :  { %v2100_v20 = vpop.f32.mrf.mxu3 }
0x17e4   :  { %v2101_v23 = vadd.f32 %v2332_v19, %v2100_v20 }
0x17e6   :  { %v2103_v32 = vadd.f32 %v2101_v23, %v1779_v21 }
0x17e8   :  { %2263 = vmatmul.msk.f32.vlgmr.msrb.gmra.mxu1 %vm75_vm0, %v2103_v32 }
0x1865   :  { %v2124_v25 = vpop.f32.mrf.mxu1 }
0x1866   :  { %v2127_v26 = vsub.f32 %v2103_v32, %v2124_v25 }
0x1868   :  { %v2128_v33 = vmul.f32 %v2127_v26, %v2127_v26 }
0x186a   :  { %2264 = vmatmul.msk.f32.vlgmr.msra.gmra.mxu2 %vm75_vm0, %v2128_v33 }
0x18ed   :  { %v2149_v43 = vpop.f32.mrf.mxu2 }
0x18ee   :  { %v2150_v45 = vadd.f32 1e-05, %v2149_v43 }
0x18f0   :  { %2398 = vrsqrt.f32 %v2150_v45  ;;  %vm2158_vm10 = vweird.f32 %v2150_v45 }
0x18f6   :  { %v2399_v52 = vpop.eup %2398 }
0x18f7   :  { %v2153_v44 = vmul.f32 %v2399_v52, %v2150_v45  ;;  %vm2159_vm9 = vweird.f32 %v2399_v52 }
0x18f8   :  { %vm2160_vm11 = vmor %vm2158_vm10, %vm2159_vm9 }
0x18f9   :  { %v2154_v54 = vmul.f32 %v2399_v52, %v2153_v44 }
0x18fb   :  { %v2155_v59 = vmul.f32 0.5, %v2154_v54 }
0x18fd   :  { %v2156_v56 = vsub.f32 1.5, %v2155_v59 }
0x18ff   :  { %v2157_v46 = vmul.f32 %v2399_v52, %v2156_v56 }
0x1901   :  { %v2161_v62 = vsel %vm2160_vm11, %v2399_v52, %v2157_v46 }
0x1902   :  { %v2162_v51 = vmul.f32 %v2161_v62, %v2127_v26 }
0x1904   :  { %v2167_v53 = vmul.f32 %v2333_v49, %v2162_v51 }
0x1906   :  { %v2172_v2 = vadd.f32 %v2334_v0, %v2167_v53 }
0x1908   :  { %v2173_v63 = vmul.f32 0.5, %v2172_v2 }
0x190a   :  { %2400 = vtanh.f32 %v2173_v63 }
0x1910   :  { %v2401_v4 = vpop.eup %2400 }
0x1911   :  { %v2175_v6 = vmul.f32 0.5, %v2401_v4 }
0x1913   :  { %v2176_v12 = vadd.f32 0.5, %v2175_v6 }
0x1915   :  { %v2177_v17 = vmul.f32 %v2176_v12, %v2172_v2 }
0x1917   :  { %2265 = vmatmul.msk.f32.vlgmr.msrb.gmra.mxu3 %vm75_vm0, %v2177_v17 }
0x199a   :  { %v2206_v34 = vpop.f32.mrf.mxu3 }
0x199b   :  { %v2207_v35 = vadd.f32 %v2335_v31, %v2206_v34 }
0x199d   :  { %2210 = vst.msk [vmem:[#allocation8] sm:$0xf] %vm2209_vm12, %v2207_v35 }
0x199e   :  { %2221 = dma.vmem_to_hbm [thread:$0]  %s2217_s10, 64, %s2219_s13, [#allocation4]  }
0x199f   :  { %2515 = dma.done.wait [#allocation4], 64  }
0x19a0   :  { %2516 = vsyncadd [#allocation4], 4294967232 }
0x19a1   :  { %2226 = vsyncpa [#allocation3], 1 }
0x19a2   :  { %2227 = vsyncpa [#allocation6], 1 }
0x19a3   :  { %2228 = vsyncpa [#allocation4], 1 }

</bundles_post_ra>
